<compile_context>
chip_gen: v6e
topology: v6e:2x2x1
jax: 0.10.0
libtpu: 0.0.40
codegen_flags: <defaults>
</compile_context>

<pallas_src>
import numpy as np
import jax
import jax.numpy as jnp
from jax import lax
from jax.experimental import pallas as pl
from jax.experimental.pallas import tpu as pltpu

BN_EPS = 1e-5


# ----------------------------- host-side helpers -----------------------------

def extract_patches(x_nhwc, k, pad):
    """im2col: (N,H,W,C) -> (N, H*W, k*k*C); column order = (dy*k+dx)*C + c."""
    N, H, W, C = x_nhwc.shape
    xp = jnp.pad(x_nhwc, ((0, 0), (pad, pad), (pad, pad), (0, 0)))
    cols = [xp[:, dy:dy + H, dx:dx + W, :] for dy in range(k) for dx in range(k)]
    p = jnp.stack(cols, axis=3)                     # (N, H, W, k*k, C)
    return p.reshape(N, H * W, k * k * C)


def conv_weight_matrix(w_oihw):
    """PyTorch (Cout,Cin,kh,kw) -> (kh*kw*Cin, Cout), matching extract_patches."""
    Cout, Cin, kh, kw = w_oihw.shape
    return jnp.transpose(w_oihw, (2, 3, 1, 0)).reshape(kh * kw * Cin, Cout)


def conv_tap_weights(w_oihw):
    """PyTorch (Cout,Cin,k,k) -> (k*k, Cin, Cout); tap order t = dy*k + dx."""
    Cout, Cin, kh, kw = w_oihw.shape
    w = jnp.transpose(w_oihw, (2, 3, 1, 0))         # (kh, kw, Cin, Cout)
    return w.reshape(kh * kw, Cin, Cout)


def interp_matrix(L_out, L_in):
    """1-D bilinear interpolation matrix, align_corners=True (PyTorch)."""
    A = np.zeros((L_out, L_in), np.float32)
    for o in range(L_out):
        src = o * (L_in - 1) / (L_out - 1) if L_out > 1 else 0.0
        i0 = min(int(np.floor(src)), L_in - 1)
        i1 = min(i0 + 1, L_in - 1)
        w1 = src - i0
        A[o, i0] += 1.0 - w1
        A[o, i1] += w1
    return A


def bn_scale_shift(gamma, beta, mean, var):
    scale = gamma / jnp.sqrt(var + BN_EPS)
    shift = beta - mean * scale
    return scale, shift


# ----------------------------- fused forward -----------------------------

def cnn_forward(x_nchw, params, dims=(16, 16)):
    x = jnp.transpose(x_nchw, (0, 2, 3, 1)).astype(jnp.float32)   # NCHW -> NHWC
    N, H, W, _ = x.shape
    Hout, Wout = dims
    H2, W2 = H // 2, W // 2            # grid after pool 1
    H3, W3 = H2 // 2, W2 // 2          # grid after pool 2
    C1, C2, C3 = 32, 8, 2
    K1, K2 = 5, 3
    KK1 = K1 * K1                      # Cin = 1
    KK1P = 32                          # pad contraction dim 25 -> 32

    # layer-1 im2col on the host (the input comes from HBM anyway); fold /100.
    p1 = extract_patches(x, K1, 2)                               # (N, H*W, 25)
    p1 = jnp.pad(p1, ((0, 0), (0, 0), (0, KK1P - KK1)))          # (N, H*W, 32)
    w1m = conv_weight_matrix(params["w1"]) / 100.0
    w1m = jnp.pad(w1m, ((0, KK1P - KK1), (0, 0)))                # (32, 32)

    sc1, sh1 = bn_scale_shift(params["g1"], params["be1"], params["rm1"], params["rv1"])
    sc2, sh2 = bn_scale_shift(params["g2"], params["be2"], params["rm2"], params["rv2"])

    w2t = conv_tap_weights(params["w2"])                         # (9, 32, 8)
    w3t = conv_tap_weights(params["w3"])                         # (9, 8, 2)

    # bilinear-upsample matrix, transposed so the head output is lane-dense.
    UT = jnp.asarray(np.kron(interp_matrix(Hout, H3),
                             interp_matrix(Wout, W3)).T)         # (H3*W3, Hout*Wout)

    taps = [(dy, dx) for dy in range(K2) for dx in range(K2)]

    def kernel(p1_ref, w1_ref, b1_ref, sc1_ref, sh1_ref,
               w2_ref, b2_ref, sc2_ref, sh2_ref,
               w3_ref, b3_ref, ut_ref, o_ref,
               hp1_ref, f1_ref, hp2_ref, f2_ref, y3_ref):
        # ---- layer 1: conv5x5 (single im2col matmul) + bias + ReLU + BN ----
        y1 = jnp.dot(p1_ref[0], w1_ref[...], preferred_element_type=jnp.float32)
        y1 = jnp.maximum(y1 + b1_ref[...], 0.0) * sc1_ref[...] + sh1_ref[...]  # (H*W, C1)

        # ---- 2x2 max-pool on the VPU ----
        # height: pair rows (2i, 2i+1) via a leading-dim split
        y1 = y1.reshape(H2, 2, W, C1)
        hp1_ref[...] = jnp.maximum(y1[:, 0], y1[:, 1]).reshape(H2 * W, C1)
        # width: pair columns (2j, 2j+1) via strided sublane reads
        pooled1 = jnp.maximum(hp1_ref[pl.ds(0, H2 * W2, stride=2), :],
                              hp1_ref[pl.ds(1, H2 * W2, stride=2), :])         # (H2*W2, C1)

        # stage into a zero-padded map for the layer-2 3x3 taps
        f1_ref[...] = jnp.zeros_like(f1_ref)
        f1_ref[pl.ds(1, H2), pl.ds(1, W2), :] = pooled1.reshape(H2, W2, C1)

        # ---- layer 2: conv3x3 as 9 per-tap matmuls + bias + ReLU + BN ----
        acc2 = jnp.zeros((H2 * W2, C2), jnp.float32)
        for t, (dy, dx) in enumerate(taps):
            tap = f1_ref[pl.ds(dy, H2), pl.ds(dx, W2), :].reshape(H2 * W2, C1)
            acc2 = acc2 + jnp.dot(tap, w2_ref[t], preferred_element_type=jnp.float32)
        y2 = jnp.maximum(acc2 + b2_ref[...], 0.0) * sc2_ref[...] + sh2_ref[...]  # (H2*W2, C2)

        # ---- 2x2 max-pool on the VPU ----
        y2 = y2.reshape(H3, 2, W2, C2)
        hp2_ref[...] = jnp.maximum(y2[:, 0], y2[:, 1]).reshape(H3 * W2, C2)
        f2_ref[...] = jnp.zeros_like(f2_ref)
        for i in range(H3):
            row = jnp.maximum(hp2_ref[pl.ds(i * W2, W3, stride=2), :],
                              hp2_ref[pl.ds(i * W2 + 1, W3, stride=2), :])      # (W3, C2)
            f2_ref[1 + i, pl.ds(1, W3), :] = row

        # ---- layer 3: conv3x3 + bias (per output row; keeps slices tile friendly) ----
        for a in range(H3):
            acc3 = jnp.zeros((W3, C3), jnp.float32)
            for t, (dy, dx) in enumerate(taps):
                tap = f2_ref[a + dy, pl.ds(dx, W3), :]                          # (W3, C2)
                acc3 = acc3 + jnp.dot(tap, w3_ref[t], preferred_element_type=jnp.float32)
            y3_ref[pl.ds(a * W3, W3), :] = acc3 + b3_ref[...]

        # ---- bilinear upsample (align_corners=True) + tanh * 128 ----
        # lane-dense output: out^T = y3^T @ U^T, expressed as a dot_general
        # contracting dim 0 of both operands (MXU trans-A path, no transpose op).
        up = lax.dot_general(y3_ref[...], ut_ref[...],
                             dimension_numbers=(((0,), (0,)), ((), ())),
                             preferred_element_type=jnp.float32)                # (C3, Hout*Wout)
        o_ref[0] = (jnp.tanh(up) * 128.0).astype(o_ref.dtype)

    out = pl.pallas_call(
        kernel,
        out_shape=jax.ShapeDtypeStruct((N, C3, Hout * Wout), jnp.float32),
        grid_spec=pltpu.PrefetchScalarGridSpec(
            num_scalar_prefetch=0,
            grid=(N,),
            in_specs=[
                pl.BlockSpec((1, H * W, KK1P), lambda n: (n, 0, 0)),   # p1 patches
                pl.BlockSpec((KK1P, C1), lambda n: (0, 0)),            # w1
                pl.BlockSpec((1, C1), lambda n: (0, 0)),               # b1
                pl.BlockSpec((1, C1), lambda n: (0, 0)),               # bn1 scale
                pl.BlockSpec((1, C1), lambda n: (0, 0)),               # bn1 shift
                pl.BlockSpec((K2 * K2, C1, C2), lambda n: (0, 0, 0)),  # w2 taps
                pl.BlockSpec((1, C2), lambda n: (0, 0)),               # b2
                pl.BlockSpec((1, C2), lambda n: (0, 0)),               # bn2 scale
                pl.BlockSpec((1, C2), lambda n: (0, 0)),               # bn2 shift
                pl.BlockSpec((K2 * K2, C2, C3), lambda n: (0, 0, 0)),  # w3 taps
                pl.BlockSpec((1, C3), lambda n: (0, 0)),               # b3
                pl.BlockSpec((H3 * W3, Hout * Wout), lambda n: (0, 0)),  # U^T
            ],
            out_specs=pl.BlockSpec((1, C3, Hout * Wout), lambda n: (n, 0, 0)),
            scratch_shapes=[
                pltpu.VMEM((H2 * W, C1), jnp.float32),          # height-pooled L1
                pltpu.VMEM((H2 + 2, W2 + 2, C1), jnp.float32),  # padded map for L2
                pltpu.VMEM((H3 * W2, C2), jnp.float32),         # height-pooled L2
                pltpu.VMEM((H3 + 2, W3 + 2, C2), jnp.float32),  # padded map for L3
                pltpu.VMEM((H3 * W3, C3), jnp.float32),         # L3 conv output
            ],
        ),
        compiler_params=pltpu.CompilerParams(dimension_semantics=("parallel",)),
    )(p1, w1m,
      params["b1"].reshape(1, -1), sc1.reshape(1, -1), sh1.reshape(1, -1),
      w2t, params["b2"].reshape(1, -1), sc2.reshape(1, -1), sh2.reshape(1, -1),
      w3t, params["b3"].reshape(1, -1), UT)

    return out.reshape(N, C3, Hout, Wout)                        # already NCHW


# ----------------------------- pure-JAX reference -----------------------------

def cnn_reference(x_nchw, params, dims=(16, 16)):
    x = jnp.transpose(x_nchw, (0, 2, 3, 1)).astype(jnp.float32) / 100.0
    sc1, sh1 = bn_scale_shift(params["g1"], params["be1"], params["rm1"], params["rv1"])
    sc2, sh2 = bn_scale_shift(params["g2"], params["be2"], params["rm2"], params["rv2"])

    def conv(x, w, b, pad):
        wh = jnp.transpose(w, (2, 3, 1, 0))  # OIHW -> HWIO
        y = jax.lax.conv_general_dilated(
            x, wh, (1, 1), [(pad, pad), (pad, pad)],
            dimension_numbers=("NHWC", "HWIO", "NHWC"))
        return y + b

    def pool(x):
        return jax.lax.reduce_window(x, -jnp.inf, jax.lax.max,
                                     (1, 2, 2, 1), (1, 2, 2, 1), "VALID")

    y = pool(jnp.maximum(conv(x, params["w1"], params["b1"], 2), 0.0) * sc1 + sh1)
    y = pool(jnp.maximum(conv(y, params["w2"], params["b2"], 1), 0.0) * sc2 + sh2)
    y = conv(y, params["w3"], params["b3"], 1)
    Ah = jnp.asarray(interp_matrix(dims[0], y.shape[1]))
    Aw = jnp.asarray(interp_matrix(dims[1], y.shape[2]))
    y = jnp.einsum("oh,nhwc->nowc", Ah, y)
    y = jnp.einsum("pw,nowc->nopc", Aw, y)
    y = jnp.tanh(y) * 128.0
    return jnp.transpose(y, (0, 3, 1, 2))


# ----------------------------- main -----------------------------

if __name__ == "__main__":
    key = jax.random.PRNGKey(0)
    ks = jax.random.split(key, 17)

    params = {
        # Conv2d(1, 32, k=5, p=2)
        "w1": jax.random.normal(ks[0], (32, 1, 5, 5), jnp.float32) * 0.2,
        "b1": jax.random.normal(ks[1], (32,), jnp.float32) * 0.1,
        "g1": 1.0 + 0.1 * jax.random.normal(ks[2], (32,), jnp.float32),
        "be1": 0.1 * jax.random.normal(ks[3], (32,), jnp.float32),
        "rm1": 0.1 * jax.random.normal(ks[4], (32,), jnp.float32),
        "rv1": jax.random.uniform(ks[5], (32,), jnp.float32, 0.5, 1.5),
        # Conv2d(32, 8, k=3, p=1)
        "w2": jax.random.normal(ks[6], (8, 32, 3, 3), jnp.float32) * 0.1,
        "b2": jax.random.normal(ks[7], (8,), jnp.float32) * 0.1,
        "g2": 1.0 + 0.1 * jax.random.normal(ks[8], (8,), jnp.float32),
        "be2": 0.1 * jax.random.normal(ks[9], (8,), jnp.float32),
        "rm2": 0.1 * jax.random.normal(ks[10], (8,), jnp.float32),
        "rv2": jax.random.uniform(ks[11], (8,), jnp.float32, 0.5, 1.5),
        # Conv2d(8, 2, k=3, p=1)
        "w3": jax.random.normal(ks[12], (2, 8, 3, 3), jnp.float32) * 0.2,
        "b3": jax.random.normal(ks[13], (2,), jnp.float32) * 0.1,
    }

    # L-channel-like input in roughly [0, 100], NCHW, spatial 16x16.
    x = jax.random.uniform(ks[16], (2, 1, 16, 16), jnp.float32, 0.0, 100.0)

    out = cnn_forward(x, params, dims=(16, 16))
    out = jax.block_until_ready(out)
    assert out.shape == (2, 2, 16, 16), out.shape

    ref = cnn_reference(x, params, dims=(16, 16))
    err = float(jnp.max(jnp.abs(out - ref)))
    if err > 2e-2:
        raise AssertionError(f"Pallas output mismatch vs reference, max abs err = {err}")
    print("KERNEL_OK")
</pallas_src>

<mosaic_0001>
module attributes {stable_mosaic.version = 11 : i64} {
  func.func @kernel(%arg0: i32, %arg1: memref<1x256x32xf32, #tpu.memory_space<vmem>>, %arg2: memref<32x32xf32, #tpu.memory_space<vmem>>, %arg3: memref<1x32xf32, #tpu.memory_space<vmem>>, %arg4: memref<1x32xf32, #tpu.memory_space<vmem>>, %arg5: memref<1x32xf32, #tpu.memory_space<vmem>>, %arg6: memref<9x32x8xf32, #tpu.memory_space<vmem>>, %arg7: memref<1x8xf32, #tpu.memory_space<vmem>>, %arg8: memref<1x8xf32, #tpu.memory_space<vmem>>, %arg9: memref<1x8xf32, #tpu.memory_space<vmem>>, %arg10: memref<9x8x2xf32, #tpu.memory_space<vmem>>, %arg11: memref<1x2xf32, #tpu.memory_space<vmem>>, %arg12: memref<16x256xf32, #tpu.memory_space<vmem>>, %arg13: memref<1x2x256xf32, #tpu.memory_space<vmem>>, %arg14: memref<128x32xf32, #tpu.memory_space<vmem>>, %arg15: memref<10x10x32xf32, #tpu.memory_space<vmem>>, %arg16: memref<32x8xf32, #tpu.memory_space<vmem>>, %arg17: memref<6x6x8xf32, #tpu.memory_space<vmem>>, %arg18: memref<16x2xf32, #tpu.memory_space<vmem>>) attributes {dimension_semantics = [#tpu.dimension_semantics<parallel>], iteration_bounds = array<i64: 2>, scalar_prefetch = 0 : i64, scratch_operands = 5 : i64, tpu.core_type = #tpu.core_type<tc>, window_params = [{transform_indices = @transform_0, window_bounds = array<i64: 1, 256, 32>}, {pipeline_mode = #tpu.pipeline_mode<synchronous>, transform_indices = @transform_1, window_bounds = array<i64: 32, 32>}, {pipeline_mode = #tpu.pipeline_mode<synchronous>, transform_indices = @transform_2, window_bounds = array<i64: 1, 32>}, {pipeline_mode = #tpu.pipeline_mode<synchronous>, transform_indices = @transform_3, window_bounds = array<i64: 1, 32>}, {pipeline_mode = #tpu.pipeline_mode<synchronous>, transform_indices = @transform_4, window_bounds = array<i64: 1, 32>}, {pipeline_mode = #tpu.pipeline_mode<synchronous>, transform_indices = @transform_5, window_bounds = array<i64: 9, 32, 8>}, {pipeline_mode = #tpu.pipeline_mode<synchronous>, transform_indices = @transform_6, window_bounds = array<i64: 1, 8>}, {pipeline_mode = #tpu.pipeline_mode<synchronous>, transform_indices = @transform_7, window_bounds = array<i64: 1, 8>}, {pipeline_mode = #tpu.pipeline_mode<synchronous>, transform_indices = @transform_8, window_bounds = array<i64: 1, 8>}, {pipeline_mode = #tpu.pipeline_mode<synchronous>, transform_indices = @transform_9, window_bounds = array<i64: 9, 8, 2>}, {pipeline_mode = #tpu.pipeline_mode<synchronous>, transform_indices = @transform_10, window_bounds = array<i64: 1, 2>}, {pipeline_mode = #tpu.pipeline_mode<synchronous>, transform_indices = @transform_11, window_bounds = array<i64: 16, 256>}, {transform_indices = @transform_12, window_bounds = array<i64: 1, 2, 256>}]} {
    %c0 = arith.constant 0 : index
    %c0_0 = arith.constant 0 : index
    %c0_1 = arith.constant 0 : index
    %0 = vector.load %arg1[%c0, %c0_0, %c0_1] : memref<1x256x32xf32, #tpu.memory_space<vmem>>, vector<1x256x32xf32>
    %1 = vector.shape_cast %0 : vector<1x256x32xf32> to vector<256x32xf32>
    %c0_2 = arith.constant 0 : index
    %c0_3 = arith.constant 0 : index
    %2 = vector.load %arg2[%c0_2, %c0_3] : memref<32x32xf32, #tpu.memory_space<vmem>>, vector<32x32xf32>
    %cst = arith.constant dense<0.000000e+00> : vector<256x32xf32>
    %3 = tpu.matmul %1, %2, %cst {dimension_numbers = #tpu.dot_dimension_numbers<[1], [0], [0], [1], [0, 0, 1, 1], [], []>} : vector<256x32xf32>, vector<32x32xf32>, vector<256x32xf32> -> vector<256x32xf32>
    %c0_4 = arith.constant 0 : index
    %c0_5 = arith.constant 0 : index
    %4 = vector.load %arg3[%c0_4, %c0_5] : memref<1x32xf32, #tpu.memory_space<vmem>>, vector<1x32xf32>
    %5 = vector.broadcast %4 : vector<1x32xf32> to vector<256x32xf32>
    %6 = arith.addf %3, %5 : vector<256x32xf32>
    %cst_6 = arith.constant 0.000000e+00 : f32
    %7 = vector.broadcast %cst_6 : f32 to vector<256x32xf32>
    %8 = arith.maximumf %6, %7 : vector<256x32xf32>
    %c0_7 = arith.constant 0 : index
    %c0_8 = arith.constant 0 : index
    %9 = vector.load %arg4[%c0_7, %c0_8] : memref<1x32xf32, #tpu.memory_space<vmem>>, vector<1x32xf32>
    %10 = vector.broadcast %9 : vector<1x32xf32> to vector<256x32xf32>
    %11 = arith.mulf %8, %10 : vector<256x32xf32>
    %c0_9 = arith.constant 0 : index
    %c0_10 = arith.constant 0 : index
    %12 = vector.load %arg5[%c0_9, %c0_10] : memref<1x32xf32, #tpu.memory_space<vmem>>, vector<1x32xf32>
    %13 = vector.broadcast %12 : vector<1x32xf32> to vector<256x32xf32>
    %14 = arith.addf %11, %13 : vector<256x32xf32>
    %15 = vector.shape_cast %14 : vector<256x32xf32> to vector<8x2x16x32xf32>
    %16 = vector.extract_strided_slice %15 {offsets = [0, 0, 0, 0], sizes = [8, 1, 16, 32], strides = [1, 1, 1, 1]} : vector<8x2x16x32xf32> to vector<8x1x16x32xf32>
    %17 = vector.shape_cast %16 : vector<8x1x16x32xf32> to vector<8x16x32xf32>
    %18 = vector.extract_strided_slice %15 {offsets = [0, 1, 0, 0], sizes = [8, 1, 16, 32], strides = [1, 1, 1, 1]} : vector<8x2x16x32xf32> to vector<8x1x16x32xf32>
    %19 = vector.shape_cast %18 : vector<8x1x16x32xf32> to vector<8x16x32xf32>
    %20 = arith.maximumf %17, %19 : vector<8x16x32xf32>
    %21 = vector.shape_cast %20 : vector<8x16x32xf32> to vector<128x32xf32>
    %c0_11 = arith.constant 0 : index
    %c0_12 = arith.constant 0 : index
    %22 = vector.load %arg14[%c0_11, %c0_12] : memref<128x32xf32, #tpu.memory_space<vmem>>, vector<128x32xf32>
    tpu.vector_store %arg14[%c0_11, %c0_12], %21 {strides = array<i32>} : memref<128x32xf32, #tpu.memory_space<vmem>>, vector<128x32xf32>,
    %c0_13 = arith.constant 0 : index
    %c0_14 = arith.constant 0 : index
    %23 = tpu.strided_load %arg14[%c0_13, %c0_14] {strides = array<i32: 2, 1>} : memref<128x32xf32, #tpu.memory_space<vmem>>, vector<64x32xf32>
    %c1 = arith.constant 1 : index
    %c0_15 = arith.constant 0 : index
    %24 = tpu.strided_load %arg14[%c1, %c0_15] {strides = array<i32: 2, 1>} : memref<128x32xf32, #tpu.memory_space<vmem>>, vector<64x32xf32>
    %25 = arith.maximumf %23, %24 : vector<64x32xf32>
    %cst_16 = arith.constant 0.000000e+00 : f32
    %26 = vector.broadcast %cst_16 : f32 to vector<10x10x32xf32>
    %c0_17 = arith.constant 0 : index
    %c0_18 = arith.constant 0 : index
    %c0_19 = arith.constant 0 : index
    %27 = vector.load %arg15[%c0_17, %c0_18, %c0_19] : memref<10x10x32xf32, #tpu.memory_space<vmem>>, vector<10x10x32xf32>
    tpu.vector_store %arg15[%c0_17, %c0_18, %c0_19], %26 {strides = array<i32>} : memref<10x10x32xf32, #tpu.memory_space<vmem>>, vector<10x10x32xf32>,
    %28 = vector.shape_cast %25 : vector<64x32xf32> to vector<8x8x32xf32>
    %c1_20 = arith.constant 1 : index
    %c1_21 = arith.constant 1 : index
    %c0_22 = arith.constant 0 : index
    %29 = vector.load %arg15[%c1_20, %c1_21, %c0_22] : memref<10x10x32xf32, #tpu.memory_space<vmem>>, vector<8x8x32xf32>
    tpu.vector_store %arg15[%c1_20, %c1_21, %c0_22], %28 {strides = array<i32>} : memref<10x10x32xf32, #tpu.memory_space<vmem>>, vector<8x8x32xf32>,
    %cst_23 = arith.constant 0.000000e+00 : f32
    %30 = vector.broadcast %cst_23 : f32 to vector<64x8xf32>
    %c0_24 = arith.constant 0 : index
    %c0_25 = arith.constant 0 : index
    %c0_26 = arith.constant 0 : index
    %31 = vector.load %arg15[%c0_24, %c0_25, %c0_26] : memref<10x10x32xf32, #tpu.memory_space<vmem>>, vector<8x8x32xf32>
    %32 = vector.shape_cast %31 : vector<8x8x32xf32> to vector<64x32xf32>
    %c0_27 = arith.constant 0 : index
    %c0_28 = arith.constant 0 : index
    %c0_29 = arith.constant 0 : index
    %33 = vector.load %arg6[%c0_27, %c0_28, %c0_29] : memref<9x32x8xf32, #tpu.memory_space<vmem>>, vector<1x32x8xf32>
    %34 = vector.shape_cast %33 : vector<1x32x8xf32> to vector<32x8xf32>
    %cst_30 = arith.constant dense<0.000000e+00> : vector<64x8xf32>
    %35 = tpu.matmul %32, %34, %cst_30 {dimension_numbers = #tpu.dot_dimension_numbers<[1], [0], [0], [1], [0, 0, 1, 1], [], []>} : vector<64x32xf32>, vector<32x8xf32>, vector<64x8xf32> -> vector<64x8xf32>
    %36 = arith.addf %30, %35 : vector<64x8xf32>
    %c0_31 = arith.constant 0 : index
    %c1_32 = arith.constant 1 : index
    %c0_33 = arith.constant 0 : index
    %37 = vector.load %arg15[%c0_31, %c1_32, %c0_33] : memref<10x10x32xf32, #tpu.memory_space<vmem>>, vector<8x8x32xf32>
    %38 = vector.shape_cast %37 : vector<8x8x32xf32> to vector<64x32xf32>
    %c1_34 = arith.constant 1 : index
    %c0_35 = arith.constant 0 : index
    %c0_36 = arith.constant 0 : index
    %39 = vector.load %arg6[%c1_34, %c0_35, %c0_36] : memref<9x32x8xf32, #tpu.memory_space<vmem>>, vector<1x32x8xf32>
    %40 = vector.shape_cast %39 : vector<1x32x8xf32> to vector<32x8xf32>
    %cst_37 = arith.constant dense<0.000000e+00> : vector<64x8xf32>
    %41 = tpu.matmul %38, %40, %cst_37 {dimension_numbers = #tpu.dot_dimension_numbers<[1], [0], [0], [1], [0, 0, 1, 1], [], []>} : vector<64x32xf32>, vector<32x8xf32>, vector<64x8xf32> -> vector<64x8xf32>
    %42 = arith.addf %36, %41 : vector<64x8xf32>
    %c0_38 = arith.constant 0 : index
    %c2 = arith.constant 2 : index
    %c0_39 = arith.constant 0 : index
    %43 = vector.load %arg15[%c0_38, %c2, %c0_39] : memref<10x10x32xf32, #tpu.memory_space<vmem>>, vector<8x8x32xf32>
    %44 = vector.shape_cast %43 : vector<8x8x32xf32> to vector<64x32xf32>
    %c2_40 = arith.constant 2 : index
    %c0_41 = arith.constant 0 : index
    %c0_42 = arith.constant 0 : index
    %45 = vector.load %arg6[%c2_40, %c0_41, %c0_42] : memref<9x32x8xf32, #tpu.memory_space<vmem>>, vector<1x32x8xf32>
    %46 = vector.shape_cast %45 : vector<1x32x8xf32> to vector<32x8xf32>
    %cst_43 = arith.constant dense<0.000000e+00> : vector<64x8xf32>
    %47 = tpu.matmul %44, %46, %cst_43 {dimension_numbers = #tpu.dot_dimension_numbers<[1], [0], [0], [1], [0, 0, 1, 1], [], []>} : vector<64x32xf32>, vector<32x8xf32>, vector<64x8xf32> -> vector<64x8xf32>
    %48 = arith.addf %42, %47 : vector<64x8xf32>
    %c1_44 = arith.constant 1 : index
    %c0_45 = arith.constant 0 : index
    %c0_46 = arith.constant 0 : index
    %49 = vector.load %arg15[%c1_44, %c0_45, %c0_46] : memref<10x10x32xf32, #tpu.memory_space<vmem>>, vector<8x8x32xf32>
    %50 = vector.shape_cast %49 : vector<8x8x32xf32> to vector<64x32xf32>
    %c3 = arith.constant 3 : index
    %c0_47 = arith.constant 0 : index
    %c0_48 = arith.constant 0 : index
    %51 = vector.load %arg6[%c3, %c0_47, %c0_48] : memref<9x32x8xf32, #tpu.memory_space<vmem>>, vector<1x32x8xf32>
    %52 = vector.shape_cast %51 : vector<1x32x8xf32> to vector<32x8xf32>
    %cst_49 = arith.constant dense<0.000000e+00> : vector<64x8xf32>
    %53 = tpu.matmul %50, %52, %cst_49 {dimension_numbers = #tpu.dot_dimension_numbers<[1], [0], [0], [1], [0, 0, 1, 1], [], []>} : vector<64x32xf32>, vector<32x8xf32>, vector<64x8xf32> -> vector<64x8xf32>
    %54 = arith.addf %48, %53 : vector<64x8xf32>
    %c1_50 = arith.constant 1 : index
    %c1_51 = arith.constant 1 : index
    %c0_52 = arith.constant 0 : index
    %55 = vector.load %arg15[%c1_50, %c1_51, %c0_52] : memref<10x10x32xf32, #tpu.memory_space<vmem>>, vector<8x8x32xf32>
    %56 = vector.shape_cast %55 : vector<8x8x32xf32> to vector<64x32xf32>
    %c4 = arith.constant 4 : index
    %c0_53 = arith.constant 0 : index
    %c0_54 = arith.constant 0 : index
    %57 = vector.load %arg6[%c4, %c0_53, %c0_54] : memref<9x32x8xf32, #tpu.memory_space<vmem>>, vector<1x32x8xf32>
    %58 = vector.shape_cast %57 : vector<1x32x8xf32> to vector<32x8xf32>
    %cst_55 = arith.constant dense<0.000000e+00> : vector<64x8xf32>
    %59 = tpu.matmul %56, %58, %cst_55 {dimension_numbers = #tpu.dot_dimension_numbers<[1], [0], [0], [1], [0, 0, 1, 1], [], []>} : vector<64x32xf32>, vector<32x8xf32>, vector<64x8xf32> -> vector<64x8xf32>
    %60 = arith.addf %54, %59 : vector<64x8xf32>
    %c1_56 = arith.constant 1 : index
    %c2_57 = arith.constant 2 : index
    %c0_58 = arith.constant 0 : index
    %61 = vector.load %arg15[%c1_56, %c2_57, %c0_58] : memref<10x10x32xf32, #tpu.memory_space<vmem>>, vector<8x8x32xf32>
    %62 = vector.shape_cast %61 : vector<8x8x32xf32> to vector<64x32xf32>
    %c5 = arith.constant 5 : index
    %c0_59 = arith.constant 0 : index
    %c0_60 = arith.constant 0 : index
    %63 = vector.load %arg6[%c5, %c0_59, %c0_60] : memref<9x32x8xf32, #tpu.memory_space<vmem>>, vector<1x32x8xf32>
    %64 = vector.shape_cast %63 : vector<1x32x8xf32> to vector<32x8xf32>
    %cst_61 = arith.constant dense<0.000000e+00> : vector<64x8xf32>
    %65 = tpu.matmul %62, %64, %cst_61 {dimension_numbers = #tpu.dot_dimension_numbers<[1], [0], [0], [1], [0, 0, 1, 1], [], []>} : vector<64x32xf32>, vector<32x8xf32>, vector<64x8xf32> -> vector<64x8xf32>
    %66 = arith.addf %60, %65 : vector<64x8xf32>
    %c2_62 = arith.constant 2 : index
    %c0_63 = arith.constant 0 : index
    %c0_64 = arith.constant 0 : index
    %67 = vector.load %arg15[%c2_62, %c0_63, %c0_64] : memref<10x10x32xf32, #tpu.memory_space<vmem>>, vector<8x8x32xf32>
    %68 = vector.shape_cast %67 : vector<8x8x32xf32> to vector<64x32xf32>
    %c6 = arith.constant 6 : index
    %c0_65 = arith.constant 0 : index
    %c0_66 = arith.constant 0 : index
    %69 = vector.load %arg6[%c6, %c0_65, %c0_66] : memref<9x32x8xf32, #tpu.memory_space<vmem>>, vector<1x32x8xf32>
    %70 = vector.shape_cast %69 : vector<1x32x8xf32> to vector<32x8xf32>
    %cst_67 = arith.constant dense<0.000000e+00> : vector<64x8xf32>
    %71 = tpu.matmul %68, %70, %cst_67 {dimension_numbers = #tpu.dot_dimension_numbers<[1], [0], [0], [1], [0, 0, 1, 1], [], []>} : vector<64x32xf32>, vector<32x8xf32>, vector<64x8xf32> -> vector<64x8xf32>
    %72 = arith.addf %66, %71 : vector<64x8xf32>
    %c2_68 = arith.constant 2 : index
    %c1_69 = arith.constant 1 : index
    %c0_70 = arith.constant 0 : index
    %73 = vector.load %arg15[%c2_68, %c1_69, %c0_70] : memref<10x10x32xf32, #tpu.memory_space<vmem>>, vector<8x8x32xf32>
    %74 = vector.shape_cast %73 : vector<8x8x32xf32> to vector<64x32xf32>
    %c7 = arith.constant 7 : index
    %c0_71 = arith.constant 0 : index
    %c0_72 = arith.constant 0 : index
    %75 = vector.load %arg6[%c7, %c0_71, %c0_72] : memref<9x32x8xf32, #tpu.memory_space<vmem>>, vector<1x32x8xf32>
    %76 = vector.shape_cast %75 : vector<1x32x8xf32> to vector<32x8xf32>
    %cst_73 = arith.constant dense<0.000000e+00> : vector<64x8xf32>
    %77 = tpu.matmul %74, %76, %cst_73 {dimension_numbers = #tpu.dot_dimension_numbers<[1], [0], [0], [1], [0, 0, 1, 1], [], []>} : vector<64x32xf32>, vector<32x8xf32>, vector<64x8xf32> -> vector<64x8xf32>
    %78 = arith.addf %72, %77 : vector<64x8xf32>
    %c2_74 = arith.constant 2 : index
    %c2_75 = arith.constant 2 : index
    %c0_76 = arith.constant 0 : index
    %79 = vector.load %arg15[%c2_74, %c2_75, %c0_76] : memref<10x10x32xf32, #tpu.memory_space<vmem>>, vector<8x8x32xf32>
    %80 = vector.shape_cast %79 : vector<8x8x32xf32> to vector<64x32xf32>
    %c8 = arith.constant 8 : index
    %c0_77 = arith.constant 0 : index
    %c0_78 = arith.constant 0 : index
    %81 = vector.load %arg6[%c8, %c0_77, %c0_78] : memref<9x32x8xf32, #tpu.memory_space<vmem>>, vector<1x32x8xf32>
    %82 = vector.shape_cast %81 : vector<1x32x8xf32> to vector<32x8xf32>
    %cst_79 = arith.constant dense<0.000000e+00> : vector<64x8xf32>
    %83 = tpu.matmul %80, %82, %cst_79 {dimension_numbers = #tpu.dot_dimension_numbers<[1], [0], [0], [1], [0, 0, 1, 1], [], []>} : vector<64x32xf32>, vector<32x8xf32>, vector<64x8xf32> -> vector<64x8xf32>
    %84 = arith.addf %78, %83 : vector<64x8xf32>
    %c0_80 = arith.constant 0 : index
    %c0_81 = arith.constant 0 : index
    %85 = vector.load %arg7[%c0_80, %c0_81] : memref<1x8xf32, #tpu.memory_space<vmem>>, vector<1x8xf32>
    %86 = vector.broadcast %85 : vector<1x8xf32> to vector<64x8xf32>
    %87 = arith.addf %84, %86 : vector<64x8xf32>
    %cst_82 = arith.constant 0.000000e+00 : f32
    %88 = vector.broadcast %cst_82 : f32 to vector<64x8xf32>
    %89 = arith.maximumf %87, %88 : vector<64x8xf32>
    %c0_83 = arith.constant 0 : index
    %c0_84 = arith.constant 0 : index
    %90 = vector.load %arg8[%c0_83, %c0_84] : memref<1x8xf32, #tpu.memory_space<vmem>>, vector<1x8xf32>
    %91 = vector.broadcast %90 : vector<1x8xf32> to vector<64x8xf32>
    %92 = arith.mulf %89, %91 : vector<64x8xf32>
    %c0_85 = arith.constant 0 : index
    %c0_86 = arith.constant 0 : index
    %93 = vector.load %arg9[%c0_85, %c0_86] : memref<1x8xf32, #tpu.memory_space<vmem>>, vector<1x8xf32>
    %94 = vector.broadcast %93 : vector<1x8xf32> to vector<64x8xf32>
    %95 = arith.addf %92, %94 : vector<64x8xf32>
    %96 = vector.shape_cast %95 : vector<64x8xf32> to vector<4x2x8x8xf32>
    %97 = vector.extract_strided_slice %96 {offsets = [0, 0, 0, 0], sizes = [4, 1, 8, 8], strides = [1, 1, 1, 1]} : vector<4x2x8x8xf32> to vector<4x1x8x8xf32>
    %98 = vector.shape_cast %97 : vector<4x1x8x8xf32> to vector<4x8x8xf32>
    %99 = vector.extract_strided_slice %96 {offsets = [0, 1, 0, 0], sizes = [4, 1, 8, 8], strides = [1, 1, 1, 1]} : vector<4x2x8x8xf32> to vector<4x1x8x8xf32>
    %100 = vector.shape_cast %99 : vector<4x1x8x8xf32> to vector<4x8x8xf32>
    %101 = arith.maximumf %98, %100 : vector<4x8x8xf32>
    %102 = vector.shape_cast %101 : vector<4x8x8xf32> to vector<32x8xf32>
    %c0_87 = arith.constant 0 : index
    %c0_88 = arith.constant 0 : index
    %103 = vector.load %arg16[%c0_87, %c0_88] : memref<32x8xf32, #tpu.memory_space<vmem>>, vector<32x8xf32>
    tpu.vector_store %arg16[%c0_87, %c0_88], %102 {strides = array<i32>} : memref<32x8xf32, #tpu.memory_space<vmem>>, vector<32x8xf32>,
    %cst_89 = arith.constant 0.000000e+00 : f32
    %104 = vector.broadcast %cst_89 : f32 to vector<6x6x8xf32>
    %c0_90 = arith.constant 0 : index
    %c0_91 = arith.constant 0 : index
    %c0_92 = arith.constant 0 : index
    %105 = vector.load %arg17[%c0_90, %c0_91, %c0_92] : memref<6x6x8xf32, #tpu.memory_space<vmem>>, vector<6x6x8xf32>
    tpu.vector_store %arg17[%c0_90, %c0_91, %c0_92], %104 {strides = array<i32>} : memref<6x6x8xf32, #tpu.memory_space<vmem>>, vector<6x6x8xf32>,
    %c0_93 = arith.constant 0 : index
    %c0_94 = arith.constant 0 : index
    %106 = tpu.strided_load %arg16[%c0_93, %c0_94] {strides = array<i32: 2, 1>} : memref<32x8xf32, #tpu.memory_space<vmem>>, vector<4x8xf32>
    %c1_95 = arith.constant 1 : index
    %c0_96 = arith.constant 0 : index
    %107 = tpu.strided_load %arg16[%c1_95, %c0_96] {strides = array<i32: 2, 1>} : memref<32x8xf32, #tpu.memory_space<vmem>>, vector<4x8xf32>
    %108 = arith.maximumf %106, %107 : vector<4x8xf32>
    %c1_97 = arith.constant 1 : index
    %c1_98 = arith.constant 1 : index
    %c0_99 = arith.constant 0 : index
    %109 = vector.load %arg17[%c1_97, %c1_98, %c0_99] : memref<6x6x8xf32, #tpu.memory_space<vmem>>, vector<1x4x8xf32>
    %110 = vector.shape_cast %109 : vector<1x4x8xf32> to vector<4x8xf32>
    %111 = vector.shape_cast %108 : vector<4x8xf32> to vector<1x4x8xf32>
    tpu.vector_store %arg17[%c1_97, %c1_98, %c0_99], %111 {strides = array<i32>} : memref<6x6x8xf32, #tpu.memory_space<vmem>>, vector<1x4x8xf32>,
    %c8_100 = arith.constant 8 : index
    %c0_101 = arith.constant 0 : index
    %112 = tpu.strided_load %arg16[%c8_100, %c0_101] {strides = array<i32: 2, 1>} : memref<32x8xf32, #tpu.memory_space<vmem>>, vector<4x8xf32>
    %c9 = arith.constant 9 : index
    %c0_102 = arith.constant 0 : index
    %113 = tpu.strided_load %arg16[%c9, %c0_102] {strides = array<i32: 2, 1>} : memref<32x8xf32, #tpu.memory_space<vmem>>, vector<4x8xf32>
    %114 = arith.maximumf %112, %113 : vector<4x8xf32>
    %c2_103 = arith.constant 2 : index
    %c1_104 = arith.constant 1 : index
    %c0_105 = arith.constant 0 : index
    %115 = vector.load %arg17[%c2_103, %c1_104, %c0_105] : memref<6x6x8xf32, #tpu.memory_space<vmem>>, vector<1x4x8xf32>
    %116 = vector.shape_cast %115 : vector<1x4x8xf32> to vector<4x8xf32>
    %117 = vector.shape_cast %114 : vector<4x8xf32> to vector<1x4x8xf32>
    tpu.vector_store %arg17[%c2_103, %c1_104, %c0_105], %117 {strides = array<i32>} : memref<6x6x8xf32, #tpu.memory_space<vmem>>, vector<1x4x8xf32>,
    %c16 = arith.constant 16 : index
    %c0_106 = arith.constant 0 : index
    %118 = tpu.strided_load %arg16[%c16, %c0_106] {strides = array<i32: 2, 1>} : memref<32x8xf32, #tpu.memory_space<vmem>>, vector<4x8xf32>
    %c17 = arith.constant 17 : index
    %c0_107 = arith.constant 0 : index
    %119 = tpu.strided_load %arg16[%c17, %c0_107] {strides = array<i32: 2, 1>} : memref<32x8xf32, #tpu.memory_space<vmem>>, vector<4x8xf32>
    %120 = arith.maximumf %118, %119 : vector<4x8xf32>
    %c3_108 = arith.constant 3 : index
    %c1_109 = arith.constant 1 : index
    %c0_110 = arith.constant 0 : index
    %121 = vector.load %arg17[%c3_108, %c1_109, %c0_110] : memref<6x6x8xf32, #tpu.memory_space<vmem>>, vector<1x4x8xf32>
    %122 = vector.shape_cast %121 : vector<1x4x8xf32> to vector<4x8xf32>
    %123 = vector.shape_cast %120 : vector<4x8xf32> to vector<1x4x8xf32>
    tpu.vector_store %arg17[%c3_108, %c1_109, %c0_110], %123 {strides = array<i32>} : memref<6x6x8xf32, #tpu.memory_space<vmem>>, vector<1x4x8xf32>,
    %c24 = arith.constant 24 : index
    %c0_111 = arith.constant 0 : index
    %124 = tpu.strided_load %arg16[%c24, %c0_111] {strides = array<i32: 2, 1>} : memref<32x8xf32, #tpu.memory_space<vmem>>, vector<4x8xf32>
    %c25 = arith.constant 25 : index
    %c0_112 = arith.constant 0 : index
    %125 = tpu.strided_load %arg16[%c25, %c0_112] {strides = array<i32: 2, 1>} : memref<32x8xf32, #tpu.memory_space<vmem>>, vector<4x8xf32>
    %126 = arith.maximumf %124, %125 : vector<4x8xf32>
    %c4_113 = arith.constant 4 : index
    %c1_114 = arith.constant 1 : index
    %c0_115 = arith.constant 0 : index
    %127 = vector.load %arg17[%c4_113, %c1_114, %c0_115] : memref<6x6x8xf32, #tpu.memory_space<vmem>>, vector<1x4x8xf32>
    %128 = vector.shape_cast %127 : vector<1x4x8xf32> to vector<4x8xf32>
    %129 = vector.shape_cast %126 : vector<4x8xf32> to vector<1x4x8xf32>
    tpu.vector_store %arg17[%c4_113, %c1_114, %c0_115], %129 {strides = array<i32>} : memref<6x6x8xf32, #tpu.memory_space<vmem>>, vector<1x4x8xf32>,
    %cst_116 = arith.constant 0.000000e+00 : f32
    %130 = vector.broadcast %cst_116 : f32 to vector<4x2xf32>
    %c0_117 = arith.constant 0 : index
    %c0_118 = arith.constant 0 : index
    %c0_119 = arith.constant 0 : index
    %131 = vector.load %arg17[%c0_117, %c0_118, %c0_119] : memref<6x6x8xf32, #tpu.memory_space<vmem>>, vector<1x4x8xf32>
    %132 = vector.shape_cast %131 : vector<1x4x8xf32> to vector<4x8xf32>
    %c0_120 = arith.constant 0 : index
    %c0_121 = arith.constant 0 : index
    %c0_122 = arith.constant 0 : index
    %133 = vector.load %arg10[%c0_120, %c0_121, %c0_122] : memref<9x8x2xf32, #tpu.memory_space<vmem>>, vector<1x8x2xf32>
    %134 = vector.shape_cast %133 : vector<1x8x2xf32> to vector<8x2xf32>
    %cst_123 = arith.constant dense<0.000000e+00> : vector<4x2xf32>
    %135 = tpu.matmul %132, %134, %cst_123 {dimension_numbers = #tpu.dot_dimension_numbers<[1], [0], [0], [1], [0, 0, 1, 1], [], []>} : vector<4x8xf32>, vector<8x2xf32>, vector<4x2xf32> -> vector<4x2xf32>
    %136 = arith.addf %130, %135 : vector<4x2xf32>
    %c0_124 = arith.constant 0 : index
    %c1_125 = arith.constant 1 : index
    %c0_126 = arith.constant 0 : index
    %137 = vector.load %arg17[%c0_124, %c1_125, %c0_126] : memref<6x6x8xf32, #tpu.memory_space<vmem>>, vector<1x4x8xf32>
    %138 = vector.shape_cast %137 : vector<1x4x8xf32> to vector<4x8xf32>
    %c1_127 = arith.constant 1 : index
    %c0_128 = arith.constant 0 : index
    %c0_129 = arith.constant 0 : index
    %139 = vector.load %arg10[%c1_127, %c0_128, %c0_129] : memref<9x8x2xf32, #tpu.memory_space<vmem>>, vector<1x8x2xf32>
    %140 = vector.shape_cast %139 : vector<1x8x2xf32> to vector<8x2xf32>
    %cst_130 = arith.constant dense<0.000000e+00> : vector<4x2xf32>
    %141 = tpu.matmul %138, %140, %cst_130 {dimension_numbers = #tpu.dot_dimension_numbers<[1], [0], [0], [1], [0, 0, 1, 1], [], []>} : vector<4x8xf32>, vector<8x2xf32>, vector<4x2xf32> -> vector<4x2xf32>
    %142 = arith.addf %136, %141 : vector<4x2xf32>
    %c0_131 = arith.constant 0 : index
    %c2_132 = arith.constant 2 : index
    %c0_133 = arith.constant 0 : index
    %143 = vector.load %arg17[%c0_131, %c2_132, %c0_133] : memref<6x6x8xf32, #tpu.memory_space<vmem>>, vector<1x4x8xf32>
    %144 = vector.shape_cast %143 : vector<1x4x8xf32> to vector<4x8xf32>
    %c2_134 = arith.constant 2 : index
    %c0_135 = arith.constant 0 : index
    %c0_136 = arith.constant 0 : index
    %145 = vector.load %arg10[%c2_134, %c0_135, %c0_136] : memref<9x8x2xf32, #tpu.memory_space<vmem>>, vector<1x8x2xf32>
    %146 = vector.shape_cast %145 : vector<1x8x2xf32> to vector<8x2xf32>
    %cst_137 = arith.constant dense<0.000000e+00> : vector<4x2xf32>
    %147 = tpu.matmul %144, %146, %cst_137 {dimension_numbers = #tpu.dot_dimension_numbers<[1], [0], [0], [1], [0, 0, 1, 1], [], []>} : vector<4x8xf32>, vector<8x2xf32>, vector<4x2xf32> -> vector<4x2xf32>
    %148 = arith.addf %142, %147 : vector<4x2xf32>
    %c1_138 = arith.constant 1 : index
    %c0_139 = arith.constant 0 : index
    %c0_140 = arith.constant 0 : index
    %149 = vector.load %arg17[%c1_138, %c0_139, %c0_140] : memref<6x6x8xf32, #tpu.memory_space<vmem>>, vector<1x4x8xf32>
    %150 = vector.shape_cast %149 : vector<1x4x8xf32> to vector<4x8xf32>
    %c3_141 = arith.constant 3 : index
    %c0_142 = arith.constant 0 : index
    %c0_143 = arith.constant 0 : index
    %151 = vector.load %arg10[%c3_141, %c0_142, %c0_143] : memref<9x8x2xf32, #tpu.memory_space<vmem>>, vector<1x8x2xf32>
    %152 = vector.shape_cast %151 : vector<1x8x2xf32> to vector<8x2xf32>
    %cst_144 = arith.constant dense<0.000000e+00> : vector<4x2xf32>
    %153 = tpu.matmul %150, %152, %cst_144 {dimension_numbers = #tpu.dot_dimension_numbers<[1], [0], [0], [1], [0, 0, 1, 1], [], []>} : vector<4x8xf32>, vector<8x2xf32>, vector<4x2xf32> -> vector<4x2xf32>
    %154 = arith.addf %148, %153 : vector<4x2xf32>
    %c1_145 = arith.constant 1 : index
    %c1_146 = arith.constant 1 : index
    %c0_147 = arith.constant 0 : index
    %155 = vector.load %arg17[%c1_145, %c1_146, %c0_147] : memref<6x6x8xf32, #tpu.memory_space<vmem>>, vector<1x4x8xf32>
    %156 = vector.shape_cast %155 : vector<1x4x8xf32> to vector<4x8xf32>
    %c4_148 = arith.constant 4 : index
    %c0_149 = arith.constant 0 : index
    %c0_150 = arith.constant 0 : index
    %157 = vector.load %arg10[%c4_148, %c0_149, %c0_150] : memref<9x8x2xf32, #tpu.memory_space<vmem>>, vector<1x8x2xf32>
    %158 = vector.shape_cast %157 : vector<1x8x2xf32> to vector<8x2xf32>
    %cst_151 = arith.constant dense<0.000000e+00> : vector<4x2xf32>
    %159 = tpu.matmul %156, %158, %cst_151 {dimension_numbers = #tpu.dot_dimension_numbers<[1], [0], [0], [1], [0, 0, 1, 1], [], []>} : vector<4x8xf32>, vector<8x2xf32>, vector<4x2xf32> -> vector<4x2xf32>
    %160 = arith.addf %154, %159 : vector<4x2xf32>
    %c1_152 = arith.constant 1 : index
    %c2_153 = arith.constant 2 : index
    %c0_154 = arith.constant 0 : index
    %161 = vector.load %arg17[%c1_152, %c2_153, %c0_154] : memref<6x6x8xf32, #tpu.memory_space<vmem>>, vector<1x4x8xf32>
    %162 = vector.shape_cast %161 : vector<1x4x8xf32> to vector<4x8xf32>
    %c5_155 = arith.constant 5 : index
    %c0_156 = arith.constant 0 : index
    %c0_157 = arith.constant 0 : index
    %163 = vector.load %arg10[%c5_155, %c0_156, %c0_157] : memref<9x8x2xf32, #tpu.memory_space<vmem>>, vector<1x8x2xf32>
    %164 = vector.shape_cast %163 : vector<1x8x2xf32> to vector<8x2xf32>
    %cst_158 = arith.constant dense<0.000000e+00> : vector<4x2xf32>
    %165 = tpu.matmul %162, %164, %cst_158 {dimension_numbers = #tpu.dot_dimension_numbers<[1], [0], [0], [1], [0, 0, 1, 1], [], []>} : vector<4x8xf32>, vector<8x2xf32>, vector<4x2xf32> -> vector<4x2xf32>
    %166 = arith.addf %160, %165 : vector<4x2xf32>
    %c2_159 = arith.constant 2 : index
    %c0_160 = arith.constant 0 : index
    %c0_161 = arith.constant 0 : index
    %167 = vector.load %arg17[%c2_159, %c0_160, %c0_161] : memref<6x6x8xf32, #tpu.memory_space<vmem>>, vector<1x4x8xf32>
    %168 = vector.shape_cast %167 : vector<1x4x8xf32> to vector<4x8xf32>
    %c6_162 = arith.constant 6 : index
    %c0_163 = arith.constant 0 : index
    %c0_164 = arith.constant 0 : index
    %169 = vector.load %arg10[%c6_162, %c0_163, %c0_164] : memref<9x8x2xf32, #tpu.memory_space<vmem>>, vector<1x8x2xf32>
    %170 = vector.shape_cast %169 : vector<1x8x2xf32> to vector<8x2xf32>
    %cst_165 = arith.constant dense<0.000000e+00> : vector<4x2xf32>
    %171 = tpu.matmul %168, %170, %cst_165 {dimension_numbers = #tpu.dot_dimension_numbers<[1], [0], [0], [1], [0, 0, 1, 1], [], []>} : vector<4x8xf32>, vector<8x2xf32>, vector<4x2xf32> -> vector<4x2xf32>
    %172 = arith.addf %166, %171 : vector<4x2xf32>
    %c2_166 = arith.constant 2 : index
    %c1_167 = arith.constant 1 : index
    %c0_168 = arith.constant 0 : index
    %173 = vector.load %arg17[%c2_166, %c1_167, %c0_168] : memref<6x6x8xf32, #tpu.memory_space<vmem>>, vector<1x4x8xf32>
    %174 = vector.shape_cast %173 : vector<1x4x8xf32> to vector<4x8xf32>
    %c7_169 = arith.constant 7 : index
    %c0_170 = arith.constant 0 : index
    %c0_171 = arith.constant 0 : index
    %175 = vector.load %arg10[%c7_169, %c0_170, %c0_171] : memref<9x8x2xf32, #tpu.memory_space<vmem>>, vector<1x8x2xf32>
    %176 = vector.shape_cast %175 : vector<1x8x2xf32> to vector<8x2xf32>
    %cst_172 = arith.constant dense<0.000000e+00> : vector<4x2xf32>
    %177 = tpu.matmul %174, %176, %cst_172 {dimension_numbers = #tpu.dot_dimension_numbers<[1], [0], [0], [1], [0, 0, 1, 1], [], []>} : vector<4x8xf32>, vector<8x2xf32>, vector<4x2xf32> -> vector<4x2xf32>
    %178 = arith.addf %172, %177 : vector<4x2xf32>
    %c2_173 = arith.constant 2 : index
    %c2_174 = arith.constant 2 : index
    %c0_175 = arith.constant 0 : index
    %179 = vector.load %arg17[%c2_173, %c2_174, %c0_175] : memref<6x6x8xf32, #tpu.memory_space<vmem>>, vector<1x4x8xf32>
    %180 = vector.shape_cast %179 : vector<1x4x8xf32> to vector<4x8xf32>
    %c8_176 = arith.constant 8 : index
    %c0_177 = arith.constant 0 : index
    %c0_178 = arith.constant 0 : index
    %181 = vector.load %arg10[%c8_176, %c0_177, %c0_178] : memref<9x8x2xf32, #tpu.memory_space<vmem>>, vector<1x8x2xf32>
    %182 = vector.shape_cast %181 : vector<1x8x2xf32> to vector<8x2xf32>
    %cst_179 = arith.constant dense<0.000000e+00> : vector<4x2xf32>
    %183 = tpu.matmul %180, %182, %cst_179 {dimension_numbers = #tpu.dot_dimension_numbers<[1], [0], [0], [1], [0, 0, 1, 1], [], []>} : vector<4x8xf32>, vector<8x2xf32>, vector<4x2xf32> -> vector<4x2xf32>
    %184 = arith.addf %178, %183 : vector<4x2xf32>
    %c0_180 = arith.constant 0 : index
    %c0_181 = arith.constant 0 : index
    %185 = vector.load %arg11[%c0_180, %c0_181] : memref<1x2xf32, #tpu.memory_space<vmem>>, vector<1x2xf32>
    %186 = vector.broadcast %185 : vector<1x2xf32> to vector<4x2xf32>
    %187 = arith.addf %184, %186 : vector<4x2xf32>
    %c0_182 = arith.constant 0 : index
    %c0_183 = arith.constant 0 : index
    %188 = vector.load %arg18[%c0_182, %c0_183] : memref<16x2xf32, #tpu.memory_space<vmem>>, vector<4x2xf32>
    tpu.vector_store %arg18[%c0_182, %c0_183], %187 {strides = array<i32>} : memref<16x2xf32, #tpu.memory_space<vmem>>, vector<4x2xf32>,
    %cst_184 = arith.constant 0.000000e+00 : f32
    %189 = vector.broadcast %cst_184 : f32 to vector<4x2xf32>
    %c1_185 = arith.constant 1 : index
    %c0_186 = arith.constant 0 : index
    %c0_187 = arith.constant 0 : index
    %190 = vector.load %arg17[%c1_185, %c0_186, %c0_187] : memref<6x6x8xf32, #tpu.memory_space<vmem>>, vector<1x4x8xf32>
    %191 = vector.shape_cast %190 : vector<1x4x8xf32> to vector<4x8xf32>
    %c0_188 = arith.constant 0 : index
    %c0_189 = arith.constant 0 : index
    %c0_190 = arith.constant 0 : index
    %192 = vector.load %arg10[%c0_188, %c0_189, %c0_190] : memref<9x8x2xf32, #tpu.memory_space<vmem>>, vector<1x8x2xf32>
    %193 = vector.shape_cast %192 : vector<1x8x2xf32> to vector<8x2xf32>
    %cst_191 = arith.constant dense<0.000000e+00> : vector<4x2xf32>
    %194 = tpu.matmul %191, %193, %cst_191 {dimension_numbers = #tpu.dot_dimension_numbers<[1], [0], [0], [1], [0, 0, 1, 1], [], []>} : vector<4x8xf32>, vector<8x2xf32>, vector<4x2xf32> -> vector<4x2xf32>
    %195 = arith.addf %189, %194 : vector<4x2xf32>
    %c1_192 = arith.constant 1 : index
    %c1_193 = arith.constant 1 : index
    %c0_194 = arith.constant 0 : index
    %196 = vector.load %arg17[%c1_192, %c1_193, %c0_194] : memref<6x6x8xf32, #tpu.memory_space<vmem>>, vector<1x4x8xf32>
    %197 = vector.shape_cast %196 : vector<1x4x8xf32> to vector<4x8xf32>
    %c1_195 = arith.constant 1 : index
    %c0_196 = arith.constant 0 : index
    %c0_197 = arith.constant 0 : index
    %198 = vector.load %arg10[%c1_195, %c0_196, %c0_197] : memref<9x8x2xf32, #tpu.memory_space<vmem>>, vector<1x8x2xf32>
    %199 = vector.shape_cast %198 : vector<1x8x2xf32> to vector<8x2xf32>
    %cst_198 = arith.constant dense<0.000000e+00> : vector<4x2xf32>
    %200 = tpu.matmul %197, %199, %cst_198 {dimension_numbers = #tpu.dot_dimension_numbers<[1], [0], [0], [1], [0, 0, 1, 1], [], []>} : vector<4x8xf32>, vector<8x2xf32>, vector<4x2xf32> -> vector<4x2xf32>
    %201 = arith.addf %195, %200 : vector<4x2xf32>
    %c1_199 = arith.constant 1 : index
    %c2_200 = arith.constant 2 : index
    %c0_201 = arith.constant 0 : index
    %202 = vector.load %arg17[%c1_199, %c2_200, %c0_201] : memref<6x6x8xf32, #tpu.memory_space<vmem>>, vector<1x4x8xf32>
    %203 = vector.shape_cast %202 : vector<1x4x8xf32> to vector<4x8xf32>
    %c2_202 = arith.constant 2 : index
    %c0_203 = arith.constant 0 : index
    %c0_204 = arith.constant 0 : index
    %204 = vector.load %arg10[%c2_202, %c0_203, %c0_204] : memref<9x8x2xf32, #tpu.memory_space<vmem>>, vector<1x8x2xf32>
    %205 = vector.shape_cast %204 : vector<1x8x2xf32> to vector<8x2xf32>
    %cst_205 = arith.constant dense<0.000000e+00> : vector<4x2xf32>
    %206 = tpu.matmul %203, %205, %cst_205 {dimension_numbers = #tpu.dot_dimension_numbers<[1], [0], [0], [1], [0, 0, 1, 1], [], []>} : vector<4x8xf32>, vector<8x2xf32>, vector<4x2xf32> -> vector<4x2xf32>
    %207 = arith.addf %201, %206 : vector<4x2xf32>
    %c2_206 = arith.constant 2 : index
    %c0_207 = arith.constant 0 : index
    %c0_208 = arith.constant 0 : index
    %208 = vector.load %arg17[%c2_206, %c0_207, %c0_208] : memref<6x6x8xf32, #tpu.memory_space<vmem>>, vector<1x4x8xf32>
    %209 = vector.shape_cast %208 : vector<1x4x8xf32> to vector<4x8xf32>
    %c3_209 = arith.constant 3 : index
    %c0_210 = arith.constant 0 : index
    %c0_211 = arith.constant 0 : index
    %210 = vector.load %arg10[%c3_209, %c0_210, %c0_211] : memref<9x8x2xf32, #tpu.memory_space<vmem>>, vector<1x8x2xf32>
    %211 = vector.shape_cast %210 : vector<1x8x2xf32> to vector<8x2xf32>
    %cst_212 = arith.constant dense<0.000000e+00> : vector<4x2xf32>
    %212 = tpu.matmul %209, %211, %cst_212 {dimension_numbers = #tpu.dot_dimension_numbers<[1], [0], [0], [1], [0, 0, 1, 1], [], []>} : vector<4x8xf32>, vector<8x2xf32>, vector<4x2xf32> -> vector<4x2xf32>
    %213 = arith.addf %207, %212 : vector<4x2xf32>
    %c2_213 = arith.constant 2 : index
    %c1_214 = arith.constant 1 : index
    %c0_215 = arith.constant 0 : index
    %214 = vector.load %arg17[%c2_213, %c1_214, %c0_215] : memref<6x6x8xf32, #tpu.memory_space<vmem>>, vector<1x4x8xf32>
    %215 = vector.shape_cast %214 : vector<1x4x8xf32> to vector<4x8xf32>
    %c4_216 = arith.constant 4 : index
    %c0_217 = arith.constant 0 : index
    %c0_218 = arith.constant 0 : index
    %216 = vector.load %arg10[%c4_216, %c0_217, %c0_218] : memref<9x8x2xf32, #tpu.memory_space<vmem>>, vector<1x8x2xf32>
    %217 = vector.shape_cast %216 : vector<1x8x2xf32> to vector<8x2xf32>
    %cst_219 = arith.constant dense<0.000000e+00> : vector<4x2xf32>
    %218 = tpu.matmul %215, %217, %cst_219 {dimension_numbers = #tpu.dot_dimension_numbers<[1], [0], [0], [1], [0, 0, 1, 1], [], []>} : vector<4x8xf32>, vector<8x2xf32>, vector<4x2xf32> -> vector<4x2xf32>
    %219 = arith.addf %213, %218 : vector<4x2xf32>
    %c2_220 = arith.constant 2 : index
    %c2_221 = arith.constant 2 : index
    %c0_222 = arith.constant 0 : index
    %220 = vector.load %arg17[%c2_220, %c2_221, %c0_222] : memref<6x6x8xf32, #tpu.memory_space<vmem>>, vector<1x4x8xf32>
    %221 = vector.shape_cast %220 : vector<1x4x8xf32> to vector<4x8xf32>
    %c5_223 = arith.constant 5 : index
    %c0_224 = arith.constant 0 : index
    %c0_225 = arith.constant 0 : index
    %222 = vector.load %arg10[%c5_223, %c0_224, %c0_225] : memref<9x8x2xf32, #tpu.memory_space<vmem>>, vector<1x8x2xf32>
    %223 = vector.shape_cast %222 : vector<1x8x2xf32> to vector<8x2xf32>
    %cst_226 = arith.constant dense<0.000000e+00> : vector<4x2xf32>
    %224 = tpu.matmul %221, %223, %cst_226 {dimension_numbers = #tpu.dot_dimension_numbers<[1], [0], [0], [1], [0, 0, 1, 1], [], []>} : vector<4x8xf32>, vector<8x2xf32>, vector<4x2xf32> -> vector<4x2xf32>
    %225 = arith.addf %219, %224 : vector<4x2xf32>
    %c3_227 = arith.constant 3 : index
    %c0_228 = arith.constant 0 : index
    %c0_229 = arith.constant 0 : index
    %226 = vector.load %arg17[%c3_227, %c0_228, %c0_229] : memref<6x6x8xf32, #tpu.memory_space<vmem>>, vector<1x4x8xf32>
    %227 = vector.shape_cast %226 : vector<1x4x8xf32> to vector<4x8xf32>
    %c6_230 = arith.constant 6 : index
    %c0_231 = arith.constant 0 : index
    %c0_232 = arith.constant 0 : index
    %228 = vector.load %arg10[%c6_230, %c0_231, %c0_232] : memref<9x8x2xf32, #tpu.memory_space<vmem>>, vector<1x8x2xf32>
    %229 = vector.shape_cast %228 : vector<1x8x2xf32> to vector<8x2xf32>
    %cst_233 = arith.constant dense<0.000000e+00> : vector<4x2xf32>
    %230 = tpu.matmul %227, %229, %cst_233 {dimension_numbers = #tpu.dot_dimension_numbers<[1], [0], [0], [1], [0, 0, 1, 1], [], []>} : vector<4x8xf32>, vector<8x2xf32>, vector<4x2xf32> -> vector<4x2xf32>
    %231 = arith.addf %225, %230 : vector<4x2xf32>
    %c3_234 = arith.constant 3 : index
    %c1_235 = arith.constant 1 : index
    %c0_236 = arith.constant 0 : index
    %232 = vector.load %arg17[%c3_234, %c1_235, %c0_236] : memref<6x6x8xf32, #tpu.memory_space<vmem>>, vector<1x4x8xf32>
    %233 = vector.shape_cast %232 : vector<1x4x8xf32> to vector<4x8xf32>
    %c7_237 = arith.constant 7 : index
    %c0_238 = arith.constant 0 : index
    %c0_239 = arith.constant 0 : index
    %234 = vector.load %arg10[%c7_237, %c0_238, %c0_239] : memref<9x8x2xf32, #tpu.memory_space<vmem>>, vector<1x8x2xf32>
    %235 = vector.shape_cast %234 : vector<1x8x2xf32> to vector<8x2xf32>
    %cst_240 = arith.constant dense<0.000000e+00> : vector<4x2xf32>
    %236 = tpu.matmul %233, %235, %cst_240 {dimension_numbers = #tpu.dot_dimension_numbers<[1], [0], [0], [1], [0, 0, 1, 1], [], []>} : vector<4x8xf32>, vector<8x2xf32>, vector<4x2xf32> -> vector<4x2xf32>
    %237 = arith.addf %231, %236 : vector<4x2xf32>
    %c3_241 = arith.constant 3 : index
    %c2_242 = arith.constant 2 : index
    %c0_243 = arith.constant 0 : index
    %238 = vector.load %arg17[%c3_241, %c2_242, %c0_243] : memref<6x6x8xf32, #tpu.memory_space<vmem>>, vector<1x4x8xf32>
    %239 = vector.shape_cast %238 : vector<1x4x8xf32> to vector<4x8xf32>
    %c8_244 = arith.constant 8 : index
    %c0_245 = arith.constant 0 : index
    %c0_246 = arith.constant 0 : index
    %240 = vector.load %arg10[%c8_244, %c0_245, %c0_246] : memref<9x8x2xf32, #tpu.memory_space<vmem>>, vector<1x8x2xf32>
    %241 = vector.shape_cast %240 : vector<1x8x2xf32> to vector<8x2xf32>
    %cst_247 = arith.constant dense<0.000000e+00> : vector<4x2xf32>
    %242 = tpu.matmul %239, %241, %cst_247 {dimension_numbers = #tpu.dot_dimension_numbers<[1], [0], [0], [1], [0, 0, 1, 1], [], []>} : vector<4x8xf32>, vector<8x2xf32>, vector<4x2xf32> -> vector<4x2xf32>
    %243 = arith.addf %237, %242 : vector<4x2xf32>
    %c0_248 = arith.constant 0 : index
    %c0_249 = arith.constant 0 : index
    %244 = vector.load %arg11[%c0_248, %c0_249] : memref<1x2xf32, #tpu.memory_space<vmem>>, vector<1x2xf32>
    %245 = vector.broadcast %244 : vector<1x2xf32> to vector<4x2xf32>
    %246 = arith.addf %243, %245 : vector<4x2xf32>
    %c4_250 = arith.constant 4 : index
    %c0_251 = arith.constant 0 : index
    %247 = vector.load %arg18[%c4_250, %c0_251] : memref<16x2xf32, #tpu.memory_space<vmem>>, vector<4x2xf32>
    tpu.vector_store %arg18[%c4_250, %c0_251], %246 {strides = array<i32>} : memref<16x2xf32, #tpu.memory_space<vmem>>, vector<4x2xf32>,
    %cst_252 = arith.constant 0.000000e+00 : f32
    %248 = vector.broadcast %cst_252 : f32 to vector<4x2xf32>
    %c2_253 = arith.constant 2 : index
    %c0_254 = arith.constant 0 : index
    %c0_255 = arith.constant 0 : index
    %249 = vector.load %arg17[%c2_253, %c0_254, %c0_255] : memref<6x6x8xf32, #tpu.memory_space<vmem>>, vector<1x4x8xf32>
    %250 = vector.shape_cast %249 : vector<1x4x8xf32> to vector<4x8xf32>
    %c0_256 = arith.constant 0 : index
    %c0_257 = arith.constant 0 : index
    %c0_258 = arith.constant 0 : index
    %251 = vector.load %arg10[%c0_256, %c0_257, %c0_258] : memref<9x8x2xf32, #tpu.memory_space<vmem>>, vector<1x8x2xf32>
    %252 = vector.shape_cast %251 : vector<1x8x2xf32> to vector<8x2xf32>
    %cst_259 = arith.constant dense<0.000000e+00> : vector<4x2xf32>
    %253 = tpu.matmul %250, %252, %cst_259 {dimension_numbers = #tpu.dot_dimension_numbers<[1], [0], [0], [1], [0, 0, 1, 1], [], []>} : vector<4x8xf32>, vector<8x2xf32>, vector<4x2xf32> -> vector<4x2xf32>
    %254 = arith.addf %248, %253 : vector<4x2xf32>
    %c2_260 = arith.constant 2 : index
    %c1_261 = arith.constant 1 : index
    %c0_262 = arith.constant 0 : index
    %255 = vector.load %arg17[%c2_260, %c1_261, %c0_262] : memref<6x6x8xf32, #tpu.memory_space<vmem>>, vector<1x4x8xf32>
    %256 = vector.shape_cast %255 : vector<1x4x8xf32> to vector<4x8xf32>
    %c1_263 = arith.constant 1 : index
    %c0_264 = arith.constant 0 : index
    %c0_265 = arith.constant 0 : index
    %257 = vector.load %arg10[%c1_263, %c0_264, %c0_265] : memref<9x8x2xf32, #tpu.memory_space<vmem>>, vector<1x8x2xf32>
    %258 = vector.shape_cast %257 : vector<1x8x2xf32> to vector<8x2xf32>
    %cst_266 = arith.constant dense<0.000000e+00> : vector<4x2xf32>
    %259 = tpu.matmul %256, %258, %cst_266 {dimension_numbers = #tpu.dot_dimension_numbers<[1], [0], [0], [1], [0, 0, 1, 1], [], []>} : vector<4x8xf32>, vector<8x2xf32>, vector<4x2xf32> -> vector<4x2xf32>
    %260 = arith.addf %254, %259 : vector<4x2xf32>
    %c2_267 = arith.constant 2 : index
    %c2_268 = arith.constant 2 : index
    %c0_269 = arith.constant 0 : index
    %261 = vector.load %arg17[%c2_267, %c2_268, %c0_269] : memref<6x6x8xf32, #tpu.memory_space<vmem>>, vector<1x4x8xf32>
    %262 = vector.shape_cast %261 : vector<1x4x8xf32> to vector<4x8xf32>
    %c2_270 = arith.constant 2 : index
    %c0_271 = arith.constant 0 : index
    %c0_272 = arith.constant 0 : index
    %263 = vector.load %arg10[%c2_270, %c0_271, %c0_272] : memref<9x8x2xf32, #tpu.memory_space<vmem>>, vector<1x8x2xf32>
    %264 = vector.shape_cast %263 : vector<1x8x2xf32> to vector<8x2xf32>
    %cst_273 = arith.constant dense<0.000000e+00> : vector<4x2xf32>
    %265 = tpu.matmul %262, %264, %cst_273 {dimension_numbers = #tpu.dot_dimension_numbers<[1], [0], [0], [1], [0, 0, 1, 1], [], []>} : vector<4x8xf32>, vector<8x2xf32>, vector<4x2xf32> -> vector<4x2xf32>
    %266 = arith.addf %260, %265 : vector<4x2xf32>
    %c3_274 = arith.constant 3 : index
    %c0_275 = arith.constant 0 : index
    %c0_276 = arith.constant 0 : index
    %267 = vector.load %arg17[%c3_274, %c0_275, %c0_276] : memref<6x6x8xf32, #tpu.memory_space<vmem>>, vector<1x4x8xf32>
    %268 = vector.shape_cast %267 : vector<1x4x8xf32> to vector<4x8xf32>
    %c3_277 = arith.constant 3 : index
    %c0_278 = arith.constant 0 : index
    %c0_279 = arith.constant 0 : index
    %269 = vector.load %arg10[%c3_277, %c0_278, %c0_279] : memref<9x8x2xf32, #tpu.memory_space<vmem>>, vector<1x8x2xf32>
    %270 = vector.shape_cast %269 : vector<1x8x2xf32> to vector<8x2xf32>
    %cst_280 = arith.constant dense<0.000000e+00> : vector<4x2xf32>
    %271 = tpu.matmul %268, %270, %cst_280 {dimension_numbers = #tpu.dot_dimension_numbers<[1], [0], [0], [1], [0, 0, 1, 1], [], []>} : vector<4x8xf32>, vector<8x2xf32>, vector<4x2xf32> -> vector<4x2xf32>
    %272 = arith.addf %266, %271 : vector<4x2xf32>
    %c3_281 = arith.constant 3 : index
    %c1_282 = arith.constant 1 : index
    %c0_283 = arith.constant 0 : index
    %273 = vector.load %arg17[%c3_281, %c1_282, %c0_283] : memref<6x6x8xf32, #tpu.memory_space<vmem>>, vector<1x4x8xf32>
    %274 = vector.shape_cast %273 : vector<1x4x8xf32> to vector<4x8xf32>
    %c4_284 = arith.constant 4 : index
    %c0_285 = arith.constant 0 : index
    %c0_286 = arith.constant 0 : index
    %275 = vector.load %arg10[%c4_284, %c0_285, %c0_286] : memref<9x8x2xf32, #tpu.memory_space<vmem>>, vector<1x8x2xf32>
    %276 = vector.shape_cast %275 : vector<1x8x2xf32> to vector<8x2xf32>
    %cst_287 = arith.constant dense<0.000000e+00> : vector<4x2xf32>
    %277 = tpu.matmul %274, %276, %cst_287 {dimension_numbers = #tpu.dot_dimension_numbers<[1], [0], [0], [1], [0, 0, 1, 1], [], []>} : vector<4x8xf32>, vector<8x2xf32>, vector<4x2xf32> -> vector<4x2xf32>
    %278 = arith.addf %272, %277 : vector<4x2xf32>
    %c3_288 = arith.constant 3 : index
    %c2_289 = arith.constant 2 : index
    %c0_290 = arith.constant 0 : index
    %279 = vector.load %arg17[%c3_288, %c2_289, %c0_290] : memref<6x6x8xf32, #tpu.memory_space<vmem>>, vector<1x4x8xf32>
    %280 = vector.shape_cast %279 : vector<1x4x8xf32> to vector<4x8xf32>
    %c5_291 = arith.constant 5 : index
    %c0_292 = arith.constant 0 : index
    %c0_293 = arith.constant 0 : index
    %281 = vector.load %arg10[%c5_291, %c0_292, %c0_293] : memref<9x8x2xf32, #tpu.memory_space<vmem>>, vector<1x8x2xf32>
    %282 = vector.shape_cast %281 : vector<1x8x2xf32> to vector<8x2xf32>
    %cst_294 = arith.constant dense<0.000000e+00> : vector<4x2xf32>
    %283 = tpu.matmul %280, %282, %cst_294 {dimension_numbers = #tpu.dot_dimension_numbers<[1], [0], [0], [1], [0, 0, 1, 1], [], []>} : vector<4x8xf32>, vector<8x2xf32>, vector<4x2xf32> -> vector<4x2xf32>
    %284 = arith.addf %278, %283 : vector<4x2xf32>
    %c4_295 = arith.constant 4 : index
    %c0_296 = arith.constant 0 : index
    %c0_297 = arith.constant 0 : index
    %285 = vector.load %arg17[%c4_295, %c0_296, %c0_297] : memref<6x6x8xf32, #tpu.memory_space<vmem>>, vector<1x4x8xf32>
    %286 = vector.shape_cast %285 : vector<1x4x8xf32> to vector<4x8xf32>
    %c6_298 = arith.constant 6 : index
    %c0_299 = arith.constant 0 : index
    %c0_300 = arith.constant 0 : index
    %287 = vector.load %arg10[%c6_298, %c0_299, %c0_300] : memref<9x8x2xf32, #tpu.memory_space<vmem>>, vector<1x8x2xf32>
    %288 = vector.shape_cast %287 : vector<1x8x2xf32> to vector<8x2xf32>
    %cst_301 = arith.constant dense<0.000000e+00> : vector<4x2xf32>
    %289 = tpu.matmul %286, %288, %cst_301 {dimension_numbers = #tpu.dot_dimension_numbers<[1], [0], [0], [1], [0, 0, 1, 1], [], []>} : vector<4x8xf32>, vector<8x2xf32>, vector<4x2xf32> -> vector<4x2xf32>
    %290 = arith.addf %284, %289 : vector<4x2xf32>
    %c4_302 = arith.constant 4 : index
    %c1_303 = arith.constant 1 : index
    %c0_304 = arith.constant 0 : index
    %291 = vector.load %arg17[%c4_302, %c1_303, %c0_304] : memref<6x6x8xf32, #tpu.memory_space<vmem>>, vector<1x4x8xf32>
    %292 = vector.shape_cast %291 : vector<1x4x8xf32> to vector<4x8xf32>
    %c7_305 = arith.constant 7 : index
    %c0_306 = arith.constant 0 : index
    %c0_307 = arith.constant 0 : index
    %293 = vector.load %arg10[%c7_305, %c0_306, %c0_307] : memref<9x8x2xf32, #tpu.memory_space<vmem>>, vector<1x8x2xf32>
    %294 = vector.shape_cast %293 : vector<1x8x2xf32> to vector<8x2xf32>
    %cst_308 = arith.constant dense<0.000000e+00> : vector<4x2xf32>
    %295 = tpu.matmul %292, %294, %cst_308 {dimension_numbers = #tpu.dot_dimension_numbers<[1], [0], [0], [1], [0, 0, 1, 1], [], []>} : vector<4x8xf32>, vector<8x2xf32>, vector<4x2xf32> -> vector<4x2xf32>
    %296 = arith.addf %290, %295 : vector<4x2xf32>
    %c4_309 = arith.constant 4 : index
    %c2_310 = arith.constant 2 : index
    %c0_311 = arith.constant 0 : index
    %297 = vector.load %arg17[%c4_309, %c2_310, %c0_311] : memref<6x6x8xf32, #tpu.memory_space<vmem>>, vector<1x4x8xf32>
    %298 = vector.shape_cast %297 : vector<1x4x8xf32> to vector<4x8xf32>
    %c8_312 = arith.constant 8 : index
    %c0_313 = arith.constant 0 : index
    %c0_314 = arith.constant 0 : index
    %299 = vector.load %arg10[%c8_312, %c0_313, %c0_314] : memref<9x8x2xf32, #tpu.memory_space<vmem>>, vector<1x8x2xf32>
    %300 = vector.shape_cast %299 : vector<1x8x2xf32> to vector<8x2xf32>
    %cst_315 = arith.constant dense<0.000000e+00> : vector<4x2xf32>
    %301 = tpu.matmul %298, %300, %cst_315 {dimension_numbers = #tpu.dot_dimension_numbers<[1], [0], [0], [1], [0, 0, 1, 1], [], []>} : vector<4x8xf32>, vector<8x2xf32>, vector<4x2xf32> -> vector<4x2xf32>
    %302 = arith.addf %296, %301 : vector<4x2xf32>
    %c0_316 = arith.constant 0 : index
    %c0_317 = arith.constant 0 : index
    %303 = vector.load %arg11[%c0_316, %c0_317] : memref<1x2xf32, #tpu.memory_space<vmem>>, vector<1x2xf32>
    %304 = vector.broadcast %303 : vector<1x2xf32> to vector<4x2xf32>
    %305 = arith.addf %302, %304 : vector<4x2xf32>
    %c8_318 = arith.constant 8 : index
    %c0_319 = arith.constant 0 : index
    %306 = vector.load %arg18[%c8_318, %c0_319] : memref<16x2xf32, #tpu.memory_space<vmem>>, vector<4x2xf32>
    tpu.vector_store %arg18[%c8_318, %c0_319], %305 {strides = array<i32>} : memref<16x2xf32, #tpu.memory_space<vmem>>, vector<4x2xf32>,
    %cst_320 = arith.constant 0.000000e+00 : f32
    %307 = vector.broadcast %cst_320 : f32 to vector<4x2xf32>
    %c3_321 = arith.constant 3 : index
    %c0_322 = arith.constant 0 : index
    %c0_323 = arith.constant 0 : index
    %308 = vector.load %arg17[%c3_321, %c0_322, %c0_323] : memref<6x6x8xf32, #tpu.memory_space<vmem>>, vector<1x4x8xf32>
    %309 = vector.shape_cast %308 : vector<1x4x8xf32> to vector<4x8xf32>
    %c0_324 = arith.constant 0 : index
    %c0_325 = arith.constant 0 : index
    %c0_326 = arith.constant 0 : index
    %310 = vector.load %arg10[%c0_324, %c0_325, %c0_326] : memref<9x8x2xf32, #tpu.memory_space<vmem>>, vector<1x8x2xf32>
    %311 = vector.shape_cast %310 : vector<1x8x2xf32> to vector<8x2xf32>
    %cst_327 = arith.constant dense<0.000000e+00> : vector<4x2xf32>
    %312 = tpu.matmul %309, %311, %cst_327 {dimension_numbers = #tpu.dot_dimension_numbers<[1], [0], [0], [1], [0, 0, 1, 1], [], []>} : vector<4x8xf32>, vector<8x2xf32>, vector<4x2xf32> -> vector<4x2xf32>
    %313 = arith.addf %307, %312 : vector<4x2xf32>
    %c3_328 = arith.constant 3 : index
    %c1_329 = arith.constant 1 : index
    %c0_330 = arith.constant 0 : index
    %314 = vector.load %arg17[%c3_328, %c1_329, %c0_330] : memref<6x6x8xf32, #tpu.memory_space<vmem>>, vector<1x4x8xf32>
    %315 = vector.shape_cast %314 : vector<1x4x8xf32> to vector<4x8xf32>
    %c1_331 = arith.constant 1 : index
    %c0_332 = arith.constant 0 : index
    %c0_333 = arith.constant 0 : index
    %316 = vector.load %arg10[%c1_331, %c0_332, %c0_333] : memref<9x8x2xf32, #tpu.memory_space<vmem>>, vector<1x8x2xf32>
    %317 = vector.shape_cast %316 : vector<1x8x2xf32> to vector<8x2xf32>
    %cst_334 = arith.constant dense<0.000000e+00> : vector<4x2xf32>
    %318 = tpu.matmul %315, %317, %cst_334 {dimension_numbers = #tpu.dot_dimension_numbers<[1], [0], [0], [1], [0, 0, 1, 1], [], []>} : vector<4x8xf32>, vector<8x2xf32>, vector<4x2xf32> -> vector<4x2xf32>
    %319 = arith.addf %313, %318 : vector<4x2xf32>
    %c3_335 = arith.constant 3 : index
    %c2_336 = arith.constant 2 : index
    %c0_337 = arith.constant 0 : index
    %320 = vector.load %arg17[%c3_335, %c2_336, %c0_337] : memref<6x6x8xf32, #tpu.memory_space<vmem>>, vector<1x4x8xf32>
    %321 = vector.shape_cast %320 : vector<1x4x8xf32> to vector<4x8xf32>
    %c2_338 = arith.constant 2 : index
    %c0_339 = arith.constant 0 : index
    %c0_340 = arith.constant 0 : index
    %322 = vector.load %arg10[%c2_338, %c0_339, %c0_340] : memref<9x8x2xf32, #tpu.memory_space<vmem>>, vector<1x8x2xf32>
    %323 = vector.shape_cast %322 : vector<1x8x2xf32> to vector<8x2xf32>
    %cst_341 = arith.constant dense<0.000000e+00> : vector<4x2xf32>
    %324 = tpu.matmul %321, %323, %cst_341 {dimension_numbers = #tpu.dot_dimension_numbers<[1], [0], [0], [1], [0, 0, 1, 1], [], []>} : vector<4x8xf32>, vector<8x2xf32>, vector<4x2xf32> -> vector<4x2xf32>
    %325 = arith.addf %319, %324 : vector<4x2xf32>
    %c4_342 = arith.constant 4 : index
    %c0_343 = arith.constant 0 : index
    %c0_344 = arith.constant 0 : index
    %326 = vector.load %arg17[%c4_342, %c0_343, %c0_344] : memref<6x6x8xf32, #tpu.memory_space<vmem>>, vector<1x4x8xf32>
    %327 = vector.shape_cast %326 : vector<1x4x8xf32> to vector<4x8xf32>
    %c3_345 = arith.constant 3 : index
    %c0_346 = arith.constant 0 : index
    %c0_347 = arith.constant 0 : index
    %328 = vector.load %arg10[%c3_345, %c0_346, %c0_347] : memref<9x8x2xf32, #tpu.memory_space<vmem>>, vector<1x8x2xf32>
    %329 = vector.shape_cast %328 : vector<1x8x2xf32> to vector<8x2xf32>
    %cst_348 = arith.constant dense<0.000000e+00> : vector<4x2xf32>
    %330 = tpu.matmul %327, %329, %cst_348 {dimension_numbers = #tpu.dot_dimension_numbers<[1], [0], [0], [1], [0, 0, 1, 1], [], []>} : vector<4x8xf32>, vector<8x2xf32>, vector<4x2xf32> -> vector<4x2xf32>
    %331 = arith.addf %325, %330 : vector<4x2xf32>
    %c4_349 = arith.constant 4 : index
    %c1_350 = arith.constant 1 : index
    %c0_351 = arith.constant 0 : index
    %332 = vector.load %arg17[%c4_349, %c1_350, %c0_351] : memref<6x6x8xf32, #tpu.memory_space<vmem>>, vector<1x4x8xf32>
    %333 = vector.shape_cast %332 : vector<1x4x8xf32> to vector<4x8xf32>
    %c4_352 = arith.constant 4 : index
    %c0_353 = arith.constant 0 : index
    %c0_354 = arith.constant 0 : index
    %334 = vector.load %arg10[%c4_352, %c0_353, %c0_354] : memref<9x8x2xf32, #tpu.memory_space<vmem>>, vector<1x8x2xf32>
    %335 = vector.shape_cast %334 : vector<1x8x2xf32> to vector<8x2xf32>
    %cst_355 = arith.constant dense<0.000000e+00> : vector<4x2xf32>
    %336 = tpu.matmul %333, %335, %cst_355 {dimension_numbers = #tpu.dot_dimension_numbers<[1], [0], [0], [1], [0, 0, 1, 1], [], []>} : vector<4x8xf32>, vector<8x2xf32>, vector<4x2xf32> -> vector<4x2xf32>
    %337 = arith.addf %331, %336 : vector<4x2xf32>
    %c4_356 = arith.constant 4 : index
    %c2_357 = arith.constant 2 : index
    %c0_358 = arith.constant 0 : index
    %338 = vector.load %arg17[%c4_356, %c2_357, %c0_358] : memref<6x6x8xf32, #tpu.memory_space<vmem>>, vector<1x4x8xf32>
    %339 = vector.shape_cast %338 : vector<1x4x8xf32> to vector<4x8xf32>
    %c5_359 = arith.constant 5 : index
    %c0_360 = arith.constant 0 : index
    %c0_361 = arith.constant 0 : index
    %340 = vector.load %arg10[%c5_359, %c0_360, %c0_361] : memref<9x8x2xf32, #tpu.memory_space<vmem>>, vector<1x8x2xf32>
    %341 = vector.shape_cast %340 : vector<1x8x2xf32> to vector<8x2xf32>
    %cst_362 = arith.constant dense<0.000000e+00> : vector<4x2xf32>
    %342 = tpu.matmul %339, %341, %cst_362 {dimension_numbers = #tpu.dot_dimension_numbers<[1], [0], [0], [1], [0, 0, 1, 1], [], []>} : vector<4x8xf32>, vector<8x2xf32>, vector<4x2xf32> -> vector<4x2xf32>
    %343 = arith.addf %337, %342 : vector<4x2xf32>
    %c5_363 = arith.constant 5 : index
    %c0_364 = arith.constant 0 : index
    %c0_365 = arith.constant 0 : index
    %344 = vector.load %arg17[%c5_363, %c0_364, %c0_365] : memref<6x6x8xf32, #tpu.memory_space<vmem>>, vector<1x4x8xf32>
    %345 = vector.shape_cast %344 : vector<1x4x8xf32> to vector<4x8xf32>
    %c6_366 = arith.constant 6 : index
    %c0_367 = arith.constant 0 : index
    %c0_368 = arith.constant 0 : index
    %346 = vector.load %arg10[%c6_366, %c0_367, %c0_368] : memref<9x8x2xf32, #tpu.memory_space<vmem>>, vector<1x8x2xf32>
    %347 = vector.shape_cast %346 : vector<1x8x2xf32> to vector<8x2xf32>
    %cst_369 = arith.constant dense<0.000000e+00> : vector<4x2xf32>
    %348 = tpu.matmul %345, %347, %cst_369 {dimension_numbers = #tpu.dot_dimension_numbers<[1], [0], [0], [1], [0, 0, 1, 1], [], []>} : vector<4x8xf32>, vector<8x2xf32>, vector<4x2xf32> -> vector<4x2xf32>
    %349 = arith.addf %343, %348 : vector<4x2xf32>
    %c5_370 = arith.constant 5 : index
    %c1_371 = arith.constant 1 : index
    %c0_372 = arith.constant 0 : index
    %350 = vector.load %arg17[%c5_370, %c1_371, %c0_372] : memref<6x6x8xf32, #tpu.memory_space<vmem>>, vector<1x4x8xf32>
    %351 = vector.shape_cast %350 : vector<1x4x8xf32> to vector<4x8xf32>
    %c7_373 = arith.constant 7 : index
    %c0_374 = arith.constant 0 : index
    %c0_375 = arith.constant 0 : index
    %352 = vector.load %arg10[%c7_373, %c0_374, %c0_375] : memref<9x8x2xf32, #tpu.memory_space<vmem>>, vector<1x8x2xf32>
    %353 = vector.shape_cast %352 : vector<1x8x2xf32> to vector<8x2xf32>
    %cst_376 = arith.constant dense<0.000000e+00> : vector<4x2xf32>
    %354 = tpu.matmul %351, %353, %cst_376 {dimension_numbers = #tpu.dot_dimension_numbers<[1], [0], [0], [1], [0, 0, 1, 1], [], []>} : vector<4x8xf32>, vector<8x2xf32>, vector<4x2xf32> -> vector<4x2xf32>
    %355 = arith.addf %349, %354 : vector<4x2xf32>
    %c5_377 = arith.constant 5 : index
    %c2_378 = arith.constant 2 : index
    %c0_379 = arith.constant 0 : index
    %356 = vector.load %arg17[%c5_377, %c2_378, %c0_379] : memref<6x6x8xf32, #tpu.memory_space<vmem>>, vector<1x4x8xf32>
    %357 = vector.shape_cast %356 : vector<1x4x8xf32> to vector<4x8xf32>
    %c8_380 = arith.constant 8 : index
    %c0_381 = arith.constant 0 : index
    %c0_382 = arith.constant 0 : index
    %358 = vector.load %arg10[%c8_380, %c0_381, %c0_382] : memref<9x8x2xf32, #tpu.memory_space<vmem>>, vector<1x8x2xf32>
    %359 = vector.shape_cast %358 : vector<1x8x2xf32> to vector<8x2xf32>
    %cst_383 = arith.constant dense<0.000000e+00> : vector<4x2xf32>
    %360 = tpu.matmul %357, %359, %cst_383 {dimension_numbers = #tpu.dot_dimension_numbers<[1], [0], [0], [1], [0, 0, 1, 1], [], []>} : vector<4x8xf32>, vector<8x2xf32>, vector<4x2xf32> -> vector<4x2xf32>
    %361 = arith.addf %355, %360 : vector<4x2xf32>
    %c0_384 = arith.constant 0 : index
    %c0_385 = arith.constant 0 : index
    %362 = vector.load %arg11[%c0_384, %c0_385] : memref<1x2xf32, #tpu.memory_space<vmem>>, vector<1x2xf32>
    %363 = vector.broadcast %362 : vector<1x2xf32> to vector<4x2xf32>
    %364 = arith.addf %361, %363 : vector<4x2xf32>
    %c12 = arith.constant 12 : index
    %c0_386 = arith.constant 0 : index
    %365 = vector.load %arg18[%c12, %c0_386] : memref<16x2xf32, #tpu.memory_space<vmem>>, vector<4x2xf32>
    tpu.vector_store %arg18[%c12, %c0_386], %364 {strides = array<i32>} : memref<16x2xf32, #tpu.memory_space<vmem>>, vector<4x2xf32>,
    %c0_387 = arith.constant 0 : index
    %c0_388 = arith.constant 0 : index
    %366 = vector.load %arg18[%c0_387, %c0_388] : memref<16x2xf32, #tpu.memory_space<vmem>>, vector<16x2xf32>
    %c0_389 = arith.constant 0 : index
    %c0_390 = arith.constant 0 : index
    %367 = vector.load %arg12[%c0_389, %c0_390] : memref<16x256xf32, #tpu.memory_space<vmem>>, vector<16x256xf32>
    %cst_391 = arith.constant dense<0.000000e+00> : vector<2x256xf32>
    %368 = tpu.matmul %366, %367, %cst_391 {dimension_numbers = #tpu.dot_dimension_numbers<[0], [0], [1], [1], [0, 1, 1, 1], [], []>} : vector<16x2xf32>, vector<16x256xf32>, vector<2x256xf32> -> vector<2x256xf32>
    %369 = math.tanh %368 : vector<2x256xf32>
    %cst_392 = arith.constant 1.280000e+02 : f32
    %370 = vector.broadcast %cst_392 : f32 to vector<2x256xf32>
    %371 = arith.mulf %369, %370 : vector<2x256xf32>
    %c0_393 = arith.constant 0 : index
    %c0_394 = arith.constant 0 : index
    %c0_395 = arith.constant 0 : index
    %372 = vector.load %arg13[%c0_393, %c0_394, %c0_395] : memref<1x2x256xf32, #tpu.memory_space<vmem>>, vector<1x2x256xf32>
    %373 = vector.shape_cast %372 : vector<1x2x256xf32> to vector<2x256xf32>
    %374 = vector.shape_cast %371 : vector<2x256xf32> to vector<1x2x256xf32>
    tpu.vector_store %arg13[%c0_393, %c0_394, %c0_395], %374 {strides = array<i32>} : memref<1x2x256xf32, #tpu.memory_space<vmem>>, vector<1x2x256xf32>,
    return
  }
  func.func @transform_0(%arg0: i32) -> (i32, i32, i32) {
    %c0_i32 = arith.constant 0 : i32
    %c0_i32_0 = arith.constant 0 : i32
    %c0_i32_1 = arith.constant 0 : i32
    return %arg0, %c0_i32, %c0_i32_0 : i32, i32, i32
  }
  func.func @transform_1(%arg0: i32) -> (i32, i32) {
    %c0_i32 = arith.constant 0 : i32
    %c0_i32_0 = arith.constant 0 : i32
    %c0_i32_1 = arith.constant 0 : i32
    return %c0_i32, %c0_i32_0 : i32, i32
  }
  func.func @transform_2(%arg0: i32) -> (i32, i32) {
    %c0_i32 = arith.constant 0 : i32
    %c0_i32_0 = arith.constant 0 : i32
    %c0_i32_1 = arith.constant 0 : i32
    return %c0_i32, %c0_i32_0 : i32, i32
  }
  func.func @transform_3(%arg0: i32) -> (i32, i32) {
    %c0_i32 = arith.constant 0 : i32
    %c0_i32_0 = arith.constant 0 : i32
    %c0_i32_1 = arith.constant 0 : i32
    return %c0_i32, %c0_i32_0 : i32, i32
  }
  func.func @transform_4(%arg0: i32) -> (i32, i32) {
    %c0_i32 = arith.constant 0 : i32
    %c0_i32_0 = arith.constant 0 : i32
    %c0_i32_1 = arith.constant 0 : i32
    return %c0_i32, %c0_i32_0 : i32, i32
  }
  func.func @transform_5(%arg0: i32) -> (i32, i32, i32) {
    %c0_i32 = arith.constant 0 : i32
    %c0_i32_0 = arith.constant 0 : i32
    %c0_i32_1 = arith.constant 0 : i32
    %c0_i32_2 = arith.constant 0 : i32
    return %c0_i32, %c0_i32_0, %c0_i32_1 : i32, i32, i32
  }
  func.func @transform_6(%arg0: i32) -> (i32, i32) {
    %c0_i32 = arith.constant 0 : i32
    %c0_i32_0 = arith.constant 0 : i32
    %c0_i32_1 = arith.constant 0 : i32
    return %c0_i32, %c0_i32_0 : i32, i32
  }
  func.func @transform_7(%arg0: i32) -> (i32, i32) {
    %c0_i32 = arith.constant 0 : i32
    %c0_i32_0 = arith.constant 0 : i32
    %c0_i32_1 = arith.constant 0 : i32
    return %c0_i32, %c0_i32_0 : i32, i32
  }
  func.func @transform_8(%arg0: i32) -> (i32, i32) {
    %c0_i32 = arith.constant 0 : i32
    %c0_i32_0 = arith.constant 0 : i32
    %c0_i32_1 = arith.constant 0 : i32
    return %c0_i32, %c0_i32_0 : i32, i32
  }
  func.func @transform_9(%arg0: i32) -> (i32, i32, i32) {
    %c0_i32 = arith.constant 0 : i32
    %c0_i32_0 = arith.constant 0 : i32
    %c0_i32_1 = arith.constant 0 : i32
    %c0_i32_2 = arith.constant 0 : i32
    return %c0_i32, %c0_i32_0, %c0_i32_1 : i32, i32, i32
  }
  func.func @transform_10(%arg0: i32) -> (i32, i32) {
    %c0_i32 = arith.constant 0 : i32
    %c0_i32_0 = arith.constant 0 : i32
    %c0_i32_1 = arith.constant 0 : i32
    return %c0_i32, %c0_i32_0 : i32, i32
  }
  func.func @transform_11(%arg0: i32) -> (i32, i32) {
    %c0_i32 = arith.constant 0 : i32
    %c0_i32_0 = arith.constant 0 : i32
    %c0_i32_1 = arith.constant 0 : i32
    return %c0_i32, %c0_i32_0 : i32, i32
  }
  func.func @transform_12(%arg0: i32) -> (i32, i32, i32) {
    %c0_i32 = arith.constant 0 : i32
    %c0_i32_0 = arith.constant 0 : i32
    %c0_i32_1 = arith.constant 0 : i32
    return %arg0, %c0_i32, %c0_i32_0 : i32, i32, i32
  }
}

</mosaic_0001>

<bundles_post_ra>
// kernel: tpu_custom_call.1
= control target key start
LH: loop header
LB: loop body
LE: loop exit
PB: predicated region body
PF: predicated region fallthrough
CT: control target
= control target key end

     0   :  { %s7388_s0 = inlined_call_operand.vmem [shape: f32[2,256,32], index: 0, kind: input, shape index: {}]   ;;  %s7389_s1 = inlined_call_operand.vmem [shape: f32[32,32], index: 1, kind: input, shape index: {}]   ;;  %s7390_s2 = inlined_call_operand.vmem [shape: f32[1,32], index: 2, kind: input, shape index: {}]   ;;  %s7391_s3 = inlined_call_operand.vmem [shape: f32[1,32], index: 3, kind: input, shape index: {}]   ;;  %s7392_s4 = inlined_call_operand.vmem [shape: f32[1,32], index: 4, kind: input, shape index: {}]   ;;  %s7393_s5 = inlined_call_operand.vmem [shape: f32[9,32,8], index: 5, kind: input, shape index: {}]   ;;  %s7394_s6 = inlined_call_operand.vmem [shape: f32[1,8], index: 6, kind: input, shape index: {}]   ;;  %s7395_s7 = inlined_call_operand.vmem [shape: f32[1,8], index: 7, kind: input, shape index: {}]   ;;  %s7396_s8 = inlined_call_operand.vmem [shape: f32[1,8], index: 8, kind: input, shape index: {}]   ;;  %s7397_s9 = inlined_call_operand.vmem [shape: f32[9,8,2], index: 9, kind: input, shape index: {}]   ;;  %s7398_s10 = inlined_call_operand.vmem [shape: f32[1,2], index: 10, kind: input, shape index: {}]   ;;  %s7399_s11 = inlined_call_operand.vmem [shape: f32[16,256], index: 11, kind: input, shape index: {}]   ;;  %s7400_s12 = inlined_call_operand.hbm [shape: f32[2,2,256], index: 12, kind: output, shape index: {}]  }
   0x1   :  { %7413 = sst [smem:[#allocation19_spill]] %s7388_s0 }
   0x2   :  { %7414 = sst [smem:[#allocation20_spill]] %s7389_s1 }
   0x3   :  { %7415 = sst [smem:[#allocation21_spill]] %s7390_s2 }
   0x4   :  { %17 = vsyncpa [#allocation8], 0 }
   0x5   :  { %19 = vsyncpa [#allocation8 + $0x1], 0  ;;  %s6433_s21 = smov 0   ;;  %s6435_s22 = smov 0  }
   0x6   :  { %s6437_s23 = smov 0   ;;  %s6439_s24 = smov 0  }
   0x7 LB: > { %s6454_s25 = sadd.s32 4294967295, %s6363_s24   ;;  %s5396_s26 = sadd.s32 4294967294, %s6363_s24   ;;  %s6363_s24 = sphi %s6439_s24, %s7443_s24   ;;  %s6359_s23 = sphi %s6437_s23, %s7442_s23   ;;  %s6355_s22 = sphi %s6435_s22, %s7441_s22   ;;  %s6351_s21 = sphi %s6433_s21, %s7440_s21  }
   0x8   : > { %s6458_s27 = sadd.s32 1, %s6363_s24   ;;  %s289_s28 = sadd.s32 1, %s6359_s23 }
   0x9   : > { %s286_s29 = ssub.s32 %s6363_s24, %s6458_s27  ;;  %p299_p0 = scmp.ne.s32.totalorder %s6359_s23, %s6355_s22 }
   0xa   : > { %p287_p1 = scmp.eq.s32.totalorder %s286_s29, 0  ;;  %p300_p2 = scmp.eq.s32.totalorder %s6454_s25, 1 }
   0xb   : > { %p305_p3 = scmp.ne.s32.totalorder %s6355_s22, %s6351_s21  ;;  %p306_p4 = scmp.eq.s32.totalorder %s5396_s26, 1 }
   0xc   : > { %s6469_s30 = scalar_select %p287_p1, %s6359_s23, %s289_s28  }
   0xd   : > { %p6471_p5 = por %p300_p2, %p299_p0  ;;  %p6475_p6 = por %p306_p4, %p305_p3 }
   0xe   : > { %p5399_p7 = scmp.ge.s32.totalorder %s6363_s24, 1  ;;  %p365_p8 = scmp.lt.s32.totalorder %s6363_s24, 3 }
  0x10   : > { %p366_p9 = pnand %p5399_p7, %p365_p8 }
  0x12   : > { %369 = sbr.rel (%p366_p9) target bundleno = 1225 (0x4c9), region = 68 }
  0x17   : > { %s7418_s1 = sld [smem:[#allocation20_spill]]  ;;  %p407_p10 = scmp.lt.s32.totalorder %s6454_s25, 1  ;;  %vm455_vm0 = vcmask 261120   ;;  %vm959_vm1 = vcmask 254976   ;;  %v5441_v36 = vld [vmem:[%s7393_s5 + $0x38] sm:$0xff]  ;;  %v7401_v37 = vmov 0.0  }
  0x18   : > { %s7419_s0 = sld [smem:[#allocation19_spill]]  ;;  %958 = vst.msk [vmem:[#allocation3] sm:$0xff] %vm455_vm0, %v7401_v37  ;;  %961 = vst.msk [vmem:[#allocation3 + $0x10] sm:$0xff] %vm455_vm0, %v7401_v37  ;;  %5898 = vmatprep.subr.mxu1 %v5441_v36  ;;  %v5440_v38 = vld [vmem:[%s7393_s5 + $0x30] sm:$0xff]  ;;  %v5439_v39 = vld [vmem:[%s7393_s5 + $0x28] sm:$0xff]  ;;  %vm2384_vm2 = vcmask 62464  }
  0x19   : > { %s408_s26 = scalar_select %p407_p10, %s6454_s25, 1  ;;  %960 = vst.msk [vmem:[#allocation3 + $0x8] sm:$0x3] %vm959_vm1, %v7401_v37  ;;  %962 = vst.msk [vmem:[#allocation3 + $0x18] sm:$0x3] %vm959_vm1, %v7401_v37  ;;  %5899 = vmatpush3.msra.mxu1 %v5441_v36  ;;  %v5438_v40 = vld [vmem:[%s7393_s5 + $0x20] sm:$0xff] }
  0x1a   : > { %963 = vst.msk [vmem:[#allocation3 + $0x20] sm:$0xff] %vm455_vm0, %v7401_v37  ;;  %965 = vst.msk [vmem:[#allocation3 + $0x30] sm:$0xff] %vm455_vm0, %v7401_v37  ;;  %5900 = vmatprep.subr.mxu1 %v5440_v38  ;;  %v5485_v42 = vld [vmem:[%s7393_s5 + $0x98] sm:$0xff]  ;;  %v5484_v43 = vld [vmem:[%s7393_s5 + $0x90] sm:$0xff]  ;;  %s7420_s2 = sld [smem:[#allocation21_spill]]  ;;  %vm2379_vm3 = vcmask 64512  }
  0x1b   : > { %s5624_s15 = sshll.u32 %s408_s26, 8  ;;  %964 = vst.msk [vmem:[#allocation3 + $0x28] sm:$0x3] %vm959_vm1, %v7401_v37  ;;  %966 = vst.msk [vmem:[#allocation3 + $0x38] sm:$0x3] %vm959_vm1, %v7401_v37  ;;  %5901 = vmatpush3.msra.mxu1 %v5440_v38  ;;  %v5483_v44 = vld [vmem:[%s7393_s5 + $0x88] sm:$0xff] }
  0x1c   : > { %967 = vst.msk [vmem:[#allocation3 + $0x40] sm:$0xff] %vm455_vm0, %v7401_v37  ;;  %969 = vst.msk [vmem:[#allocation3 + $0x50] sm:$0xff] %vm455_vm0, %v7401_v37  ;;  %5902 = vmatprep.subr.mxu1 %v5439_v39  ;;  %v5482_v45 = vld [vmem:[%s7393_s5 + $0x80] sm:$0xff]  ;;  %v6632_v46 = vld [vmem:[%s7393_s5 + $0x18] sm:$0xff]  ;;  %vm6366_vm4 = vmmov 0   ;;  %vm2396_vm5 = vcmask 60416  }
  0x1d   : > { %v447_v0 = vld [vmem:[%s7418_s1 + $0x18] sm:$0xff]  ;;  %v446_v1 = vld [vmem:[%s7418_s1 + $0x10] sm:$0xff]  ;;  %v445_v2 = vld [vmem:[%s7418_s1 + $0x8] sm:$0xff]  ;;  %968 = vst.msk [vmem:[#allocation3 + $0x48] sm:$0x3] %vm959_vm1, %v7401_v37  ;;  %5903 = vmatpush3.msra.mxu1 %v5439_v39  ;;  %vm3117_vm6 = vcmask 11264  }
  0x1e   : > { %5842 = vmatprep.subr.mxu0 %v447_v0  ;;  %v444_v3 = vld [vmem:[%s7418_s1] sm:$0xff]  ;;  %s6498_s18 = scalar_lea.vmem %s7419_s0, %s5624_s15  ;;  %970 = vst.msk [vmem:[#allocation3 + $0x58] sm:$0x3] %vm959_vm1, %v7401_v37  ;;  %972 = vst.msk [vmem:[#allocation3 + $0x68] sm:$0x3] %vm959_vm1, %v7401_v37  ;;  %5904 = vmatprep.subr.mxu1 %v5438_v40  ;;  %v6638_v47 = vld [vmem:[%s7393_s5 + $0xd8] sm:$0xff] }
  0x1f   : > { %5843 = vmatpush3.msra.mxu0 %v447_v0  ;;  %v412_v4 = vld [vmem:[%s6498_s18] sm:$0xff]  ;;  %v413_v5 = vld [vmem:[%s6498_s18 + $0x8] sm:$0xff]  ;;  %v414_v6 = vld [vmem:[%s6498_s18 + $0x10] sm:$0xff]  ;;  %971 = vst.msk [vmem:[#allocation3 + $0x60] sm:$0xff] %vm455_vm0, %v7401_v37  ;;  %5905 = vmatpush3.msra.mxu1 %v5438_v40  ;;  %vm5231_vm7 = vcmask 130048   ;;  %s404_s29 = sand.u32 1, %s6355_s22  }
  0x20   : > { %5844 = vmatprep.subr.mxu0 %v446_v1  ;;  %5850 = vmatprep.mubr.msk.f32.mxu0 %vm455_vm0, %v412_v4  ;;  %v415_v7 = vld [vmem:[%s6498_s18 + $0x18] sm:$0xff]  ;;  %v416_v8 = vld [vmem:[%s6498_s18 + $0x20] sm:$0xff]  ;;  %v417_v9 = vld [vmem:[%s6498_s18 + $0x28] sm:$0xff]  ;;  %973 = vst.msk [vmem:[#allocation3 + $0x70] sm:$0xff] %vm455_vm0, %v7401_v37  ;;  %s5400_s15 = sshll.u32 %s404_s29, 2  ;;  %s5625_s16 = sshll.u32 %s6454_s25, 6 }
  0x21   : > { %5845 = vmatpush3.msra.mxu0 %v446_v1  ;;  %v418_v10 = vld [vmem:[%s6498_s18 + $0x30] sm:$0xff]  ;;  %v419_v11 = vld [vmem:[%s6498_s18 + $0x38] sm:$0xff]  ;;  %v420_v12 = vld [vmem:[%s6498_s18 + $0x40] sm:$0xff]  ;;  %974 = vst.msk [vmem:[#allocation3 + $0x78] sm:$0x3] %vm959_vm1, %v7401_v37  ;;  %5918 = vmatprep.subr.mxu1 %v6632_v46  ;;  %s406_s17 = scalar_lea.vmem [#allocation7], %s5400_s15  ;;  %s5335_s26 = scalar_lea.hbm %s7400_s12, %s5625_s16 }
  0x22   : > { %5846 = vmatprep.subr.mxu0 %v445_v2  ;;  %v421_v13 = vld [vmem:[%s6498_s18 + $0x48] sm:$0xff]  ;;  %v422_v14 = vld [vmem:[%s6498_s18 + $0x50] sm:$0xff]  ;;  %v423_v15 = vld [vmem:[%s6498_s18 + $0x58] sm:$0xff]  ;;  %975 = vst.msk [vmem:[#allocation3 + $0x80] sm:$0xff] %vm455_vm0, %v7401_v37  ;;  %s5323_s28 = scalar_lea.sflag [#allocation8], %s404_s29  ;;  %s6367_s1 = smov [#allocation7]  }
  0x23   : > { %5847 = vmatpush3.msra.mxu0 %v445_v2  ;;  %v424_v16 = vld [vmem:[%s6498_s18 + $0x60] sm:$0xff]  ;;  %v425_v17 = vld [vmem:[%s6498_s18 + $0x68] sm:$0xff]  ;;  %v426_v18 = vld [vmem:[%s6498_s18 + $0x70] sm:$0xff]  ;;  %976 = vst.msk [vmem:[#allocation3 + $0x88] sm:$0x3] %vm959_vm1, %v7401_v37 }
  0x24   : > { %5848 = vmatprep.subr.mxu0 %v444_v3  ;;  %v427_v19 = vld [vmem:[%s6498_s18 + $0x78] sm:$0xff]  ;;  %v428_v20 = vld [vmem:[%s6498_s18 + $0x80] sm:$0xff]  ;;  %v429_v21 = vld [vmem:[%s6498_s18 + $0x88] sm:$0xff]  ;;  %977 = vst.msk [vmem:[#allocation3 + $0x90] sm:$0xff] %vm455_vm0, %v7401_v37 }
  0x25   : > { %5849 = vmatpush3.msra.mxu0 %v444_v3  ;;  %v430_v22 = vld [vmem:[%s6498_s18 + $0x90] sm:$0xff]  ;;  %v431_v23 = vld [vmem:[%s6498_s18 + $0x98] sm:$0xff]  ;;  %v432_v24 = vld [vmem:[%s6498_s18 + $0xa0] sm:$0xff]  ;;  %978 = vst.msk [vmem:[#allocation3 + $0x98] sm:$0x3] %vm959_vm1, %v7401_v37 }
  0x26   : > { %5851 = vmatmul.mubr.msk.f32.vlgmr.msra.gmra.mxu0 %vm455_vm0, %v413_v5  ;;  %v433_v25 = vld [vmem:[%s6498_s18 + $0xa8] sm:$0xff]  ;;  %v434_v26 = vld [vmem:[%s6498_s18 + $0xb0] sm:$0xff]  ;;  %v435_v27 = vld [vmem:[%s6498_s18 + $0xb8] sm:$0xff]  ;;  %5978 = vmatprep.subr.mxu0 %v5485_v42  ;;  %2385 = vst.msk [vmem:[#allocation5] sm:$0x3f] %vm2384_vm2, %v7401_v37 }
  0x27   : > { %5853 = vmatprep.mubr.msk.f32.mxu0 %vm455_vm0, %v414_v6  ;;  %v436_v28 = vld [vmem:[%s6498_s18 + $0xc0] sm:$0xff]  ;;  %v437_v29 = vld [vmem:[%s6498_s18 + $0xc8] sm:$0xff]  ;;  %v438_v30 = vld [vmem:[%s6498_s18 + $0xd0] sm:$0xff]  ;;  %5979 = vmatpush3.msra.mxu0 %v5485_v42  ;;  %2386 = vst.msk [vmem:[#allocation5 + $0x8] sm:$0x3f] %vm2384_vm2, %v7401_v37 }
  0x28   : > { %v439_v31 = vld [vmem:[%s6498_s18 + $0xd8] sm:$0xff]  ;;  %v440_v32 = vld [vmem:[%s6498_s18 + $0xe0] sm:$0xff]  ;;  %v441_v33 = vld [vmem:[%s6498_s18 + $0xe8] sm:$0xff]  ;;  %5980 = vmatprep.subr.mxu0 %v5484_v43  ;;  %2387 = vst.msk [vmem:[#allocation5 + $0x10] sm:$0x3f] %vm2384_vm2, %v7401_v37 }
  0x29   : > { %v442_v34 = vld [vmem:[%s6498_s18 + $0xf0] sm:$0xff]  ;;  %v443_v35 = vld [vmem:[%s6498_s18 + $0xf8] sm:$0xff]  ;;  %v1000_v41 = vld [vmem:[#allocation3 + $0x1] sm:$0xff]  ;;  %5981 = vmatpush3.msra.mxu0 %v5484_v43  ;;  %2388 = vst.msk [vmem:[#allocation5 + $0x18] sm:$0x3f] %vm2384_vm2, %v7401_v37  ;;  %s5337_s18 = sshll.u32 %s406_s17, 4  ;;  %s5338_s18 = int_to_ptr.vmem [resolvable:$true] %s5337_s18 }
  0x2a   : > { %5854 = vmatmul.mubr.msk.f32.gmra.mxu0 %vm455_vm0, %v415_v7  ;;  %5906 = vmatprep.mubr.msk.f32.mxu1 %vm455_vm0, %v1000_v41  ;;  %v6644_v48 = vld [vmem:[%s7420_s2] ss:$0 sm:$0xff]  ;;  %2389 = vst.msk [vmem:[#allocation5 + $0x20] sm:$0x3f] %vm2384_vm2, %v7401_v37  ;;  %2390 = vst.msk [vmem:[#allocation5 + $0x28] sm:$0x3f] %vm2384_vm2, %v7401_v37 }
  0x2b   : > { %5856 = vmatprep.mubr.msk.f32.mxu0 %vm455_vm0, %v416_v8  ;;  %5982 = vmatprep.subr.mxu0 %v5483_v44  ;;  %v6651_v54 = vld [vmem:[%s7391_s3] ss:$0 sm:$0xff]  ;;  %s6303_s0 = scalar_lea.vmem %s5338_s18, 64  ;;  %s6307_s2 = sshll.u32 %s6367_s1, 4  ;;  %s6308_s2 = int_to_ptr.vmem [resolvable:$false] %s6307_s2 }
  0x2c   : > { %5983 = vmatpush3.msra.mxu0 %v5483_v44  ;;  %v6659_v62 = vld [vmem:[%s7392_s4] ss:$0 sm:$0xff]  ;;  %p6304_p11 = scmp.ne.s32.totalorder %s5338_s18, %s6303_s0  ;;  %s6309_s25 = scalar_lea.vmem %s6308_s2, 128 }
  0x2d   : > { %5984 = vmatprep.subr.mxu0 %v5482_v45  ;;  %p6310_p0 = scmp.lt.s32.totalorder %s5338_s18, %s6308_s2  ;;  %p6311_p1 = scmp.lt.s32.totalorder %s6309_s25, %s6303_s0 }
  0x2e   : > { %5857 = vmatmul.mubr.msk.f32.gmra.mxu0 %vm455_vm0, %v417_v9  ;;  %p6305_p12 = pnand %p6304_p11, %p6471_p5 }
  0x2f   : > { %5859 = vmatprep.mubr.msk.f32.mxu0 %vm455_vm0, %v418_v10  ;;  %5985 = vmatpush3.msra.mxu0 %v5482_v45  ;;  %p6312_p2 = por %p6311_p1, %p6310_p0 }
  0x30   : > { %6018 = vmatprep.subr.mxu0 %v6638_v47  ;;  %p6306_p13 = pneg %p6305_p12 }
  0x32   : > { %5860 = vmatmul.mubr.msk.f32.gmra.mxu0 %vm455_vm0, %v419_v11  ;;  %p6313_p3 = pnand %p6312_p2, %p6306_p13 }
  0x33   : > { %5862 = vmatprep.mubr.msk.f32.mxu0 %vm455_vm0, %v420_v12 }
  0x36   : > { %5863 = vmatmul.mubr.msk.f32.gmra.mxu0 %vm455_vm0, %v421_v13 }
  0x37   : > { %5865 = vmatprep.mubr.msk.f32.mxu0 %vm455_vm0, %v422_v14 }
  0x3a   : > { %5866 = vmatmul.mubr.msk.f32.gmra.mxu0 %vm455_vm0, %v423_v15 }
  0x3b   : > { %5868 = vmatprep.mubr.msk.f32.mxu0 %vm455_vm0, %v424_v16 }
  0x3e   : > { %5869 = vmatmul.mubr.msk.f32.gmra.mxu0 %vm455_vm0, %v425_v17 }
  0x3f   : > { %5871 = vmatprep.mubr.msk.f32.mxu0 %vm455_vm0, %v426_v18 }
  0x42   : > { %5872 = vmatmul.mubr.msk.f32.gmra.mxu0 %vm455_vm0, %v427_v19 }
  0x43   : > { %5874 = vmatprep.mubr.msk.f32.mxu0 %vm455_vm0, %v428_v20 }
  0x46   : > { %5875 = vmatmul.mubr.msk.f32.gmra.mxu0 %vm455_vm0, %v429_v21 }
  0x47   : > { %5877 = vmatprep.mubr.msk.f32.mxu0 %vm455_vm0, %v430_v22 }
  0x4a   : > { %5878 = vmatmul.mubr.msk.f32.gmra.mxu0 %vm455_vm0, %v431_v23 }
  0x4b   : > { %5880 = vmatprep.mubr.msk.f32.mxu0 %vm455_vm0, %v432_v24 }
  0x4e   : > { %5881 = vmatmul.mubr.msk.f32.gmra.mxu0 %vm455_vm0, %v433_v25 }
  0x4f   : > { %5883 = vmatprep.mubr.msk.f32.mxu0 %vm455_vm0, %v434_v26 }
  0x52   : > { %5884 = vmatmul.mubr.msk.f32.gmra.mxu0 %vm455_vm0, %v435_v27 }
  0x53   : > { %5886 = vmatprep.mubr.msk.f32.mxu0 %vm455_vm0, %v436_v28 }
  0x56   : > { %5887 = vmatmul.mubr.msk.f32.gmra.mxu0 %vm455_vm0, %v437_v29 }
  0x57   : > { %5889 = vmatprep.mubr.msk.f32.mxu0 %vm455_vm0, %v438_v30 }
  0x5a   : > { %5890 = vmatmul.mubr.msk.f32.gmra.mxu0 %vm455_vm0, %v439_v31 }
  0x5b   : > { %5892 = vmatprep.mubr.msk.f32.mxu0 %vm455_vm0, %v440_v32 }
  0x5e   : > { %5893 = vmatmul.mubr.msk.f32.gmra.mxu0 %vm455_vm0, %v441_v33 }
  0x5f   : > { %5895 = vmatprep.mubr.msk.f32.mxu0 %vm455_vm0, %v442_v34 }
  0x62   : > { %5896 = vmatmul.mubr.msk.f32.gmra.mxu0 %vm455_vm0, %v443_v35 }
  0xe6   : > { %v5852_v49 = vpop.f32.mrf.mxu0 }
  0xe7   : > { %v624_v50 = vadd.f32 %v5852_v49, %v6644_v48 }
  0xe8   : > { %v618_v51 = vpop.f32.mrf.mxu0 }
  0xe9   : > { %v778_v52 = vmax.f32 %v624_v50, 0.0  ;;  %v619_v53 = vadd.f32 %v6644_v48, %v618_v51 }
  0xea   : > { %v5855_v55 = vpop.f32.mrf.mxu0 }
  0xeb   : > { %v777_v56 = vmax.f32 %v619_v53, 0.0  ;;  %v634_v57 = vadd.f32 %v5855_v55, %v6644_v48  ;;  %v817_v59 = vmul.f32 %v6651_v54, %v778_v52 }
  0xec   : > { %v628_v58 = vpop.f32.mrf.mxu0 }
  0xed   : > { %v780_v60 = vmax.f32 %v634_v57, 0.0  ;;  %v629_v61 = vadd.f32 %v6644_v48, %v628_v58  ;;  %v816_v0 = vmul.f32 %v6651_v54, %v777_v56  ;;  %v856_v5 = vadd.f32 %v6659_v62, %v817_v59 }
  0xee   : > { %v5858_v63 = vpop.f32.mrf.mxu0 }
  0xef   : > { %v819_v1 = vmul.f32 %v6651_v54, %v780_v60  ;;  %v779_v2 = vmax.f32 %v629_v61, 0.0  ;;  %v644_v3 = vadd.f32 %v5858_v63, %v6644_v48  ;;  %v855_v11 = vadd.f32 %v6659_v62, %v816_v0 }
  0xf0   : > { %v638_v4 = vpop.f32.mrf.mxu0 }
  0xf1   : > { %v858_v6 = vadd.f32 %v6659_v62, %v819_v1  ;;  %v818_v7 = vmul.f32 %v6651_v54, %v779_v2  ;;  %v639_v8 = vadd.f32 %v6644_v48, %v638_v4  ;;  %v782_v9 = vmax.f32 %v644_v3, 0.0 }
  0xf2   : > { %v5861_v10 = vpop.f32.mrf.mxu0 }
  0xf3   : > { %v888_v12 = vmax.f32 %v856_v5, %v858_v6  ;;  %v857_v13 = vadd.f32 %v6659_v62, %v818_v7  ;;  %v781_v14 = vmax.f32 %v639_v8, 0.0  ;;  %v654_v15 = vadd.f32 %v5861_v10, %v6644_v48 }
  0xf4   : > { %v648_v16 = vpop.f32.mrf.mxu0  ;;  %v821_v19 = vmul.f32 %v6651_v54, %v782_v9 }
  0xf5   : > { %904 = vst.msk [vmem:[#allocation2 + $0x8] sm:$0xff] %vm455_vm0, %v888_v12  ;;  %v887_v17 = vmax.f32 %v855_v11, %v857_v13  ;;  %v649_v18 = vadd.f32 %v6644_v48, %v648_v16  ;;  %v784_v20 = vmax.f32 %v654_v15, 0.0  ;;  %v820_v22 = vmul.f32 %v6651_v54, %v781_v14 }
  0xf6   : > { %v5864_v21 = vpop.f32.mrf.mxu0  ;;  %v860_v30 = vadd.f32 %v6659_v62, %v821_v19 }
  0xf7   : > { %903 = vst.msk [vmem:[#allocation2] sm:$0xff] %vm455_vm0, %v887_v17  ;;  %v783_v23 = vmax.f32 %v649_v18, 0.0  ;;  %v664_v24 = vadd.f32 %v5864_v21, %v6644_v48  ;;  %v823_v25 = vmul.f32 %v6651_v54, %v784_v20  ;;  %v859_v33 = vadd.f32 %v6659_v62, %v820_v22  ;;  %v998_v21 = vld [vmem:[%s7393_s5 + $0x10] sm:$0xff] }
  0xf8   : > { %v658_v26 = vpop.f32.mrf.mxu0 }
  0xf9   : > { %v822_v27 = vmul.f32 %v6651_v54, %v783_v23  ;;  %v786_v28 = vmax.f32 %v664_v24, 0.0  ;;  %v659_v29 = vadd.f32 %v6644_v48, %v658_v26  ;;  %v862_v31 = vadd.f32 %v6659_v62, %v823_v25 }
  0xfa   : > { %v5867_v32 = vpop.f32.mrf.mxu0 }
  0xfb   : > { %v861_v34 = vadd.f32 %v6659_v62, %v822_v27  ;;  %v674_v35 = vadd.f32 %v5867_v32, %v6644_v48  ;;  %v890_v36 = vmax.f32 %v860_v30, %v862_v31  ;;  %v785_v38 = vmax.f32 %v659_v29, 0.0 }
  0xfc   : > { %v668_v39 = vpop.f32.mrf.mxu0  ;;  %v825_v41 = vmul.f32 %v6651_v54, %v786_v28  ;;  %v997_v28 = vld [vmem:[%s7393_s5 + $0x8] sm:$0xff] }
  0xfd   : > { %v889_v40 = vmax.f32 %v859_v33, %v861_v34  ;;  %v788_v42 = vmax.f32 %v674_v35, 0.0  ;;  %906 = vst.msk [vmem:[#allocation2 + $0x18] sm:$0xff] %vm455_vm0, %v890_v36  ;;  %v669_v45 = vadd.f32 %v6644_v48, %v668_v39  ;;  %v824_v53 = vmul.f32 %v6651_v54, %v785_v38  ;;  %v996_v35 = vld [vmem:[%s7393_s5] sm:$0xff] }
  0xfe   : > { %v919_v43 = vld [vmem:[#allocation2] ss:$2 sm:$0xff]  ;;  %v935_v44 = vld [vmem:[#allocation2 + $0x1] ss:$2 sm:$0xff]  ;;  %v5870_v49 = vpop.f32.mrf.mxu0  ;;  %v864_v57 = vadd.f32 %v6659_v62, %v825_v41 }
  0xff   : > { %v950_v50 = vmax.f32 %v919_v43, %v935_v44  ;;  %905 = vst.msk [vmem:[#allocation2 + $0x10] sm:$0xff] %vm455_vm0, %v889_v40  ;;  %v827_v51 = vmul.f32 %v6651_v54, %v788_v42  ;;  %v684_v52 = vadd.f32 %v5870_v49, %v6644_v48  ;;  %v787_v55 = vmax.f32 %v669_v45, 0.0  ;;  %v6737_v49 = vld [vmem:[%s7393_s5 + $0x58] sm:$0xff] }
 0x100   : > { %v678_v56 = vpop.f32.mrf.mxu0  ;;  %v863_v3 = vadd.f32 %v6659_v62, %v824_v53 }
 0x101   : > { %v866_v58 = vadd.f32 %v6659_v62, %v827_v51  ;;  %v790_v59 = vmax.f32 %v684_v52, 0.0  ;;  %v679_v60 = vadd.f32 %v6644_v48, %v678_v56  ;;  %980 = vst.msk [vmem:[#allocation3 + $0x11] sm:$0xff] %vm455_vm0, %v950_v50  ;;  %v826_v61 = vmul.f32 %v6651_v54, %v787_v55  ;;  %v5508_v55 = vld [vmem:[%s7393_s5 + $0xd0] sm:$0xff] }
 0x102   : > { %v5873_v63 = vpop.f32.mrf.mxu0 }
 0x103   : > { %v892_v0 = vmax.f32 %v864_v57, %v866_v58  ;;  %v789_v1 = vmax.f32 %v679_v60, 0.0  ;;  %v694_v2 = vadd.f32 %v5873_v63, %v6644_v48  ;;  %v865_v4 = vadd.f32 %v6659_v62, %v826_v61  ;;  %v5507_v61 = vld [vmem:[%s7393_s5 + $0xc8] sm:$0xff] }
 0x104   : > { %v829_v5 = vmul.f32 %v6651_v54, %v790_v59  ;;  %v688_v6 = vpop.f32.mrf.mxu0 }
 0x105   : > { %908 = vst.msk [vmem:[#allocation2 + $0x28] sm:$0xff] %vm455_vm0, %v892_v0  ;;  %v792_v7 = vmax.f32 %v694_v2, 0.0  ;;  %v689_v8 = vadd.f32 %v6644_v48, %v688_v6  ;;  %v891_v11 = vmax.f32 %v863_v3, %v865_v4  ;;  %v828_v12 = vmul.f32 %v6651_v54, %v789_v1 }
 0x106   : > { %v921_v9 = vld [vmem:[#allocation2 + $0x10] ss:$2 sm:$0xff]  ;;  %v937_v10 = vld [vmem:[#allocation2 + $0x11] ss:$2 sm:$0xff]  ;;  %v5876_v13 = vpop.f32.mrf.mxu0  ;;  %v868_v17 = vadd.f32 %v6659_v62, %v829_v5  ;;  %v5506_v5 = vld [vmem:[%s7393_s5 + $0xc0] sm:$0xff] }
 0x107   : > { %v951_v14 = vmax.f32 %v921_v9, %v937_v10  ;;  %v831_v15 = vmul.f32 %v6651_v54, %v792_v7  ;;  %v791_v16 = vmax.f32 %v689_v8, 0.0  ;;  %907 = vst.msk [vmem:[#allocation2 + $0x20] sm:$0xff] %vm455_vm0, %v891_v11  ;;  %v704_v18 = vadd.f32 %v5876_v13, %v6644_v48 }
 0x108   : > { %v698_v19 = vpop.f32.mrf.mxu0  ;;  %v1001_v20 = vld [vmem:[#allocation3 + $0x11] sm:$0xff]  ;;  %v867_v25 = vadd.f32 %v6659_v62, %v828_v12 }
 0x109   : > { %v870_v22 = vadd.f32 %v6659_v62, %v831_v15  ;;  %v830_v23 = vmul.f32 %v6651_v54, %v791_v16  ;;  %v699_v24 = vadd.f32 %v6644_v48, %v698_v19  ;;  %5907 = vmatmul.mubr.msk.f32.vlgmr.msra.gmra.mxu1 %vm455_vm0, %v1001_v20  ;;  %981 = vst.msk [vmem:[#allocation3 + $0x21] sm:$0xff] %vm455_vm0, %v951_v14  ;;  %v794_v26 = vmax.f32 %v704_v18, 0.0  ;;  %v6770_v12 = vld [vmem:[%s7393_s5 + $0x118] sm:$0xff] }
 0x10a   : > { %5986 = vmatprep.mubr.msk.f32.mxu0 %vm455_vm0, %v1001_v20  ;;  %v5879_v27 = vpop.f32.mrf.mxu0  ;;  %5919 = vmatpush3.msra.mxu1 %v6632_v46 }
 0x10b   : > { %v894_v29 = vmax.f32 %v868_v17, %v870_v22  ;;  %v869_v30 = vadd.f32 %v6659_v62, %v830_v23  ;;  %v793_v31 = vmax.f32 %v699_v24, 0.0  ;;  %v714_v32 = vadd.f32 %v5879_v27, %v6644_v48  ;;  %5920 = vmatprep.subr.mxu1 %v998_v21 }
 0x10c   : > { %v833_v33 = vmul.f32 %v6651_v54, %v794_v26  ;;  %v708_v34 = vpop.f32.mrf.mxu0  ;;  %5921 = vmatpush3.msra.mxu1 %v998_v21 }
 0x10d   : > { %910 = vst.msk [vmem:[#allocation2 + $0x38] sm:$0xff] %vm455_vm0, %v894_v29  ;;  %v893_v46 = vmax.f32 %v867_v25, %v869_v30  ;;  %v796_v36 = vmax.f32 %v714_v32, 0.0  ;;  %v709_v38 = vadd.f32 %v6644_v48, %v708_v34  ;;  %5922 = vmatprep.subr.mxu1 %v997_v28  ;;  %v832_v42 = vmul.f32 %v6651_v54, %v793_v31 }
 0x10e   : > { %v5882_v39 = vpop.f32.mrf.mxu0  ;;  %5923 = vmatpush3.msra.mxu1 %v997_v28  ;;  %v923_v40 = vld [vmem:[#allocation2 + $0x20] ss:$2 sm:$0xff]  ;;  %v939_v41 = vld [vmem:[#allocation2 + $0x21] ss:$2 sm:$0xff]  ;;  %v872_v51 = vadd.f32 %v6659_v62, %v833_v33 }
 0x10f   : > { %909 = vst.msk [vmem:[#allocation2 + $0x30] sm:$0xff] %vm455_vm0, %v893_v46  ;;  %v835_v43 = vmul.f32 %v6651_v54, %v796_v36  ;;  %v795_v44 = vmax.f32 %v709_v38, 0.0  ;;  %v724_v45 = vadd.f32 %v5882_v39, %v6644_v48  ;;  %5924 = vmatprep.subr.mxu1 %v996_v35  ;;  %v952_v50 = vmax.f32 %v923_v40, %v939_v41 }
 0x110   : > { %v718_v52 = vpop.f32.mrf.mxu0  ;;  %v6740_v53 = vld [vmem:[#allocation3 + $0x21] sm:$0xff]  ;;  %5925 = vmatpush3.msra.mxu1 %v996_v35  ;;  %v871_v63 = vadd.f32 %v6659_v62, %v832_v42 }
 0x111   : > { %v874_v56 = vadd.f32 %v6659_v62, %v835_v43  ;;  %v834_v57 = vmul.f32 %v6651_v54, %v795_v44  ;;  %v719_v58 = vadd.f32 %v6644_v48, %v718_v52  ;;  %5909 = vmatprep.mubr.msk.f32.mxu1 %vm455_vm0, %v6740_v53  ;;  %5987 = vmatmul.mubr.msk.f32.vlgmr.msra.gmra.mxu0 %vm455_vm0, %v6740_v53  ;;  %v798_v59 = vmax.f32 %v724_v45, 0.0 }
 0x112   : > { %982 = vst.msk [vmem:[#allocation3 + $0x31] sm:$0xff] %vm455_vm0, %v952_v50  ;;  %v5885_v60 = vpop.f32.mrf.mxu0  ;;  %5938 = vmatprep.subr.mxu1 %v6737_v49  ;;  %6019 = vmatpush3.msra.mxu0 %v6638_v47 }
 0x113   : > { %v896_v0 = vmax.f32 %v872_v51, %v874_v56  ;;  %v873_v1 = vadd.f32 %v6659_v62, %v834_v57  ;;  %v797_v2 = vmax.f32 %v719_v58, 0.0  ;;  %6020 = vmatprep.subr.mxu0 %v5508_v55  ;;  %v734_v3 = vadd.f32 %v5885_v60, %v6644_v48 }
 0x114   : > { %v728_v4 = vpop.f32.mrf.mxu0  ;;  %6021 = vmatpush3.msra.mxu0 %v5508_v55  ;;  %v837_v9 = vmul.f32 %v6651_v54, %v798_v59 }
 0x115   : > { %912 = vst.msk [vmem:[#allocation2 + $0x48] sm:$0xff] %vm455_vm0, %v896_v0  ;;  %v895_v47 = vmax.f32 %v871_v63, %v873_v1  ;;  %v729_v6 = vadd.f32 %v6644_v48, %v728_v4  ;;  %6022 = vmatprep.subr.mxu0 %v5507_v61  ;;  %v800_v10 = vmax.f32 %v734_v3, 0.0  ;;  %v836_v14 = vmul.f32 %v6651_v54, %v797_v2 }
 0x116   : > { %v925_v7 = vld [vmem:[#allocation2 + $0x30] ss:$2 sm:$0xff]  ;;  %v941_v8 = vld [vmem:[#allocation2 + $0x31] ss:$2 sm:$0xff]  ;;  %v5888_v11 = vpop.f32.mrf.mxu0  ;;  %6023 = vmatpush3.msra.mxu0 %v5507_v61  ;;  %v876_v23 = vadd.f32 %v6659_v62, %v837_v9 }
 0x117   : > { %v953_v13 = vmax.f32 %v925_v7, %v941_v8  ;;  %911 = vst.msk [vmem:[#allocation2 + $0x40] sm:$0xff] %vm455_vm0, %v895_v47  ;;  %v799_v15 = vmax.f32 %v729_v6, 0.0  ;;  %v744_v16 = vadd.f32 %v5888_v11, %v6644_v48  ;;  %6024 = vmatprep.subr.mxu0 %v5506_v5  ;;  %v839_v17 = vmul.f32 %v6651_v54, %v800_v10 }
 0x118   : > { %v738_v18 = vpop.f32.mrf.mxu0  ;;  %6025 = vmatpush3.msra.mxu0 %v5506_v5  ;;  %v875_v26 = vadd.f32 %v6659_v62, %v836_v14 }
 0x119   : > { %983 = vst.msk [vmem:[#allocation3 + $0x41] sm:$0xff] %vm455_vm0, %v953_v13  ;;  %v838_v19 = vmul.f32 %v6651_v54, %v799_v15  ;;  %v802_v20 = vmax.f32 %v744_v16, 0.0  ;;  %v739_v21 = vadd.f32 %v6644_v48, %v738_v18  ;;  %v6779_v22 = vld [vmem:[#allocation3 + $0x31] sm:$0xff]  ;;  %6058 = vmatprep.subr.mxu0 %v6770_v12  ;;  %v878_v24 = vadd.f32 %v6659_v62, %v839_v17 }
 0x11a   : > { %5910 = vmatmul.mubr.msk.f32.gmra.mxu1 %vm455_vm0, %v6779_v22  ;;  %5989 = vmatprep.mubr.msk.f32.mxu0 %vm455_vm0, %v6779_v22  ;;  %v5891_v25 = vpop.f32.mrf.mxu0 }
 0x11b   : > { %v877_v27 = vadd.f32 %v6659_v62, %v838_v19  ;;  %v754_v28 = vadd.f32 %v5891_v25, %v6644_v48  ;;  %v898_v29 = vmax.f32 %v876_v23, %v878_v24  ;;  %v801_v30 = vmax.f32 %v739_v21, 0.0  ;;  %v988_v24 = vld [vmem:[#allocation3] sm:$0xff] }
 0x11c   : > { %v748_v31 = vpop.f32.mrf.mxu0  ;;  %v841_v33 = vmul.f32 %v6651_v54, %v802_v20 }
 0x11d   : > { %v897_v32 = vmax.f32 %v875_v26, %v877_v27  ;;  %v804_v34 = vmax.f32 %v754_v28, 0.0  ;;  %914 = vst.msk [vmem:[#allocation2 + $0x58] sm:$0xff] %vm455_vm0, %v898_v29  ;;  %v749_v36 = vadd.f32 %v6644_v48, %v748_v31  ;;  %v840_v42 = vmul.f32 %v6651_v54, %v801_v30  ;;  %v6847_v26 = vld [vmem:[#allocation3 + $0x10] sm:$0xff]  ;;  %v6854_v28 = vld [vmem:[#allocation3 + $0x20] sm:$0xff]  ;;  %v5459_v30 = vld [vmem:[%s7393_s5 + $0x48] sm:$0xff] }
 0x11e   : > { %v927_v35 = vld [vmem:[#allocation2 + $0x40] ss:$2 sm:$0xff]  ;;  %v943_v46 = vld [vmem:[#allocation2 + $0x41] ss:$2 sm:$0xff]  ;;  %v5894_v38 = vpop.f32.mrf.mxu0  ;;  %v880_v50 = vadd.f32 %v6659_v62, %v841_v33  ;;  %v5460_v27 = vld [vmem:[%s7393_s5 + $0x50] sm:$0xff] }
 0x11f   : > { %v954_v39 = vmax.f32 %v927_v35, %v943_v46  ;;  %913 = vst.msk [vmem:[#allocation2 + $0x50] sm:$0xff] %vm455_vm0, %v897_v32  ;;  %v843_v40 = vmul.f32 %v6651_v54, %v804_v34  ;;  %v764_v41 = vadd.f32 %v5894_v38, %v6644_v48  ;;  %v803_v43 = vmax.f32 %v749_v36, 0.0  ;;  %v6864_v31 = vld [vmem:[#allocation3 + $0x30] sm:$0xff]  ;;  %v5458_v32 = vld [vmem:[%s7393_s5 + $0x40] sm:$0xff]  ;;  %v5473_v34 = vld [vmem:[%s7393_s5 + $0x78] sm:$0xff] }
 0x120   : > { %v758_v44 = vpop.f32.mrf.mxu0  ;;  %v6798_v45 = vld [vmem:[#allocation3 + $0x41] sm:$0xff]  ;;  %v879_v63 = vadd.f32 %v6659_v62, %v840_v42  ;;  %v5532_v46 = vld [vmem:[%s7393_s5 + $0x110] sm:$0xff] }
 0x121   : > { %984 = vst.msk [vmem:[#allocation3 + $0x51] sm:$0xff] %vm455_vm0, %v954_v39  ;;  %v882_v51 = vadd.f32 %v6659_v62, %v843_v40  ;;  %v806_v52 = vmax.f32 %v764_v41, 0.0  ;;  %v759_v55 = vadd.f32 %v6644_v48, %v758_v44  ;;  %5912 = vmatprep.mubr.msk.f32.mxu1 %vm455_vm0, %v6798_v45  ;;  %5990 = vmatmul.mubr.msk.f32.gmra.mxu0 %vm455_vm0, %v6798_v45  ;;  %v1271_v36 = vld [vmem:[#allocation3 + $0x2] sm:$0xff]  ;;  %v5472_v41 = vld [vmem:[%s7393_s5 + $0x70] sm:$0xff] }
 0x122   : > { %v842_v56 = vmul.f32 %v6651_v54, %v803_v43  ;;  %v5897_v57 = vpop.f32.mrf.mxu0  ;;  %v5531_v39 = vld [vmem:[%s7393_s5 + $0x108] sm:$0xff]  ;;  %v1879_v43 = vld [vmem:[#allocation3 + $0x90] sm:$0xff]  ;;  %v5530_v44 = vld [vmem:[%s7393_s5 + $0x100] sm:$0xff] }
 0x123   : > { %v900_v58 = vmax.f32 %v880_v50, %v882_v51  ;;  %v845_v59 = vmul.f32 %v6651_v54, %v806_v52  ;;  %v805_v60 = vmax.f32 %v759_v55, 0.0  ;;  %v774_v61 = vadd.f32 %v5897_v57, %v6644_v48  ;;  %v6921_v42 = vld [vmem:[#allocation3 + $0x22] sm:$0xff]  ;;  %v1274_v50 = vld [vmem:[#allocation3 + $0x32] sm:$0xff] }
 0x124   : > { %v881_v0 = vadd.f32 %v6659_v62, %v842_v56  ;;  %v768_v1 = vpop.f32.mrf.mxu0  ;;  %v5471_v51 = vld [vmem:[%s7393_s5 + $0x68] sm:$0xff]  ;;  %v5470_v55 = vld [vmem:[%s7393_s5 + $0x60] sm:$0xff] }
 0x125   : > { %916 = vst.msk [vmem:[#allocation2 + $0x68] sm:$0xff] %vm455_vm0, %v900_v58  ;;  %v844_v2 = vmul.f32 %v6651_v54, %v805_v60  ;;  %v808_v3 = vmax.f32 %v774_v61, 0.0  ;;  %v769_v4 = vadd.f32 %v6644_v48, %v768_v1  ;;  %v884_v8 = vadd.f32 %v6659_v62, %v845_v59  ;;  %v1275_v52 = vld [vmem:[#allocation3 + $0x42] sm:$0xff]  ;;  %v5497_v58 = vld [vmem:[%s7393_s5 + $0xb8] sm:$0xff]  ;;  %v5496_v61 = vld [vmem:[%s7393_s5 + $0xb0] sm:$0xff] }
 0x126   : > { %v929_v5 = vld [vmem:[#allocation2 + $0x50] ss:$2 sm:$0xff]  ;;  %v945_v47 = vld [vmem:[#allocation2 + $0x51] ss:$2 sm:$0xff]  ;;  %v899_v6 = vmax.f32 %v879_v63, %v881_v0  ;;  %v5495_v0 = vld [vmem:[%s7393_s5 + $0xa8] sm:$0xff] }
 0x127   : > { %v955_v7 = vmax.f32 %v929_v5, %v945_v47  ;;  %v847_v9 = vmul.f32 %v6651_v54, %v808_v3  ;;  %v807_v10 = vmax.f32 %v769_v4, 0.0  ;;  %v883_v13 = vadd.f32 %v6659_v62, %v844_v2  ;;  %v2179_v63 = vld [vmem:[#allocation3 + $0x92] sm:$0xff]  ;;  %v5494_v1 = vld [vmem:[%s7393_s5 + $0xa0] sm:$0xff]  ;;  %v5519_v4 = vld [vmem:[%s7393_s5 + $0xe8] sm:$0xff] }
 0x128   : > { %915 = vst.msk [vmem:[#allocation2 + $0x60] sm:$0xff] %vm455_vm0, %v899_v6  ;;  %v6819_v11 = vld [vmem:[#allocation3 + $0x51] sm:$0xff]  ;;  %v5518_v5 = vld [vmem:[%s7393_s5 + $0xe0] sm:$0xff] }
 0x129   : > { %985 = vst.msk [vmem:[#allocation3 + $0x61] sm:$0xff] %vm455_vm0, %v955_v7  ;;  %v886_v14 = vadd.f32 %v6659_v62, %v847_v9  ;;  %v846_v48 = vmul.f32 %v6651_v54, %v807_v10  ;;  %5913 = vmatmul.mubr.msk.f32.gmra.mxu1 %vm455_vm0, %v6819_v11  ;;  %5992 = vmatprep.mubr.msk.f32.mxu0 %vm455_vm0, %v6819_v11  ;;  %v6879_v33 = vld [vmem:[#allocation3 + $0x50] sm:$0xff]  ;;  %v5521_v2 = vld [vmem:[%s7393_s5 + $0xf8] sm:$0xff]  ;;  %v2419_v6 = vld [vmem:[#allocation5] sm:$0xf] }
 0x12a   : > { %v1276_v56 = vld [vmem:[#allocation3 + $0x52] sm:$0xff]  ;;  %v7061_v9 = vld [vmem:[%s7397_s9 + $0x20] sm:$0xff] }
 0x12b   : > { %v902_v15 = vmax.f32 %v884_v8, %v886_v14  ;;  %v885_v16 = vadd.f32 %v6659_v62, %v846_v48  ;;  %v5520_v3 = vld [vmem:[%s7393_s5 + $0xf0] sm:$0xff]  ;;  %v2570_v8 = vld [vmem:[#allocation5 + $0x2] sm:$0xf]  ;;  %7424 = vst [vmem:[#allocation13_spill] sm:$0xff] %v7061_v9  ;;  %v7066_v10 = vld [vmem:[%s7397_s9 + $0x18] sm:$0xff] }
 0x12c   : > { %v2029_v47 = vld [vmem:[#allocation3 + $0x91] sm:$0xff]  ;;  %7425 = vst [vmem:[#allocation14_spill] sm:$0xff] %v7066_v10 }
 0x12d   : > { %918 = vst.msk [vmem:[#allocation2 + $0x78] sm:$0xff] %vm455_vm0, %v902_v15  ;;  %v901_v17 = vmax.f32 %v883_v13, %v885_v16  ;;  %v7051_v7 = vld [vmem:[%s7397_s9 + $0x10] sm:$0xff] }
 0x12e   : > { %7423 = vst [vmem:[#allocation12_spill] sm:$0xff] %v7051_v7 }
 0x12f   : > { %v931_v18 = vld [vmem:[#allocation2 + $0x60] ss:$2 sm:$0xff]  ;;  %v947_v19 = vld [vmem:[#allocation2 + $0x61] ss:$2 sm:$0xff]  ;;  %917 = vst.msk [vmem:[#allocation2 + $0x70] sm:$0xff] %vm455_vm0, %v901_v17 }
 0x130   : > { %v956_v20 = vmax.f32 %v931_v18, %v947_v19  ;;  %v6832_v21 = vld [vmem:[#allocation3 + $0x61] sm:$0xff] }
 0x131   : > { %5915 = vmatprep.mubr.msk.f32.mxu1 %vm455_vm0, %v6832_v21  ;;  %5993 = vmatmul.mubr.msk.f32.gmra.mxu0 %vm455_vm0, %v6832_v21  ;;  %v6888_v35 = vld [vmem:[#allocation3 + $0x60] sm:$0xff] }
 0x132   : > { %986 = vst.msk [vmem:[#allocation3 + $0x71] sm:$0xff] %vm455_vm0, %v956_v20  ;;  %v1277_v57 = vld [vmem:[#allocation3 + $0x62] sm:$0xff] }
 0x136   : > { %v933_v54 = vld [vmem:[#allocation2 + $0x70] ss:$2 sm:$0xff]  ;;  %v949_v62 = vld [vmem:[#allocation2 + $0x71] ss:$2 sm:$0xff] }
 0x137   : > { %v957_v23 = vmax.f32 %v933_v54, %v949_v62 }
 0x139   : > { %987 = vst.msk [vmem:[#allocation3 + $0x81] sm:$0xff] %vm455_vm0, %v957_v23  ;;  %v6840_v25 = vld [vmem:[#allocation3 + $0x71] sm:$0xff] }
 0x13a   : > { %5916 = vmatmul.mubr.msk.f32.gmra.mxu1 %vm455_vm0, %v6840_v25  ;;  %5995 = vmatprep.mubr.msk.f32.mxu0 %vm455_vm0, %v6840_v25  ;;  %v6898_v38 = vld [vmem:[#allocation3 + $0x70] sm:$0xff] }
 0x13b   : > { %5926 = vmatprep.mubr.msk.f32.mxu1 %vm455_vm0, %v988_v24  ;;  %v1278_v59 = vld [vmem:[#allocation3 + $0x72] sm:$0xff] }
 0x13e   : > { %5927 = vmatmul.mubr.msk.f32.vlgmr.msra.gmra.mxu1 %vm455_vm0, %v6847_v26 }
 0x13f   : > { %5939 = vmatpush3.msra.mxu1 %v6737_v49  ;;  %5929 = vmatprep.mubr.msk.f32.mxu1 %vm455_vm0, %v6854_v28  ;;  %v6870_v49 = vld [vmem:[#allocation3 + $0x40] sm:$0xff] }
 0x140   : > { %5940 = vmatprep.subr.mxu1 %v5460_v27  ;;  %v6859_v29 = vld [vmem:[#allocation3 + $0x81] sm:$0xff] }
 0x141   : > { %5941 = vmatpush3.msra.mxu1 %v5460_v27  ;;  %5996 = vmatmul.mubr.msk.f32.gmra.mxu0 %vm455_vm0, %v6859_v29  ;;  %v6910_v40 = vld [vmem:[#allocation3 + $0x80] sm:$0xff] }
 0x142   : > { %5930 = vmatmul.mubr.msk.f32.gmra.mxu1 %vm455_vm0, %v6864_v31  ;;  %6026 = vmatprep.mubr.msk.f32.mxu0 %vm455_vm0, %v6854_v28  ;;  %v2178_v60 = vld [vmem:[#allocation3 + $0x82] sm:$0xff] }
 0x143   : > { %5932 = vmatprep.mubr.msk.f32.mxu1 %vm455_vm0, %v6870_v49  ;;  %5942 = vmatprep.subr.mxu1 %v5459_v30 }
 0x144   : > { %5943 = vmatpush3.msra.mxu1 %v5459_v30 }
 0x145   : > { %6027 = vmatmul.mubr.msk.f32.vlgmr.msra.gmra.mxu0 %vm455_vm0, %v6864_v31  ;;  %5944 = vmatprep.subr.mxu1 %v5458_v32 }
 0x146   : > { %5933 = vmatmul.mubr.msk.f32.gmra.mxu1 %vm455_vm0, %v6879_v33  ;;  %6029 = vmatprep.mubr.msk.f32.mxu0 %vm455_vm0, %v6870_v49 }
 0x147   : > { %5935 = vmatprep.mubr.msk.f32.mxu1 %vm455_vm0, %v6888_v35  ;;  %5945 = vmatpush3.msra.mxu1 %v5458_v32 }
 0x148   : > { %5958 = vmatprep.subr.mxu1 %v5473_v34  ;;  %6059 = vmatpush3.msra.mxu0 %v6770_v12  ;;  %v6912_v12 = vld [vmem:[#allocation3 + $0x12] sm:$0xff] }
 0x149   : > { %6030 = vmatmul.mubr.msk.f32.gmra.mxu0 %vm455_vm0, %v6879_v33  ;;  %6060 = vmatprep.subr.mxu0 %v5532_v46 }
 0x14a   : > { %5936 = vmatmul.mubr.msk.f32.gmra.mxu1 %vm455_vm0, %v6898_v38  ;;  %6032 = vmatprep.mubr.msk.f32.mxu0 %vm455_vm0, %v6888_v35 }
 0x14b   : > { %5946 = vmatprep.mubr.msk.f32.mxu1 %vm455_vm0, %v1271_v36  ;;  %6061 = vmatpush3.msra.mxu0 %v5532_v46 }
 0x14c   : > { %6062 = vmatprep.subr.mxu0 %v5531_v39 }
 0x14d   : > { %6033 = vmatmul.mubr.msk.f32.gmra.mxu0 %vm455_vm0, %v6898_v38 }
 0x14e   : > { %5947 = vmatmul.mubr.msk.f32.vlgmr.msra.gmra.mxu1 %vm455_vm0, %v6912_v12  ;;  %6035 = vmatprep.mubr.msk.f32.mxu0 %vm455_vm0, %v6910_v40 }
 0x14f   : > { %5959 = vmatpush3.msra.mxu1 %v5473_v34  ;;  %5949 = vmatprep.mubr.msk.f32.mxu1 %vm455_vm0, %v6921_v42 }
 0x150   : > { %5960 = vmatprep.subr.mxu1 %v5472_v41  ;;  %6063 = vmatpush3.msra.mxu0 %v5531_v39 }
 0x151   : > { %5961 = vmatpush3.msra.mxu1 %v5472_v41  ;;  %6036 = vmatmul.mubr.msk.f32.gmra.mxu0 %vm455_vm0, %v1879_v43 }
 0x152   : > { %5950 = vmatmul.mubr.msk.f32.gmra.mxu1 %vm455_vm0, %v1274_v50  ;;  %6066 = vmatprep.mubr.msk.f32.mxu0 %vm455_vm0, %v6921_v42 }
 0x153   : > { %5952 = vmatprep.mubr.msk.f32.mxu1 %vm455_vm0, %v1275_v52  ;;  %6064 = vmatprep.subr.mxu0 %v5530_v44 }
 0x154   : > { %5962 = vmatprep.subr.mxu1 %v5471_v51  ;;  %6065 = vmatpush3.msra.mxu0 %v5530_v44 }
 0x155   : > { %5963 = vmatpush3.msra.mxu1 %v5471_v51  ;;  %6067 = vmatmul.mubr.msk.f32.vlgmr.msra.gmra.mxu0 %vm455_vm0, %v1274_v50 }
 0x156   : > { %5953 = vmatmul.mubr.msk.f32.gmra.mxu1 %vm455_vm0, %v1276_v56  ;;  %6069 = vmatprep.mubr.msk.f32.mxu0 %vm455_vm0, %v1275_v52 }
 0x157   : > { %5955 = vmatprep.mubr.msk.f32.mxu1 %vm455_vm0, %v1277_v57  ;;  %5964 = vmatprep.subr.mxu1 %v5470_v55 }
 0x158   : > { %5965 = vmatpush3.msra.mxu1 %v5470_v55  ;;  %6098 = vmatprep.subr.mxu0 %v7401_v37 }
 0x159   : > { %6070 = vmatmul.mubr.msk.f32.gmra.mxu0 %vm455_vm0, %v1276_v56  ;;  %5998 = vmatprep.subr.mxu1 %v5497_v58 }
 0x15a   : > { %5956 = vmatmul.mubr.msk.f32.gmra.mxu1 %vm455_vm0, %v1278_v59  ;;  %6072 = vmatprep.mubr.msk.f32.mxu0 %vm455_vm0, %v1277_v57 }
 0x15b   : > { %5966 = vmatprep.mubr.msk.f32.mxu1 %vm455_vm0, %v6847_v26  ;;  %6099 = vmatpush3.msra.mxu0 %v7061_v9 }
 0x15c   : > { %6108 = vmatprep.subr.mxu0 %v7401_v37 }
 0x15d   : > { %6073 = vmatmul.mubr.msk.f32.gmra.mxu0 %vm455_vm0, %v1278_v59 }
 0x15e   : > { %5967 = vmatmul.mubr.msk.f32.vlgmr.msra.gmra.mxu1 %vm455_vm0, %v6854_v28  ;;  %6075 = vmatprep.mubr.msk.f32.mxu0 %vm455_vm0, %v2178_v60 }
 0x15f   : > { %5999 = vmatpush3.msra.mxu1 %v5497_v58  ;;  %5969 = vmatprep.mubr.msk.f32.mxu1 %vm455_vm0, %v6864_v31 }
 0x160   : > { %6000 = vmatprep.subr.mxu1 %v5496_v61 }
 0x161   : > { %6001 = vmatpush3.msra.mxu1 %v5496_v61  ;;  %6076 = vmatmul.mubr.msk.f32.gmra.mxu0 %vm455_vm0, %v2179_v63 }
 0x162   : > { %5970 = vmatmul.mubr.msk.f32.gmra.mxu1 %vm455_vm0, %v6870_v49  ;;  %6002 = vmatprep.subr.mxu1 %v5495_v0 }
 0x163   : > { %5972 = vmatprep.mubr.msk.f32.mxu1 %vm455_vm0, %v6879_v33  ;;  %6003 = vmatpush3.msra.mxu1 %v5495_v0 }
 0x164   : > { %6004 = vmatprep.subr.mxu1 %v5494_v1  ;;  %6100 = vmatprep.mubr.msk.f32.mxu0 %vm6366_vm4, %v7401_v37 }
 0x165   : > { %6005 = vmatpush3.msra.mxu1 %v5494_v1 }
 0x166   : > { %5973 = vmatmul.mubr.msk.f32.gmra.mxu1 %vm455_vm0, %v6888_v35  ;;  %6038 = vmatprep.subr.mxu1 %v5521_v2 }
 0x167   : > { %5975 = vmatprep.mubr.msk.f32.mxu1 %vm455_vm0, %v6898_v38 }
 0x16a   : > { %5976 = vmatmul.mubr.msk.f32.gmra.mxu1 %vm455_vm0, %v6910_v40 }
 0x16b   : > { %6006 = vmatprep.mubr.msk.f32.mxu1 %vm455_vm0, %v6912_v12 }
 0x16e   : > { %6007 = vmatmul.mubr.msk.f32.vlgmr.msra.gmra.mxu1 %vm455_vm0, %v6921_v42 }
 0x16f   : > { %6039 = vmatpush3.msra.mxu1 %v5521_v2  ;;  %6009 = vmatprep.mubr.msk.f32.mxu1 %vm455_vm0, %v1274_v50 }
 0x170   : > { %6040 = vmatprep.subr.mxu1 %v5520_v3 }
 0x171   : > { %6041 = vmatpush3.msra.mxu1 %v5520_v3 }
 0x172   : > { %6010 = vmatmul.mubr.msk.f32.gmra.mxu1 %vm455_vm0, %v1275_v52  ;;  %6042 = vmatprep.subr.mxu1 %v5519_v4 }
 0x173   : > { %6012 = vmatprep.mubr.msk.f32.mxu1 %vm455_vm0, %v1276_v56  ;;  %6043 = vmatpush3.msra.mxu1 %v5519_v4 }
 0x174   : > { %6044 = vmatprep.subr.mxu1 %v5518_v5 }
 0x175   : > { %6045 = vmatpush3.msra.mxu1 %v5518_v5 }
 0x176   : > { %6013 = vmatmul.mubr.msk.f32.gmra.mxu1 %vm455_vm0, %v1277_v57  ;;  %6078 = vmatprep.subr.mxu1 %v7401_v37 }
 0x177   : > { %6015 = vmatprep.mubr.msk.f32.mxu1 %vm455_vm0, %v1278_v59 }
 0x17a   : > { %6016 = vmatmul.mubr.msk.f32.gmra.mxu1 %vm455_vm0, %v2178_v60 }
 0x17b   : > { %6046 = vmatprep.mubr.msk.f32.mxu1 %vm455_vm0, %v6740_v53  ;;  %v7027_v53 = vld [vmem:[%s7397_s9 + $0x8] sm:$0xff] }
 0x17c   : > { %7421 = vst [vmem:[#allocation10_spill] sm:$0xff] %v7027_v53 }
 0x17e   : > { %6047 = vmatmul.mubr.msk.f32.vlgmr.msra.gmra.mxu1 %vm455_vm0, %v6779_v22  ;;  %v2421_v22 = vld [vmem:[#allocation5 + $0x1] sm:$0xf] }
 0x17f   : > { %6049 = vmatprep.mubr.msk.f32.mxu1 %vm455_vm0, %v6798_v45  ;;  %6079 = vmatpush3.msra.mxu1 %v7027_v53  ;;  %v7041_v45 = vld [vmem:[%s7397_s9] sm:$0xff] }
 0x180   : > { %6083 = vmatprep.subr.mxu1 %v7401_v37  ;;  %7422 = vst [vmem:[#allocation11_spill] sm:$0xff] %v7041_v45 }
 0x182   : > { %6050 = vmatmul.mubr.msk.f32.gmra.mxu1 %vm455_vm0, %v6819_v11 }
 0x183   : > { %6052 = vmatprep.mubr.msk.f32.mxu1 %vm455_vm0, %v6832_v21 }
 0x186   : > { %6053 = vmatmul.mubr.msk.f32.gmra.mxu1 %vm455_vm0, %v6840_v25 }
 0x187   : > { %6055 = vmatprep.mubr.msk.f32.mxu1 %vm455_vm0, %v6859_v29 }
 0x18a   : > { %6056 = vmatmul.mubr.msk.f32.gmra.mxu1 %vm455_vm0, %v2029_v47 }
 0x18b   : > { %6080 = vmatprep.mubr.msk.f32.mxu1 %vm6366_vm4, %v7401_v37 }
 0x18e   : > { %6081 = vmatmul.mubr.msk.f32.vlgmr.msra.gmra.mxu1 %vm2379_vm3, %v2421_v22 }
 0x18f   : > { %6085 = vmatprep.mubr.msk.f32.mxu1 %vm6366_vm4, %v7401_v37  ;;  %6084 = vmatpush3.msra.mxu1 %v7041_v45 }
 0x190   : > { %6088 = vmatprep.subr.mxu1 %v7401_v37 }
 0x192   : > { %6086 = vmatmul.mubr.msk.f32.vlgmr.msra.gmra.mxu1 %vm2379_vm3, %v2419_v6 }
 0x193   : > { %6090 = vmatprep.mubr.msk.f32.mxu1 %vm6366_vm4, %v7401_v37  ;;  %6089 = vmatpush3.msra.mxu1 %v7051_v7 }
 0x194   : > { %6093 = vmatprep.subr.mxu1 %v7401_v37 }
 0x196   : > { %6091 = vmatmul.mubr.msk.f32.vlgmr.msra.gmra.mxu1 %vm2379_vm3, %v2570_v8 }
 0x197   : > { %6095 = vmatprep.mubr.msk.f32.mxu1 %vm6366_vm4, %v7401_v37  ;;  %6094 = vmatpush3.msra.mxu1 %v7066_v10 }
 0x198   : > { %6103 = vmatprep.subr.mxu1 %v7401_v37 }
 0x1c9   : > { %v5908_v11 = vpop.f32.mrf.mxu1 }
 0x1cb   : > { %v1103_v13 = vpop.f32.mrf.mxu1 }
 0x1d1   : > { %v5988_v16 = vpop.f32.mrf.mxu0 }
 0x1d3   : > { %v7078_v19 = vpop.f32.mrf.mxu0 }
 0x1da   : > { %v5911_v14 = vpop.f32.mrf.mxu1 }
 0x1dc   : > { %v1113_v48 = vpop.f32.mrf.mxu1 }
 0x1e1   : > { %v7082_v21 = vpop.f32.mrf.mxu0 }
 0x1e3   : > { %v7084_v23 = vpop.f32.mrf.mxu0 }
 0x1e9   : > { %v7072_v15 = vpop.f32.mrf.mxu1 }
 0x1eb   : > { %v7074_v17 = vpop.f32.mrf.mxu1 }
 0x1f1   : > { %v7086_v25 = vpop.f32.mrf.mxu0 }
 0x1f3   : > { %v7088_v28 = vpop.f32.mrf.mxu0 }
 0x1fa   : > { %v7076_v18 = vpop.f32.mrf.mxu1 }
 0x1fc   : > { %v7080_v20 = vpop.f32.mrf.mxu1 }
 0x1fe   : > { %v5928_v54 = vpop.f32.mrf.mxu1 }
 0x1ff   : > { %v1238_v1 = vadd.f32 %v5928_v54, %v5908_v11 }
 0x200   : > { %v1232_v62 = vpop.f32.mrf.mxu1 }
 0x201   : > { %v7090_v30 = vpop.f32.mrf.mxu0  ;;  %v1233_v3 = vadd.f32 %v1232_v62, %v1103_v13 }
 0x202   : > { %v5931_v24 = vpop.f32.mrf.mxu1 }
 0x203   : > { %v7092_v32 = vpop.f32.mrf.mxu0  ;;  %v1248_v22 = vadd.f32 %v5931_v24, %v5911_v14 }
 0x204   : > { %v1242_v26 = vpop.f32.mrf.mxu1 }
 0x205   : > { %v6028_v35 = vpop.f32.mrf.mxu0  ;;  %v1243_v9 = vadd.f32 %v1242_v26, %v1113_v48 }
 0x206   : > { %v5934_v27 = vpop.f32.mrf.mxu1 }
 0x207   : > { %v7094_v38 = vpop.f32.mrf.mxu0 }
 0x208   : > { %v1252_v29 = vpop.f32.mrf.mxu1 }
 0x209   : > { %v7096_v12 = vpop.f32.mrf.mxu0  ;;  %v1253_v14 = vadd.f32 %v1252_v29, %v7074_v17 }
 0x20a   : > { %v5937_v31 = vpop.f32.mrf.mxu1 }
 0x20b   : > { %v7098_v43 = vpop.f32.mrf.mxu0  ;;  %v1268_v24 = vadd.f32 %v5937_v31, %v7076_v18 }
 0x20c   : > { %v1262_v49 = vpop.f32.mrf.mxu1 }
 0x20d   : > { %v7100_v51 = vpop.f32.mrf.mxu0 }
 0x20e   : > { %v5948_v33 = vpop.f32.mrf.mxu1  ;;  %7426 = vst [vmem:[#allocation15_spill] sm:$0xff] %v7100_v51 }
 0x20f   : > { %v7102_v56 = vpop.f32.mrf.mxu0  ;;  %v1414_v4 = vadd.f32 %v5948_v33, %v1238_v1 }
 0x210   : > { %v1374_v34 = vpop.f32.mrf.mxu1  ;;  %7427 = vst [vmem:[#allocation16_spill] sm:$0xff] %v7102_v56 }
 0x211   : > { %v7104_v59 = vpop.f32.mrf.mxu0  ;;  %v1413_v6 = vadd.f32 %v1374_v34, %v1233_v3 }
 0x212   : > { %v5951_v46 = vpop.f32.mrf.mxu1  ;;  %7428 = vst [vmem:[#allocation17_spill] sm:$0xff] %v7104_v59 }
 0x213   : > { %v7106_v63 = vpop.f32.mrf.mxu0  ;;  %v1416_v10 = vadd.f32 %v5951_v46, %v1248_v22 }
 0x214   : > { %v1384_v36 = vpop.f32.mrf.mxu1  ;;  %7429 = vst [vmem:[#allocation18_spill] sm:$0xff] %v7106_v63  ;;  %v1258_v63 = vadd.f32 %v5934_v27, %v7072_v15 }
 0x215   : > { %v6068_v5 = vpop.f32.mrf.mxu0  ;;  %v1415_v59 = vadd.f32 %v1384_v36, %v1243_v9  ;;  %v1263_v9 = vadd.f32 %v1262_v49, %v7080_v20  ;;  %v7120_v49 = vld [vmem:[%s7394_s6] ss:$0 sm:$0xff] }
 0x216   : > { %v5954_v39 = vpop.f32.mrf.mxu1 }
 0x217   : > { %v2275_v45 = vpop.f32.mrf.mxu0  ;;  %v1418_v33 = vadd.f32 %v5954_v39, %v1258_v63 }
 0x218   : > { %v1394_v40 = vpop.f32.mrf.mxu1 }
 0x219   : > { %v6071_v48 = vpop.f32.mrf.mxu0 }
 0x21a   : > { %v5957_v41 = vpop.f32.mrf.mxu1 }
 0x21b   : > { %v2285_v17 = vpop.f32.mrf.mxu0 }
 0x21c   : > { %v1404_v42 = vpop.f32.mrf.mxu1 }
 0x21e   : > { %v5968_v44 = vpop.f32.mrf.mxu1 }
 0x21f   : > { %v1564_v8 = vadd.f32 %v5968_v44, %v1414_v4 }
 0x220   : > { %v1524_v50 = vpop.f32.mrf.mxu1 }
 0x221   : > { %v1563_v7 = vadd.f32 %v1524_v50, %v1413_v6  ;;  %v1714_v51 = vadd.f32 %v5988_v16, %v1564_v8  ;;  %v1420_v16 = vadd.f32 %v5957_v41, %v1268_v24  ;;  %v7431_v8 = vld [vmem:[#allocation16_spill] sm:$0xff] }
 0x222   : > { %v5971_v52 = vpop.f32.mrf.mxu1 }
 0x223   : > { %v1566_v56 = vadd.f32 %v5971_v52, %v1416_v10  ;;  %v1713_v62 = vadd.f32 %v7078_v19, %v1563_v7  ;;  %v1417_v10 = vadd.f32 %v1394_v40, %v1253_v14  ;;  %v1419_v19 = vadd.f32 %v1404_v42, %v1263_v9  ;;  %v6074_v42 = vpop.f32.mrf.mxu0 }
 0x224   : > { %v1534_v55 = vpop.f32.mrf.mxu1 }
 0x225   : > { %v1565_v54 = vadd.f32 %v1534_v55, %v1415_v59  ;;  %v1716_v46 = vadd.f32 %v7082_v21, %v1566_v56  ;;  %v2295_v1 = vpop.f32.mrf.mxu0 }
 0x226   : > { %v5974_v57 = vpop.f32.mrf.mxu1 }
 0x227   : > { %v1568_v15 = vadd.f32 %v5974_v57, %v1418_v33  ;;  %v1715_v44 = vadd.f32 %v7084_v23, %v1565_v54  ;;  %v7432_v33 = vld [vmem:[#allocation17_spill] sm:$0xff] }
 0x228   : > { %v1544_v58 = vpop.f32.mrf.mxu1 }
 0x229   : > { %v1567_v29 = vadd.f32 %v1544_v58, %v1417_v10  ;;  %v1718_v20 = vadd.f32 %v7086_v25, %v1568_v15  ;;  %v7433_v10 = vld [vmem:[#allocation18_spill] sm:$0xff] }
 0x22a   : > { %v5977_v60 = vpop.f32.mrf.mxu1 }
 0x22b   : > { %v1570_v18 = vadd.f32 %v5977_v60, %v1420_v16 }
 0x22c   : > { %v1554_v61 = vpop.f32.mrf.mxu1 }
 0x22d   : > { %v1569_v21 = vadd.f32 %v1554_v61, %v1419_v19  ;;  %v1720_v55 = vadd.f32 %v7090_v30, %v1570_v18 }
 0x22e   : > { %v6008_v0 = vpop.f32.mrf.mxu1 }
 0x22f   : > { %v1864_v13 = vadd.f32 %v6008_v0, %v1714_v51  ;;  %v1719_v61 = vadd.f32 %v7092_v32, %v1569_v21  ;;  %v5544_v32 = vld [vmem:[%s7396_s8] ss:$0 sm:$0xff] }
 0x230   : > { %v1824_v2 = vpop.f32.mrf.mxu1 }
 0x231   : > { %v1863_v34 = vadd.f32 %v1824_v2, %v1713_v62  ;;  %v2015_v7 = vadd.f32 %v6028_v35, %v1864_v13  ;;  %v6077_v13 = vpop.f32.mrf.mxu0 }
 0x232   : > { %v6011_v47 = vpop.f32.mrf.mxu1 }
 0x233   : > { %v1866_v36 = vadd.f32 %v6011_v47, %v1716_v46  ;;  %v2014_v51 = vadd.f32 %v7094_v38, %v1863_v34 }
 0x234   : > { %v1834_v37 = vpop.f32.mrf.mxu1 }
 0x235   : > { %v1865_v39 = vadd.f32 %v1834_v37, %v1715_v44  ;;  %v2017_v41 = vadd.f32 %v7096_v12, %v1866_v36  ;;  %v1717_v37 = vadd.f32 %v7088_v28, %v1567_v29  ;;  %v5543_v12 = vld [vmem:[%s7395_s7] ss:$0 sm:$0xff]  ;;  %v2305_v29 = vpop.f32.mrf.mxu0 }
 0x236   : > { %v6014_v53 = vpop.f32.mrf.mxu1 }
 0x237   : > { %v1868_v52 = vadd.f32 %v6014_v53, %v1718_v20  ;;  %v2016_v58 = vadd.f32 %v7098_v43, %v1865_v39 }
 0x238   : > { %v1844_v11 = vpop.f32.mrf.mxu1 }
 0x239   : > { %v1867_v59 = vadd.f32 %v1844_v11, %v1717_v37 }
 0x23a   : > { %v6017_v26 = vpop.f32.mrf.mxu1 }
 0x23b   : > { %v1870_v60 = vadd.f32 %v6017_v26, %v1720_v55  ;;  %v2018_v11 = vadd.f32 %v7431_v8, %v1867_v59  ;;  %v7173_v8 = vld [vmem:[%s7397_s9 + $0x38] sm:$0xff] }
 0x23c   : > { %v1854_v27 = vpop.f32.mrf.mxu1 }
 0x23d   : > { %v1869_v2 = vadd.f32 %v1854_v27, %v1719_v61 }
 0x23e   : > { %v6048_v31 = vpop.f32.mrf.mxu1 }
 0x23f   : > { %v2165_v50 = vadd.f32 %v6048_v31, %v2015_v7  ;;  %v2020_v16 = vadd.f32 %v7433_v10, %v1869_v2 }
 0x240   : > { %v2125_v40 = vpop.f32.mrf.mxu1 }
 0x241   : > { %v2315_v23 = vadd.f32 %v6068_v5, %v2165_v50  ;;  %v2164_v35 = vadd.f32 %v2125_v40, %v2014_v51 }
 0x242   : > { %v6051_v38 = vpop.f32.mrf.mxu1 }
 0x243   : > { %v2330_v56 = vadd.f32 %v7120_v49, %v2315_v23  ;;  %v2314_v25 = vadd.f32 %v2275_v45, %v2164_v35  ;;  %v2167_v57 = vadd.f32 %v6051_v38, %v2017_v41  ;;  %v7430_v45 = vld [vmem:[#allocation15_spill] sm:$0xff] }
 0x244   : > { %v2135_v53 = vpop.f32.mrf.mxu1  ;;  %v2019_v3 = vadd.f32 %v7430_v45, %v1868_v52  ;;  %v7159_v45 = vld [vmem:[%s7397_s9 + $0x30] sm:$0xff] }
 0x245   : > { %v2338_v63 = vmax.f32 %v2330_v56, 0.0  ;;  %v2329_v28 = vadd.f32 %v7120_v49, %v2314_v25  ;;  %v2317_v30 = vadd.f32 %v6071_v48, %v2167_v57  ;;  %v2166_v0 = vadd.f32 %v2135_v53, %v2016_v58 }
 0x246   : > { %v6054_v4 = vpop.f32.mrf.mxu1  ;;  %v2021_v48 = vadd.f32 %v7432_v33, %v1870_v60  ;;  %v7435_v33 = vld [vmem:[#allocation10_spill] sm:$0xff] }
 0x247   : > { %v2353_v43 = vmul.f32 %v5543_v12, %v2338_v63  ;;  %v2337_v5 = vmax.f32 %v2329_v28, 0.0  ;;  %v2332_v47 = vadd.f32 %v7120_v49, %v2317_v30  ;;  %v2316_v22 = vadd.f32 %v2285_v17, %v2166_v0 }
 0x248   : > { %v2169_v6 = vadd.f32 %v6054_v4, %v2019_v3  ;;  %v2145_v54 = vpop.f32.mrf.mxu1 }
 0x249   : > { %v2352_v62 = vmul.f32 %v5543_v12, %v2337_v5  ;;  %v2340_v14 = vmax.f32 %v2332_v47, 0.0  ;;  %v2331_v24 = vadd.f32 %v7120_v49, %v2316_v22  ;;  %v2368_v26 = vadd.f32 %v5544_v32, %v2353_v43 }
 0x24a   : > { %v2319_v34 = vadd.f32 %v6074_v42, %v2169_v6  ;;  %v2168_v46 = vadd.f32 %v2145_v54, %v2018_v11  ;;  %v6057_v9 = vpop.f32.mrf.mxu1  ;;  %v7434_v6 = vmov 0.0   ;;  %v7178_v11 = vld [vmem:[%s7397_s9 + $0x40] sm:$0xff] }
 0x24b   : > { %v2367_v15 = vadd.f32 %v5544_v32, %v2352_v62  ;;  %v2355_v27 = vmul.f32 %v5543_v12, %v2340_v14  ;;  %v2339_v36 = vmax.f32 %v2331_v24, 0.0  ;;  %v2171_v44 = vadd.f32 %v6057_v9, %v2021_v48  ;;  %v7436_v48 = vld [vmem:[#allocation11_spill] sm:$0xff]  ;;  %v7438_v9 = vld [vmem:[#allocation14_spill] sm:$0xff] }
 0x24c   : > { %v2334_v7 = vadd.f32 %v7120_v49, %v2319_v34  ;;  %v2318_v19 = vadd.f32 %v2295_v1, %v2168_v46  ;;  %v2155_v17 = vpop.f32.mrf.mxu1  ;;  %v7437_v46 = vld [vmem:[#allocation12_spill] sm:$0xff] }
 0x24d   : > { %v2375_v18 = vmax.f32 %v2367_v15, %v2368_v26  ;;  %v2354_v31 = vmul.f32 %v5543_v12, %v2339_v36  ;;  %v2170_v39 = vadd.f32 %v2155_v17, %v2020_v16  ;;  %v2321_v21 = vadd.f32 %v6077_v13, %v2171_v44  ;;  %v7439_v15 = vld [vmem:[#allocation13_spill] sm:$0xff] }
 0x24e   : > { %v2342_v50 = vmax.f32 %v2334_v7, 0.0  ;;  %v2333_v51 = vadd.f32 %v7120_v49, %v2318_v19  ;;  %v2370_v20 = vadd.f32 %v5544_v32, %v2355_v27 }
 0x24f   : > { %2380 = vst.msk [vmem:[#allocation4] sm:$0xff] %vm2379_vm3, %v2375_v18  ;;  %v2369_v40 = vadd.f32 %v5544_v32, %v2354_v31  ;;  %v2320_v23 = vadd.f32 %v2305_v29, %v2170_v39  ;;  %v2336_v42 = vadd.f32 %v7120_v49, %v2321_v21 }
 0x250   : > { %v2357_v35 = vmul.f32 %v5543_v12, %v2342_v50  ;;  %v2341_v41 = vmax.f32 %v2333_v51, 0.0 }
 0x251   : > { %v2376_v52 = vmax.f32 %v2369_v40, %v2370_v20  ;;  %v2335_v37 = vadd.f32 %v7120_v49, %v2320_v23  ;;  %v2344_v38 = vmax.f32 %v2336_v42, 0.0 }
 0x252   : > { %v2356_v55 = vmul.f32 %v5543_v12, %v2341_v41  ;;  %v2372_v25 = vadd.f32 %v5544_v32, %v2357_v35  ;;  %v2493_v35 = vpop.f32.mrf.mxu1 }
 0x253   : > { %2381 = vst.msk [vmem:[#allocation4 + $0x8] sm:$0xff] %vm2379_vm3, %v2376_v52  ;;  %v2343_v56 = vmax.f32 %v2335_v37, 0.0  ;;  %v2359_v58 = vmul.f32 %v5543_v12, %v2344_v38 }
 0x254   : > { %v2371_v57 = vadd.f32 %v5544_v32, %v2356_v55  ;;  %v6082_v41 = vpop.f32.mrf.mxu1 }
 0x255   : > { %v2358_v59 = vmul.f32 %v5543_v12, %v2343_v56  ;;  %v2374_v63 = vadd.f32 %v5544_v32, %v2359_v58  ;;  %v7154_v12 = vld [vmem:[%s7397_s9 + $0x28] sm:$0xff] }
 0x256   : > { %v2377_v60 = vmax.f32 %v2371_v57, %v2372_v25  ;;  %v2391_v61 = vld [vmem:[#allocation4] ss:$2 sm:$0xf]  ;;  %v2393_v53 = vld [vmem:[#allocation4 + $0x1] ss:$2 sm:$0xf]  ;;  %v2566_v37 = vpop.f32.mrf.mxu1 }
 0x257   : > { %v2373_v28 = vadd.f32 %v5544_v32, %v2358_v59  ;;  %v2394_v30 = vmax.f32 %v2391_v61, %v2393_v53  ;;  %v2567_v55 = vadd.f32 %v2566_v37, %v2493_v35  ;;  %v4956_v59 = vld [vmem:[#allocation5 + $0x28] sm:$0xf] }
 0x258   : > { %2382 = vst.msk [vmem:[#allocation4 + $0x10] sm:$0xff] %vm2379_vm3, %v2377_v60  ;;  %v6087_v38 = vpop.f32.mrf.mxu1  ;;  %v5032_v60 = vld [vmem:[#allocation5 + $0x29] sm:$0xf] }
 0x259   : > { %v2378_v0 = vmax.f32 %v2373_v28, %v2374_v63  ;;  %2397 = vst.msk [vmem:[#allocation5 + $0x9] sm:$0xf] %vm2396_vm5, %v2394_v30  ;;  %v5108_v53 = vld [vmem:[#allocation5 + $0x2a] sm:$0xf]  ;;  %v5198_v63 = vld [vmem:[%s7399_s11 + $0x18] sm:$0xff]  ;;  %v5197_v28 = vld [vmem:[%s7399_s11 + $0x10] sm:$0xff] }
 0x25a   : > { %v2399_v49 = vld [vmem:[#allocation4 + $0x8] ss:$2 sm:$0xf]  ;;  %v2401_v1 = vld [vmem:[#allocation4 + $0x9] ss:$2 sm:$0xf]  ;;  %v2642_v57 = vpop.f32.mrf.mxu1 }
 0x25b   : > { %2383 = vst.msk [vmem:[#allocation4 + $0x18] sm:$0xff] %vm2379_vm3, %v2378_v0  ;;  %v2402_v2 = vmax.f32 %v2399_v49, %v2401_v1  ;;  %v2646_v58 = vadd.f32 %v2642_v57, %v2567_v55  ;;  %v5196_v30 = vld [vmem:[%s7399_s11 + $0x8] sm:$0xff]  ;;  %v5195_v0 = vld [vmem:[%s7399_s11] sm:$0xff] }
 0x25c   : > { %v6092_v61 = vpop.f32.mrf.mxu1 }
 0x25d   : > { %2404 = vst.msk [vmem:[#allocation5 + $0x11] sm:$0xf] %vm2396_vm5, %v2402_v2 }
 0x25f   : > { %v2406_v3 = vld [vmem:[#allocation4 + $0x10] ss:$2 sm:$0xf]  ;;  %v2408_v4 = vld [vmem:[#allocation4 + $0x11] ss:$2 sm:$0xf] }
 0x260   : > { %v2647_v43 = vld [vmem:[#allocation5 + $0x8] sm:$0xf]  ;;  %v2409_v5 = vmax.f32 %v2406_v3, %v2408_v4 }
 0x261   : > { %v2724_v32 = vld [vmem:[#allocation5 + $0x9] sm:$0xf]  ;;  %6096 = vmatmul.mubr.msk.f32.vlgmr.msra.gmra.mxu1 %vm2379_vm3, %v2647_v43 }
 0x262   : > { %6101 = vmatmul.mubr.msk.f32.vlgmr.msra.gmra.mxu0 %vm2379_vm3, %v2724_v32  ;;  %v2413_v47 = vld [vmem:[#allocation4 + $0x18] ss:$2 sm:$0xf]  ;;  %v2415_v22 = vld [vmem:[#allocation4 + $0x19] ss:$2 sm:$0xf]  ;;  %6104 = vmatpush3.msra.mxu1 %v7154_v12 }
 0x263   : > { %6109 = vmatpush3.msra.mxu0 %v7159_v45  ;;  %2411 = vst.msk [vmem:[#allocation5 + $0x19] sm:$0xf] %vm2396_vm5, %v2409_v5  ;;  %6105 = vmatprep.mubr.msk.f32.mxu1 %vm6366_vm4, %v7434_v6  ;;  %v2416_v54 = vmax.f32 %v2413_v47, %v2415_v22  ;;  %v2801_v13 = vld [vmem:[#allocation5 + $0xa] sm:$0xf] }
 0x264   : > { %6110 = vmatprep.mubr.msk.f32.mxu0 %vm6366_vm4, %v7434_v6  ;;  %6113 = vmatprep.subr.mxu1 %v7434_v6  ;;  %v2878_v62 = vld [vmem:[#allocation5 + $0x10] sm:$0xf]  ;;  %v3121_v26 = vld [vmem:[#allocation5 + $0x9] sm:$0xf] }
 0x265   : > { %6118 = vmatprep.subr.mxu0 %v7434_v6  ;;  %6106 = vmatmul.mubr.msk.f32.vlgmr.msra.gmra.mxu1 %vm2379_vm3, %v2801_v13  ;;  %2418 = vst.msk [vmem:[#allocation5 + $0x21] sm:$0xf] %vm2396_vm5, %v2416_v54  ;;  %v2955_v14 = vld [vmem:[#allocation5 + $0x11] sm:$0xf]  ;;  %v3119_v34 = vld [vmem:[#allocation5 + $0x8] sm:$0xf] }
 0x266   : > { %6111 = vmatmul.mubr.msk.f32.vlgmr.msra.gmra.mxu0 %vm2379_vm3, %v2878_v62  ;;  %6114 = vmatpush3.msra.mxu1 %v7173_v8  ;;  %v3032_v24 = vld [vmem:[#allocation5 + $0x12] sm:$0xf]  ;;  %v3269_v10 = vld [vmem:[#allocation5 + $0xa] sm:$0xf]  ;;  %v7344_v54 = vld [vmem:[%s7398_s10] ss:$0 sm:$0xff] }
 0x267   : > { %6119 = vmatpush3.msra.mxu0 %v7178_v11  ;;  %6115 = vmatprep.mubr.msk.f32.mxu1 %vm6366_vm4, %v7434_v6  ;;  %v3345_v16 = vld [vmem:[#allocation5 + $0x10] sm:$0xf] }
 0x268   : > { %6120 = vmatprep.mubr.msk.f32.mxu0 %vm6366_vm4, %v7434_v6  ;;  %6123 = vmatprep.subr.mxu1 %v7434_v6  ;;  %v3421_v27 = vld [vmem:[#allocation5 + $0x11] sm:$0xf] }
 0x269   : > { %6128 = vmatprep.subr.mxu0 %v7434_v6  ;;  %6116 = vmatmul.mubr.msk.f32.vlgmr.msra.gmra.mxu1 %vm2379_vm3, %v2955_v14  ;;  %v3497_v36 = vld [vmem:[#allocation5 + $0x12] sm:$0xf] }
 0x26a   : > { %6121 = vmatmul.mubr.msk.f32.vlgmr.msra.gmra.mxu0 %vm2379_vm3, %v3032_v24  ;;  %6124 = vmatpush3.msra.mxu1 %v7435_v33  ;;  %v3573_v44 = vld [vmem:[#allocation5 + $0x18] sm:$0xf]  ;;  %v3812_v17 = vld [vmem:[#allocation5 + $0x11] sm:$0xf] }
 0x26b   : > { %6129 = vmatpush3.msra.mxu0 %v7436_v48  ;;  %6125 = vmatprep.mubr.msk.f32.mxu1 %vm6366_vm4, %v7434_v6  ;;  %v3649_v7 = vld [vmem:[#allocation5 + $0x19] sm:$0xf]  ;;  %v3810_v29 = vld [vmem:[#allocation5 + $0x10] sm:$0xf] }
 0x26c   : > { %6130 = vmatprep.mubr.msk.f32.mxu0 %vm6366_vm4, %v7434_v6  ;;  %6133 = vmatprep.subr.mxu1 %v7434_v6  ;;  %v3725_v19 = vld [vmem:[#allocation5 + $0x1a] sm:$0xf]  ;;  %v3960_v18 = vld [vmem:[#allocation5 + $0x12] sm:$0xf]  ;;  %v4264_v51 = vld [vmem:[#allocation5 + $0x20] sm:$0xf] }
 0x26d   : > { %6138 = vmatprep.subr.mxu0 %v7434_v6  ;;  %6126 = vmatmul.mubr.msk.f32.vlgmr.msra.gmra.mxu1 %vm2379_vm3, %v3121_v26  ;;  %v4036_v31 = vld [vmem:[#allocation5 + $0x18] sm:$0xf]  ;;  %v4340_v21 = vld [vmem:[#allocation5 + $0x21] sm:$0xf] }
 0x26e   : > { %6131 = vmatmul.mubr.msk.f32.vlgmr.msra.gmra.mxu0 %vm2379_vm3, %v3119_v34  ;;  %6134 = vmatpush3.msra.mxu1 %v7437_v46  ;;  %v4112_v39 = vld [vmem:[#allocation5 + $0x19] sm:$0xf]  ;;  %v4416_v20 = vld [vmem:[#allocation5 + $0x22] sm:$0xf] }
 0x26f   : > { %6139 = vmatpush3.msra.mxu0 %v7438_v9  ;;  %6135 = vmatprep.mubr.msk.f32.mxu1 %vm6366_vm4, %v7434_v6  ;;  %v4188_v50 = vld [vmem:[#allocation5 + $0x1a] sm:$0xf]  ;;  %v4727_v52 = vld [vmem:[#allocation5 + $0x20] sm:$0xf] }
 0x270   : > { %6140 = vmatprep.mubr.msk.f32.mxu0 %vm6366_vm4, %v7434_v6  ;;  %6143 = vmatprep.subr.mxu1 %v7434_v6  ;;  %v4503_v40 = vld [vmem:[#allocation5 + $0x19] sm:$0xf]  ;;  %v4803_v56 = vld [vmem:[#allocation5 + $0x21] sm:$0xf] }
 0x271   : > { %6148 = vmatprep.subr.mxu0 %v7434_v6  ;;  %6136 = vmatmul.mubr.msk.f32.vlgmr.msra.gmra.mxu1 %vm2379_vm3, %v3269_v10  ;;  %v4501_v23 = vld [vmem:[#allocation5 + $0x18] sm:$0xf]  ;;  %v4879_v25 = vld [vmem:[#allocation5 + $0x22] sm:$0xf] }
 0x272   : > { %6141 = vmatmul.mubr.msk.f32.vlgmr.msra.gmra.mxu0 %vm2379_vm3, %v3345_v16  ;;  %6144 = vmatpush3.msra.mxu1 %v7439_v15  ;;  %v4651_v42 = vld [vmem:[#allocation5 + $0x1a] sm:$0xf] }
 0x273   : > { %6149 = vmatpush3.msra.mxu0 %v7154_v12  ;;  %6145 = vmatprep.mubr.msk.f32.mxu1 %vm6366_vm4, %v7434_v6 }
 0x274   : > { %6150 = vmatprep.mubr.msk.f32.mxu0 %vm6366_vm4, %v7434_v6  ;;  %6153 = vmatprep.subr.mxu1 %v7434_v6 }
 0x275   : > { %6158 = vmatprep.subr.mxu0 %v7434_v6  ;;  %6146 = vmatmul.mubr.msk.f32.vlgmr.msra.gmra.mxu1 %vm2379_vm3, %v3421_v27 }
 0x276   : > { %6151 = vmatmul.mubr.msk.f32.vlgmr.msra.gmra.mxu0 %vm2379_vm3, %v3497_v36  ;;  %6154 = vmatpush3.msra.mxu1 %v7159_v45 }
 0x277   : > { %6159 = vmatpush3.msra.mxu0 %v7173_v8  ;;  %6155 = vmatprep.mubr.msk.f32.mxu1 %vm6366_vm4, %v7434_v6 }
 0x278   : > { %6160 = vmatprep.mubr.msk.f32.mxu0 %vm6366_vm4, %v7434_v6  ;;  %6163 = vmatprep.subr.mxu1 %v7434_v6 }
 0x279   : > { %6168 = vmatprep.subr.mxu0 %v7434_v6  ;;  %6156 = vmatmul.mubr.msk.f32.vlgmr.msra.gmra.mxu1 %vm2379_vm3, %v3573_v44 }
 0x27a   : > { %6161 = vmatmul.mubr.msk.f32.vlgmr.msra.gmra.mxu0 %vm2379_vm3, %v3649_v7  ;;  %6164 = vmatpush3.msra.mxu1 %v7178_v11 }
 0x27b   : > { %6169 = vmatpush3.msra.mxu0 %v7435_v33  ;;  %6165 = vmatprep.mubr.msk.f32.mxu1 %vm6366_vm4, %v7434_v6 }
 0x27c   : > { %6170 = vmatprep.mubr.msk.f32.mxu0 %vm6366_vm4, %v7434_v6  ;;  %6173 = vmatprep.subr.mxu1 %v7434_v6 }
 0x27d   : > { %6178 = vmatprep.subr.mxu0 %v7434_v6  ;;  %6166 = vmatmul.mubr.msk.f32.vlgmr.msra.gmra.mxu1 %vm2379_vm3, %v3725_v19 }
 0x27e   : > { %6171 = vmatmul.mubr.msk.f32.vlgmr.msra.gmra.mxu0 %vm2379_vm3, %v3812_v17  ;;  %6174 = vmatpush3.msra.mxu1 %v7436_v48 }
 0x27f   : > { %6179 = vmatpush3.msra.mxu0 %v7437_v46  ;;  %6175 = vmatprep.mubr.msk.f32.mxu1 %vm6366_vm4, %v7434_v6 }
 0x280   : > { %6180 = vmatprep.mubr.msk.f32.mxu0 %vm6366_vm4, %v7434_v6  ;;  %6183 = vmatprep.subr.mxu1 %v7434_v6 }
 0x281   : > { %6188 = vmatprep.subr.mxu0 %v7434_v6  ;;  %6176 = vmatmul.mubr.msk.f32.vlgmr.msra.gmra.mxu1 %vm2379_vm3, %v3810_v29 }
 0x282   : > { %6181 = vmatmul.mubr.msk.f32.vlgmr.msra.gmra.mxu0 %vm2379_vm3, %v3960_v18  ;;  %6184 = vmatpush3.msra.mxu1 %v7438_v9 }
 0x283   : > { %6189 = vmatpush3.msra.mxu0 %v7439_v15  ;;  %6185 = vmatprep.mubr.msk.f32.mxu1 %vm6366_vm4, %v7434_v6 }
 0x284   : > { %6190 = vmatprep.mubr.msk.f32.mxu0 %vm6366_vm4, %v7434_v6  ;;  %6193 = vmatprep.subr.mxu1 %v7434_v6 }
 0x285   : > { %6198 = vmatprep.subr.mxu0 %v7434_v6  ;;  %6186 = vmatmul.mubr.msk.f32.vlgmr.msra.gmra.mxu1 %vm2379_vm3, %v4036_v31 }
 0x286   : > { %6191 = vmatmul.mubr.msk.f32.vlgmr.msra.gmra.mxu0 %vm2379_vm3, %v4112_v39  ;;  %6194 = vmatpush3.msra.mxu1 %v7154_v12 }
 0x287   : > { %6199 = vmatpush3.msra.mxu0 %v7159_v45  ;;  %6195 = vmatprep.mubr.msk.f32.mxu1 %vm6366_vm4, %v7434_v6 }
 0x288   : > { %6200 = vmatprep.mubr.msk.f32.mxu0 %vm6366_vm4, %v7434_v6  ;;  %6203 = vmatprep.subr.mxu1 %v7434_v6 }
 0x289   : > { %6208 = vmatprep.subr.mxu0 %v7434_v6  ;;  %6196 = vmatmul.mubr.msk.f32.vlgmr.msra.gmra.mxu1 %vm2379_vm3, %v4188_v50 }
 0x28a   : > { %6201 = vmatmul.mubr.msk.f32.vlgmr.msra.gmra.mxu0 %vm2379_vm3, %v4264_v51  ;;  %6204 = vmatpush3.msra.mxu1 %v7173_v8 }
 0x28b   : > { %6209 = vmatpush3.msra.mxu0 %v7178_v11  ;;  %6205 = vmatprep.mubr.msk.f32.mxu1 %vm6366_vm4, %v7434_v6 }
 0x28c   : > { %6210 = vmatprep.mubr.msk.f32.mxu0 %vm6366_vm4, %v7434_v6  ;;  %6213 = vmatprep.subr.mxu1 %v7434_v6 }
 0x28d   : > { %6218 = vmatprep.subr.mxu0 %v7434_v6  ;;  %6206 = vmatmul.mubr.msk.f32.vlgmr.msra.gmra.mxu1 %vm2379_vm3, %v4340_v21 }
 0x28e   : > { %6211 = vmatmul.mubr.msk.f32.vlgmr.msra.gmra.mxu0 %vm2379_vm3, %v4416_v20  ;;  %6214 = vmatpush3.msra.mxu1 %v7435_v33 }
 0x28f   : > { %6219 = vmatpush3.msra.mxu0 %v7436_v48  ;;  %6215 = vmatprep.mubr.msk.f32.mxu1 %vm6366_vm4, %v7434_v6 }
 0x290   : > { %6220 = vmatprep.mubr.msk.f32.mxu0 %vm6366_vm4, %v7434_v6  ;;  %6223 = vmatprep.subr.mxu1 %v7434_v6 }
 0x291   : > { %6228 = vmatprep.subr.mxu0 %v7434_v6  ;;  %6216 = vmatmul.mubr.msk.f32.vlgmr.msra.gmra.mxu1 %vm2379_vm3, %v4503_v40 }
 0x292   : > { %6221 = vmatmul.mubr.msk.f32.vlgmr.msra.gmra.mxu0 %vm2379_vm3, %v4501_v23  ;;  %6224 = vmatpush3.msra.mxu1 %v7437_v46 }
 0x293   : > { %6229 = vmatpush3.msra.mxu0 %v7438_v9  ;;  %6225 = vmatprep.mubr.msk.f32.mxu1 %vm6366_vm4, %v7434_v6 }
 0x294   : > { %6230 = vmatprep.mubr.msk.f32.mxu0 %vm6366_vm4, %v7434_v6  ;;  %6233 = vmatprep.subr.mxu1 %v7434_v6 }
 0x295   : > { %6238 = vmatprep.subr.mxu0 %v7434_v6  ;;  %6226 = vmatmul.mubr.msk.f32.vlgmr.msra.gmra.mxu1 %vm2379_vm3, %v4651_v42 }
 0x296   : > { %6231 = vmatmul.mubr.msk.f32.vlgmr.msra.gmra.mxu0 %vm2379_vm3, %v4727_v52  ;;  %6234 = vmatpush3.msra.mxu1 %v7439_v15 }
 0x297   : > { %6239 = vmatpush3.msra.mxu0 %v7154_v12  ;;  %6235 = vmatprep.mubr.msk.f32.mxu1 %vm6366_vm4, %v7434_v6 }
 0x298   : > { %6240 = vmatprep.mubr.msk.f32.mxu0 %vm6366_vm4, %v7434_v6  ;;  %6243 = vmatprep.subr.mxu1 %v7434_v6 }
 0x299   : > { %6248 = vmatprep.subr.mxu0 %v7434_v6  ;;  %6236 = vmatmul.mubr.msk.f32.vlgmr.msra.gmra.mxu1 %vm2379_vm3, %v4803_v56 }
 0x29a   : > { %6241 = vmatmul.mubr.msk.f32.vlgmr.msra.gmra.mxu0 %vm2379_vm3, %v4879_v25  ;;  %6244 = vmatpush3.msra.mxu1 %v7159_v45 }
 0x29b   : > { %6249 = vmatpush3.msra.mxu0 %v7173_v8  ;;  %6245 = vmatprep.mubr.msk.f32.mxu1 %vm6366_vm4, %v7434_v6 }
 0x29c   : > { %6250 = vmatprep.mubr.msk.f32.mxu0 %vm6366_vm4, %v7434_v6  ;;  %6253 = vmatprep.subr.mxu1 %v7434_v6 }
 0x29d   : > { %6246 = vmatmul.mubr.msk.f32.vlgmr.msra.gmra.mxu1 %vm2379_vm3, %v4956_v59  ;;  %5263 = vmatprep.subr.mxu0 %v5198_v63 }
 0x29e   : > { %6251 = vmatmul.mubr.msk.f32.vlgmr.msra.gmra.mxu0 %vm2379_vm3, %v5032_v60  ;;  %6254 = vmatpush3.msra.mxu1 %v7178_v11 }
 0x29f   : > { %6255 = vmatprep.mubr.msk.f32.mxu1 %vm6366_vm4, %v7434_v6  ;;  %5299 = vmatprep.mubr.f32.mxu0 %v7434_v6 }
 0x2a0   : > { %5264 = vmatpush1.msra.mxu0 %v5197_v28 }
 0x2a1   : > { %6256 = vmatmul.mubr.msk.f32.vlgmr.msra.gmra.mxu1 %vm2379_vm3, %v5108_v53  ;;  %5265 = vmatprep.subr.mxu0 %v5196_v30 }
 0x2a2   : > { %5266 = vmatpush1.msra.mxu0 %v5195_v0 }
 0x321   : > { %v2719_v49 = vpop.f32.mrf.mxu1 }
 0x322   : > { %v2796_v1 = vpop.f32.mrf.mxu0  ;;  %v2723_v2 = vadd.f32 %v2719_v49, %v2646_v58 }
 0x323   : > { %v6097_v12 = vpop.f32.mrf.mxu1 }
 0x324   : > { %v6102_v45 = vpop.f32.mrf.mxu0  ;;  %v2800_v3 = vadd.f32 %v2796_v1, %v2723_v2 }
 0x325   : > { %v2873_v4 = vpop.f32.mrf.mxu1 }
 0x326   : > { %v2950_v43 = vpop.f32.mrf.mxu0  ;;  %v2877_v32 = vadd.f32 %v2873_v4, %v2800_v3 }
 0x327   : > { %v6107_v5 = vpop.f32.mrf.mxu1 }
 0x328   : > { %v6112_v47 = vpop.f32.mrf.mxu0  ;;  %v2954_v22 = vadd.f32 %v2950_v43, %v2877_v32 }
 0x329   : > { %v3027_v6 = vpop.f32.mrf.mxu1 }
 0x32a   : > { %v3104_v8 = vpop.f32.mrf.mxu0  ;;  %v3031_v11 = vadd.f32 %v3027_v6, %v2954_v22 }
 0x32b   : > { %v6117_v13 = vpop.f32.mrf.mxu1 }
 0x32c   : > { %v6122_v62 = vpop.f32.mrf.mxu0  ;;  %v3108_v14 = vadd.f32 %v3104_v8, %v3031_v11 }
 0x32d   : > { %v3192_v24 = vpop.f32.mrf.mxu1 }
 0x32e   : > { %v3265_v33 = vpop.f32.mrf.mxu0  ;;  %v3116_v48 = vadd.f32 %v7344_v54, %v3108_v14 }
 0x32f   : > { %v6127_v26 = vpop.f32.mrf.mxu1  ;;  %v3266_v46 = vadd.f32 %v3265_v33, %v3192_v24 }
 0x330   : > { %v6132_v34 = vpop.f32.mrf.mxu0  ;;  %3118 = vst.msk [vmem:[#allocation6] sm:$0xf] %vm3117_vm6, %v3116_v48 }
 0x331   : > { %v3340_v9 = vpop.f32.mrf.mxu1 }
 0x332   : > { %v3416_v10 = vpop.f32.mrf.mxu0  ;;  %v3344_v16 = vadd.f32 %v3340_v9, %v3266_v46 }
 0x333   : > { %v6137_v15 = vpop.f32.mrf.mxu1 }
 0x334   : > { %v6142_v27 = vpop.f32.mrf.mxu0  ;;  %v3420_v36 = vadd.f32 %v3416_v10, %v3344_v16 }
 0x335   : > { %v3492_v44 = vpop.f32.mrf.mxu1 }
 0x336   : > { %v3568_v7 = vpop.f32.mrf.mxu0  ;;  %v3496_v19 = vadd.f32 %v3492_v44, %v3420_v36 }
 0x337   : > { %v6147_v17 = vpop.f32.mrf.mxu1 }
 0x338   : > { %v6152_v29 = vpop.f32.mrf.mxu0  ;;  %v3572_v18 = vadd.f32 %v3568_v7, %v3496_v19 }
 0x339   : > { %v3644_v31 = vpop.f32.mrf.mxu1 }
 0x33a   : > { %v3720_v39 = vpop.f32.mrf.mxu0  ;;  %v3648_v50 = vadd.f32 %v3644_v31, %v3572_v18 }
 0x33b   : > { %v6157_v51 = vpop.f32.mrf.mxu1 }
 0x33c   : > { %v6162_v21 = vpop.f32.mrf.mxu0  ;;  %v3724_v20 = vadd.f32 %v3720_v39, %v3648_v50 }
 0x33d   : > { %v3796_v40 = vpop.f32.mrf.mxu1 }
 0x33e   : > { %v3883_v23 = vpop.f32.mrf.mxu0  ;;  %v3800_v35 = vadd.f32 %v3796_v40, %v3724_v20 }
 0x33f   : > { %v6167_v41 = vpop.f32.mrf.mxu1 }
 0x340   : > { %v6172_v42 = vpop.f32.mrf.mxu0  ;;  %v3808_v52 = vadd.f32 %v7344_v54, %v3800_v35 }
 0x341   : > { %v3956_v37 = vpop.f32.mrf.mxu1 }
 0x342   : > { %v4031_v55 = vpop.f32.mrf.mxu0  ;;  %3809 = vst.msk [vmem:[#allocation6 + $0x4] sm:$0xf] %vm3117_vm6, %v3808_v52  ;;  %v3957_v38 = vadd.f32 %v3956_v37, %v3883_v23 }
 0x343   : > { %v6177_v56 = vpop.f32.mrf.mxu1 }
 0x344   : > { %v6182_v25 = vpop.f32.mrf.mxu0  ;;  %v4035_v57 = vadd.f32 %v4031_v55, %v3957_v38 }
 0x345   : > { %v4107_v58 = vpop.f32.mrf.mxu1 }
 0x346   : > { %v4183_v59 = vpop.f32.mrf.mxu0  ;;  %v4111_v60 = vadd.f32 %v4107_v58, %v4035_v57 }
 0x347   : > { %v6187_v61 = vpop.f32.mrf.mxu1 }
 0x348   : > { %v6192_v53 = vpop.f32.mrf.mxu0  ;;  %v4187_v63 = vadd.f32 %v4183_v59, %v4111_v60 }
 0x349   : > { %v4259_v28 = vpop.f32.mrf.mxu1  ;;  %v5193_v0 = vld [vmem:[#allocation6] sm:$0xff] }
 0x34a   : > { %v4335_v30 = vpop.f32.mrf.mxu0  ;;  %v4263_v49 = vadd.f32 %v4259_v28, %v4187_v63  ;;  %5199 = vxpose.xlu0.b32.start [1/2] (short) (narrow) %v5193_v0, 8 }
 0x34b   : > { %v6197_v1 = vpop.f32.mrf.mxu1 }
 0x34c   : > { %v6202_v2 = vpop.f32.mrf.mxu0  ;;  %v4339_v12 = vadd.f32 %v4335_v30, %v4263_v49 }
 0x34d   : > { %v4411_v45 = vpop.f32.mrf.mxu1 }
 0x34e   : > { %v4487_v3 = vpop.f32.mrf.mxu0  ;;  %v4415_v4 = vadd.f32 %v4411_v45, %v4339_v12 }
 0x34f   : > { %v6207_v43 = vpop.f32.mrf.mxu1 }
 0x350   : > { %v6212_v32 = vpop.f32.mrf.mxu0  ;;  %v4491_v5 = vadd.f32 %v4487_v3, %v4415_v4 }
 0x351   : > { %v4574_v47 = vpop.f32.mrf.mxu1 }
 0x352   : > { %v4647_v22 = vpop.f32.mrf.mxu0  ;;  %v4499_v6 = vadd.f32 %v7344_v54, %v4491_v5 }
 0x353   : > { %v6217_v8 = vpop.f32.mrf.mxu1  ;;  %v4648_v13 = vadd.f32 %v4647_v22, %v4574_v47 }
 0x354   : > { %v6222_v11 = vpop.f32.mrf.mxu0  ;;  %4500 = vst.msk [vmem:[#allocation6 + $0x8] sm:$0xf] %vm3117_vm6, %v4499_v6 }
 0x355   : > { %v4722_v62 = vpop.f32.mrf.mxu1 }
 0x356   : > { %v4798_v14 = vpop.f32.mrf.mxu0  ;;  %v4726_v24 = vadd.f32 %v4722_v62, %v4648_v13 }
 0x357   : > { %v6227_v33 = vpop.f32.mrf.mxu1 }
 0x358   : > { %v6232_v48 = vpop.f32.mrf.mxu0  ;;  %v4802_v26 = vadd.f32 %v4798_v14, %v4726_v24 }
 0x359   : > { %v4874_v34 = vpop.f32.mrf.mxu1 }
 0x35a   : > { %v4950_v46 = vpop.f32.mrf.mxu0  ;;  %v4878_v9 = vadd.f32 %v4874_v34, %v4802_v26 }
 0x35b   : > { %v6237_v10 = vpop.f32.mrf.mxu1 }
 0x35c   : > { %v6242_v16 = vpop.f32.mrf.mxu0  ;;  %v4954_v15 = vadd.f32 %v4950_v46, %v4878_v9 }
 0x35d   : > { %v5027_v27 = vpop.f32.mrf.mxu1 }
 0x35e   : > { %v5103_v36 = vpop.f32.mrf.mxu0  ;;  %v5031_v44 = vadd.f32 %v5027_v27, %v4954_v15 }
 0x35f   : > { %v6247_v7 = vpop.f32.mrf.mxu1 }
 0x360   : > { %v6252_v19 = vpop.f32.mrf.mxu0  ;;  %v5107_v17 = vadd.f32 %v5103_v36, %v5031_v44 }
 0x361   : > { %v5179_v29 = vpop.f32.mrf.mxu1 }
 0x362   : > { %v5183_v18 = vadd.f32 %v5179_v29, %v5107_v17 }
 0x363   : > { %v6257_v31 = vpop.f32.mrf.mxu1 }
 0x364   : > { %v5191_v39 = vadd.f32 %v7344_v54, %v5183_v18 }
 0x366   : > { %5192 = vst.msk [vmem:[#allocation6 + $0xc] sm:$0xf] %vm3117_vm6, %v5191_v39 }
 0x36d   : > { %v5194_v50 = vld [vmem:[#allocation6 + $0x8] sm:$0xff] }
 0x36e   : > { %5200 = vxpose.xlu0.b32.end [2/2] (short) (narrow) %v5194_v50, 8 }
 0x3e6   : > { %v5215_v51 = vpop.trf.xlu0 }
 0x3e7   : > { %5617 = vmatmul.mubr.msk.f32.vlgmr.msra.gmra.mxu0 %vm5231_vm7, %v5215_v51 }
 0x4a7   : > { %v5301_v21 = vpop.f32.mrf.mxu0 }
 0x4a8   : > { %6299 = vtanh.f32 %v5301_v21 }
 0x4a9   : > { %v5303_v20 = vpop.f32.mrf.mxu0 }
 0x4aa   : > { %6301 = vtanh.f32 %v5303_v20 }
 0x4b5   : > { %v6300_v40 = vpop.eup %6299 }
 0x4b6   : > { %v5308_v54 = vmul.f32 128.0, %v6300_v40 }
 0x4b7   : > { %v6302_v23 = vpop.eup %6301 }
 0x4b8   : > { %v5309_v35 = vmul.f32 128.0, %v6302_v23 }
 0x4ba   : > { %v5312_v41 = vcombine.low %v5308_v54, %v5309_v35 }
 0x4bc   : > { %5618 = vst.sshfl [vmem:[%s406_s17] sm:$0x33 pattern:$0x76325410] %v5312_v41 }
 0x4bd   : > { %6316 = shalt.err (!%p6313_p3)
}
 0x4be   : > { %s6317_s15 = scalar_lea.hbm %s5335_s26, 64  ;;  %s6321_s17 = scalar_lea.hbm %s7400_s12, 128 }
 0x4bf   : > { %p6318_p4 = scmp.ne.s32.totalorder %s5335_s26, %s6317_s15  ;;  %p6322_p9 = scmp.lt.s32.totalorder %s5335_s26, %s7400_s12 }
 0x4c0   : > { %p6323_p10 = scmp.lt.s32.totalorder %s6321_s17, %s6317_s15 }
 0x4c1   : > { %p6319_p7 = pnand %p6318_p4, %p6471_p5 }
 0x4c2   : > { %p6324_p11 = por %p6323_p10, %p6322_p9 }
 0x4c3   : > { %p6320_p8 = pneg %p6319_p7 }
 0x4c5   : > { %p6325_p12 = pnand %p6324_p11, %p6320_p8 }
 0x4c7   : > { %6328 = shalt.err (!%p6325_p12)
}
 0x4c8   : > { %6258 = dma.vmem_to_hbm [thread:$0]  (%p6471_p5), %s5338_s18, 64, %s5335_s26, %s5323_s28  }
 0x4c9 PF: > { %p6264_p13 = scmp.ge.s32.totalorder %s6363_s24, 2  ;;  %s5349_s0 = sand.u32 1, %s6351_s21  }
 0x4ca   : > { %s5350_s1 = scalar_lea.sflag [#allocation8], %s5349_s0 }
 0x4cb   : > { %p6261_p0 = pnand %p6264_p13, %p6475_p6 }
 0x4cd   : > { %p6262_p1 = pneg %p6261_p0 }
 0x4cf   : > { %6346 = dma.done.wait (%p6262_p1), %s5350_s1, 64  }
 0x4d0   : > { %6348 = vsyncadd (%p6262_p1), %s5350_s1, 4294967232  ;;  %p22_p2 = scmp.ge.s32.totalorder %s6458_s27, 4   ;;  %s7440_s21 = smov %s6355_s22 }
 0x4d1   : > { %s7441_s22 = smov %s6359_s23  ;;  %s7442_s23 = smov %s6469_s30 }
 0x4d2   : > { %s7443_s24 = smov %s6458_s27  ;;  %24 = sbr.rel (!%p22_p2) target bundleno = 7 (0x7), region = 148 }
 0x4d7   :  { %5355 = vsyncpa [#allocation8], 1 }
 0x4d8   :  { %5357 = vsyncpa [#allocation8 + $0x1], 1 }

</bundles_post_ra>
